<compile_context>
chip_gen: v7x
topology: tpu7x:2x2x1
jax: 0.10.0
libtpu: 0.0.40
codegen_flags: <defaults>
</compile_context>

<pallas_src>
import jax
import jax.numpy as jnp
from jax import lax
from jax.experimental import pallas as pl
from jax.experimental.pallas import tpu as pltpu

D = 192            # d_model ("small" -> [384, 192, 192])
NHEAD = 3
HEAD_DIM = D // NHEAD
N_LAYERS = 2
EPS = 1e-5         # nn.LayerNorm default eps

AB_PAD = 64        # pad between fused gated-attn "a" and "b" weight blocks
AB_OFF = D + AB_PAD        # 256: lane-aligned start of the "b" half
AB_W = AB_OFF + D          # 448: fused wa/pad/wb width


def _layernorm(x, g, b):
    mu = jnp.mean(x, axis=-1, keepdims=True)
    var = jnp.mean((x - mu) ** 2, axis=-1, keepdims=True)
    return (x - mu) * lax.rsqrt(var + EPS) * g + b


def hipt_gp_fc_kernel(
    # inputs
    x_ref,
    phi_w_ref, phi_b_ref,
    wqkv_ref, bqkv_ref, wo_ref, bo_ref,
    w1_ref, b1_ref, w2_ref, b2_ref,
    ln1_g_ref, ln1_b_ref, ln2_g_ref, ln2_b_ref,
    wab_ref, bab_ref, wc_ref, bc_ref,
    wr_ref, br_ref, wcls_ref, bcls_ref,
    # outputs
    logits_ref, probs_ref, yhat_ref,
):
    bf16 = jnp.bfloat16
    f32 = jnp.float32

    x = x_ref[0]                                                 # (N, 192) f32

    # ---- global_phi: Linear(192,192) + ReLU (+ Dropout == identity) ----
    h = jnp.maximum(
        jnp.dot(x.astype(bf16), phi_w_ref[...], preferred_element_type=f32)
        + phi_b_ref[...], 0.0)

    # ---- global_transformer: 2 post-norm TransformerEncoderLayers ----
    scale = 1.0 / (HEAD_DIM ** 0.5)
    for l in range(N_LAYERS):
        # Fused QKV: one (N,192) x (192,576) matmul, columns [q | k | v].
        qkv = jnp.dot(h.astype(bf16), wqkv_ref[l],
                      preferred_element_type=f32) + bqkv_ref[l]   # (N, 576)

        heads = []
        for hh in range(NHEAD):
            q_h = qkv[:, hh * HEAD_DIM:(hh + 1) * HEAD_DIM]
            k_h = qkv[:, D + hh * HEAD_DIM: D + (hh + 1) * HEAD_DIM]
            v_h = qkv[:, 2 * D + hh * HEAD_DIM: 2 * D + (hh + 1) * HEAD_DIM]

            # scores = q_h @ k_h^T  (NT form, no explicit transpose)
            s = lax.dot_general(q_h.astype(bf16), k_h.astype(bf16),
                                (((1,), (1,)), ((), ())),
                                preferred_element_type=f32) * scale   # (N, N)
            m = jnp.max(s, axis=-1, keepdims=True)
            e = jnp.exp(s - m)
            p = e * pl.reciprocal(jnp.sum(e, axis=-1, keepdims=True),
                                  approx=True)
            heads.append(jnp.dot(p.astype(bf16), v_h.astype(bf16),
                                 preferred_element_type=f32))         # (N, 64)

        # Single K=192 output projection on the concatenated heads.
        attn_cat = jnp.concatenate(heads, axis=-1)                    # (N, 192)
        attn_out = jnp.dot(attn_cat.astype(bf16), wo_ref[l],
                           preferred_element_type=f32) + bo_ref[l]

        h = _layernorm(h + attn_out, ln1_g_ref[l], ln1_b_ref[l])

        ff = jnp.maximum(
            jnp.dot(h.astype(bf16), w1_ref[l], preferred_element_type=f32)
            + b1_ref[l], 0.0)
        ff = jnp.dot(ff.astype(bf16), w2_ref[l],
                     preferred_element_type=f32) + b2_ref[l]

        h = _layernorm(h + ff, ln2_g_ref[l], ln2_b_ref[l])

    # ---- Attn_Net_Gated pooling (L = D = 192, n_classes = 1) ----
    # Fused wa / wb projection; "b" half starts at lane AB_OFF (= 256, aligned)
    ab = jnp.dot(h.astype(bf16), wab_ref[...],
                 preferred_element_type=f32) + bab_ref[...]           # (N, 448)
    a = jnp.tanh(ab[:, :D])
    zb = ab[:, AB_OFF:AB_OFF + D]
    b = 1.0 / (1.0 + jnp.exp(-zb))                                    # sigmoid
    A = jnp.dot((a * b).astype(bf16), wc_ref[...],
                preferred_element_type=f32) + bc_ref[...]             # (N, 1)

    # softmax over the N tokens, then pooled feature as an MXU contraction
    Am = jnp.max(A, axis=0, keepdims=True)
    Ae = jnp.exp(A - Am)
    Aw = Ae * pl.reciprocal(jnp.sum(Ae, axis=0, keepdims=True), approx=True)
    h_path = lax.dot_general(Aw, h, (((0,), (0,)), ((), ())),
                             preferred_element_type=f32)              # (1, 192)

    # ---- global_rho: Linear + ReLU ----
    h_wsi = jnp.maximum(
        jnp.dot(h_path.astype(bf16), wr_ref[...], preferred_element_type=f32)
        + br_ref[...], 0.0)

    # ---- classifier + softmax + top-1 ----
    logits = jnp.dot(h_wsi.astype(bf16), wcls_ref[...],
                     preferred_element_type=f32) + bcls_ref[...]      # (1, C)
    m = jnp.max(logits, axis=-1, keepdims=True)
    e = jnp.exp(logits - m)
    probs = e / jnp.sum(e, axis=-1, keepdims=True)   # exact: tiny (1, C) divide

    logits_ref[0] = logits
    probs_ref[0] = probs

    # Y_hat = torch.topk(logits, 1, dim=1)[1]  (argmax, first max on ties)
    idx = lax.broadcasted_iota(jnp.int32, logits.shape, 1)
    yhat_ref[0] = jnp.min(jnp.where(logits >= m, idx, jnp.int32(2 ** 30)),
                          axis=-1, keepdims=True)


def init_params(key, n_classes=4):
    """Deterministic synthetic parameters (shapes match the PyTorch module)."""
    ks = list(jax.random.split(key, 32))
    pop = lambda: ks.pop(0)

    def lin(k, fan_in, fan_out):
        # nn.Linear-style uniform(-1/sqrt(fan_in), 1/sqrt(fan_in)); stored (in, out)
        bound = 1.0 / (fan_in ** 0.5)
        kw, kb = jax.random.split(k)
        w = jax.random.uniform(kw, (fan_in, fan_out), jnp.float32, -bound, bound)
        b = jax.random.uniform(kb, (1, fan_out), jnp.float32, -bound, bound)
        return w, b

    p = {}
    p["phi_w"], p["phi_b"] = lin(pop(), D, D)

    def stack_lin(fan_in, fan_out):
        ws, bs = [], []
        for _ in range(N_LAYERS):
            w, b = lin(pop(), fan_in, fan_out)
            ws.append(w); bs.append(b)
        return jnp.stack(ws), jnp.stack(bs)

    p["wq"], p["bq"] = stack_lin(D, D)
    p["wk"], p["bk"] = stack_lin(D, D)
    p["wv"], p["bv"] = stack_lin(D, D)
    p["wo"], p["bo"] = stack_lin(D, D)
    p["w1"], p["b1"] = stack_lin(D, D)   # dim_feedforward = 192
    p["w2"], p["b2"] = stack_lin(D, D)
    ones = jnp.ones((N_LAYERS, 1, D), jnp.float32)
    zeros = jnp.zeros((N_LAYERS, 1, D), jnp.float32)
    p["ln1_g"], p["ln1_b"] = ones, zeros
    p["ln2_g"], p["ln2_b"] = ones, zeros

    p["wa"], p["ba"] = lin(pop(), D, D)
    p["wb"], p["bb"] = lin(pop(), D, D)
    p["wc"], p["bc"] = lin(pop(), D, 1)
    p["wr"], p["br"] = lin(pop(), D, D)
    p["wcls"], p["bcls"] = lin(pop(), D, n_classes)
    return p


def pack_params(p):
    """Fuse / pad / cast weights once, outside the kernel."""
    bf = jnp.bfloat16
    f = {}
    f["phi_w"] = p["phi_w"].astype(bf)
    f["phi_b"] = p["phi_b"]
    f["wqkv"] = jnp.concatenate([p["wq"], p["wk"], p["wv"]], axis=-1).astype(bf)  # (L,192,576)
    f["bqkv"] = jnp.concatenate([p["bq"], p["bk"], p["bv"]], axis=-1)             # (L,1,576)
    f["wo"] = p["wo"].astype(bf)
    f["bo"] = p["bo"]
    f["w1"] = p["w1"].astype(bf)
    f["b1"] = p["b1"]
    f["w2"] = p["w2"].astype(bf)
    f["b2"] = p["b2"]
    f["ln1_g"], f["ln1_b"] = p["ln1_g"], p["ln1_b"]
    f["ln2_g"], f["ln2_b"] = p["ln2_g"], p["ln2_b"]
    zw = jnp.zeros((D, AB_PAD), jnp.float32)
    zb = jnp.zeros((1, AB_PAD), jnp.float32)
    f["wab"] = jnp.concatenate([p["wa"], zw, p["wb"]], axis=-1).astype(bf)        # (192,448)
    f["bab"] = jnp.concatenate([p["ba"], zb, p["bb"]], axis=-1)                   # (1,448)
    f["wc"] = p["wc"].astype(bf)
    f["bc"] = p["bc"]
    f["wr"] = p["wr"].astype(bf)
    f["br"] = p["br"]
    f["wcls"] = p["wcls"].astype(bf)
    f["bcls"] = p["bcls"]
    return f


PACKED_ORDER = [
    "phi_w", "phi_b",
    "wqkv", "bqkv", "wo", "bo",
    "w1", "b1", "w2", "b2",
    "ln1_g", "ln1_b", "ln2_g", "ln2_b",
    "wab", "bab", "wc", "bc", "wr", "br", "wcls", "bcls",
]


@jax.jit
def hipt_gp_fc_forward(x, packed):
    """x: (B, N, 192) float32 — B independent slides (B=1 matches the module)."""
    B, N, _ = x.shape
    n_classes = packed["wcls"].shape[-1]

    def resident(arr):
        nd = arr.ndim
        # Full-array block, constant block index -> stays VMEM-resident across
        # the batch grid (fetched once).
        return pl.BlockSpec(arr.shape, lambda b, _n=nd: (0,) * _n)

    weights = [packed[k] for k in PACKED_ORDER]
    in_specs = ([pl.BlockSpec((1, N, D), lambda b: (b, 0, 0))]
                + [resident(w) for w in weights])
    out_specs = (
        pl.BlockSpec((1, 1, n_classes), lambda b: (b, 0, 0)),
        pl.BlockSpec((1, 1, n_classes), lambda b: (b, 0, 0)),
        pl.BlockSpec((1, 1, 1), lambda b: (b, 0, 0)),
    )

    logits, probs, y_hat = pl.pallas_call(
        hipt_gp_fc_kernel,
        grid=(B,),
        in_specs=in_specs,
        out_specs=out_specs,
        out_shape=(
            jax.ShapeDtypeStruct((B, 1, n_classes), jnp.float32),
            jax.ShapeDtypeStruct((B, 1, n_classes), jnp.float32),
            jax.ShapeDtypeStruct((B, 1, 1), jnp.int32),
        ),
        compiler_params=pltpu.CompilerParams(
            dimension_semantics=("parallel",),     # both TCs on v7x
            vmem_limit_bytes=32 * 1024 * 1024,
        ),
    )(x, *weights)

    # matches PyTorch return: (logits, softmax(logits), Y_hat, None, None)
    return logits[:, 0, :], probs[:, 0, :], y_hat[:, 0, :], None, None


if __name__ == "__main__":
    key = jax.random.PRNGKey(0)
    k_param, k_x = jax.random.split(key)

    B = 2            # slides batched on the parallel grid axis
    N_TOKENS = 8     # number of 4096-region tokens per slide (small)
    N_CLASSES = 4

    x = jax.random.normal(k_x, (B, N_TOKENS, D), jnp.float32)   # h_4096 batch
    params = init_params(k_param, n_classes=N_CLASSES)
    packed = pack_params(params)

    logits, probs, y_hat, _, _ = hipt_gp_fc_forward(x, packed)
    jax.block_until_ready((logits, probs, y_hat))

    assert logits.shape == (B, N_CLASSES) and probs.shape == (B, N_CLASSES)
    assert y_hat.shape == (B, 1)
    assert bool(jnp.all(jnp.isfinite(logits)))
    assert bool(jnp.all(jnp.abs(jnp.sum(probs, axis=-1) - 1.0) < 1e-4))
    assert bool(jnp.all(y_hat[:, 0] ==
                        jnp.argmax(logits, axis=-1).astype(y_hat.dtype)))
    print("KERNEL_OK")
</pallas_src>

<mosaic_0001>
module attributes {stable_mosaic.version = 11 : i64} {
  func.func @hipt_gp_fc_kernel(%arg0: i32, %arg1: memref<1x8x192xf32, #tpu.memory_space<vmem>>, %arg2: memref<192x192xbf16, #tpu.memory_space<vmem>>, %arg3: memref<1x192xf32, #tpu.memory_space<vmem>>, %arg4: memref<2x192x576xbf16, #tpu.memory_space<vmem>>, %arg5: memref<2x1x576xf32, #tpu.memory_space<vmem>>, %arg6: memref<2x192x192xbf16, #tpu.memory_space<vmem>>, %arg7: memref<2x1x192xf32, #tpu.memory_space<vmem>>, %arg8: memref<2x192x192xbf16, #tpu.memory_space<vmem>>, %arg9: memref<2x1x192xf32, #tpu.memory_space<vmem>>, %arg10: memref<2x192x192xbf16, #tpu.memory_space<vmem>>, %arg11: memref<2x1x192xf32, #tpu.memory_space<vmem>>, %arg12: memref<2x1x192xf32, #tpu.memory_space<vmem>>, %arg13: memref<2x1x192xf32, #tpu.memory_space<vmem>>, %arg14: memref<2x1x192xf32, #tpu.memory_space<vmem>>, %arg15: memref<2x1x192xf32, #tpu.memory_space<vmem>>, %arg16: memref<192x448xbf16, #tpu.memory_space<vmem>>, %arg17: memref<1x448xf32, #tpu.memory_space<vmem>>, %arg18: memref<192x1xbf16, #tpu.memory_space<vmem>>, %arg19: memref<1x1xf32, #tpu.memory_space<vmem>>, %arg20: memref<192x192xbf16, #tpu.memory_space<vmem>>, %arg21: memref<1x192xf32, #tpu.memory_space<vmem>>, %arg22: memref<192x4xbf16, #tpu.memory_space<vmem>>, %arg23: memref<1x4xf32, #tpu.memory_space<vmem>>, %arg24: memref<1x1x4xf32, #tpu.memory_space<vmem>>, %arg25: memref<1x1x4xf32, #tpu.memory_space<vmem>>, %arg26: memref<1x1x1xi32, #tpu.memory_space<vmem>>) attributes {dimension_semantics = [#tpu.dimension_semantics<parallel>], iteration_bounds = array<i64: 2>, scalar_prefetch = 0 : i64, scratch_operands = 0 : i64, tpu.core_type = #tpu.core_type<tc>, window_params = [{transform_indices = @transform_0, window_bounds = array<i64: 1, 8, 192>}, {pipeline_mode = #tpu.pipeline_mode<synchronous>, transform_indices = @transform_1, window_bounds = array<i64: 192, 192>}, {pipeline_mode = #tpu.pipeline_mode<synchronous>, transform_indices = @transform_2, window_bounds = array<i64: 1, 192>}, {pipeline_mode = #tpu.pipeline_mode<synchronous>, transform_indices = @transform_3, window_bounds = array<i64: 2, 192, 576>}, {pipeline_mode = #tpu.pipeline_mode<synchronous>, transform_indices = @transform_4, window_bounds = array<i64: 2, 1, 576>}, {pipeline_mode = #tpu.pipeline_mode<synchronous>, transform_indices = @transform_5, window_bounds = array<i64: 2, 192, 192>}, {pipeline_mode = #tpu.pipeline_mode<synchronous>, transform_indices = @transform_6, window_bounds = array<i64: 2, 1, 192>}, {pipeline_mode = #tpu.pipeline_mode<synchronous>, transform_indices = @transform_7, window_bounds = array<i64: 2, 192, 192>}, {pipeline_mode = #tpu.pipeline_mode<synchronous>, transform_indices = @transform_8, window_bounds = array<i64: 2, 1, 192>}, {pipeline_mode = #tpu.pipeline_mode<synchronous>, transform_indices = @transform_9, window_bounds = array<i64: 2, 192, 192>}, {pipeline_mode = #tpu.pipeline_mode<synchronous>, transform_indices = @transform_10, window_bounds = array<i64: 2, 1, 192>}, {pipeline_mode = #tpu.pipeline_mode<synchronous>, transform_indices = @transform_11, window_bounds = array<i64: 2, 1, 192>}, {pipeline_mode = #tpu.pipeline_mode<synchronous>, transform_indices = @transform_12, window_bounds = array<i64: 2, 1, 192>}, {pipeline_mode = #tpu.pipeline_mode<synchronous>, transform_indices = @transform_13, window_bounds = array<i64: 2, 1, 192>}, {pipeline_mode = #tpu.pipeline_mode<synchronous>, transform_indices = @transform_14, window_bounds = array<i64: 2, 1, 192>}, {pipeline_mode = #tpu.pipeline_mode<synchronous>, transform_indices = @transform_15, window_bounds = array<i64: 192, 448>}, {pipeline_mode = #tpu.pipeline_mode<synchronous>, transform_indices = @transform_16, window_bounds = array<i64: 1, 448>}, {pipeline_mode = #tpu.pipeline_mode<synchronous>, transform_indices = @transform_17, window_bounds = array<i64: 192, 1>}, {pipeline_mode = #tpu.pipeline_mode<synchronous>, transform_indices = @transform_18, window_bounds = array<i64: 1, 1>}, {pipeline_mode = #tpu.pipeline_mode<synchronous>, transform_indices = @transform_19, window_bounds = array<i64: 192, 192>}, {pipeline_mode = #tpu.pipeline_mode<synchronous>, transform_indices = @transform_20, window_bounds = array<i64: 1, 192>}, {pipeline_mode = #tpu.pipeline_mode<synchronous>, transform_indices = @transform_21, window_bounds = array<i64: 192, 4>}, {pipeline_mode = #tpu.pipeline_mode<synchronous>, transform_indices = @transform_22, window_bounds = array<i64: 1, 4>}, {transform_indices = @transform_23, window_bounds = array<i64: 1, 1, 4>}, {transform_indices = @transform_24, window_bounds = array<i64: 1, 1, 4>}, {transform_indices = @transform_25, window_bounds = array<i64: 1, 1, 1>}]} {
    %c0 = arith.constant 0 : index
    %c0_0 = arith.constant 0 : index
    %c0_1 = arith.constant 0 : index
    %0 = vector.load %arg1[%c0, %c0_0, %c0_1] : memref<1x8x192xf32, #tpu.memory_space<vmem>>, vector<1x8x192xf32>
    %1 = vector.shape_cast %0 : vector<1x8x192xf32> to vector<8x192xf32>
    %2 = arith.truncf %1 : vector<8x192xf32> to vector<8x192xbf16>
    %c0_2 = arith.constant 0 : index
    %c0_3 = arith.constant 0 : index
    %3 = vector.load %arg2[%c0_2, %c0_3] : memref<192x192xbf16, #tpu.memory_space<vmem>>, vector<192x192xbf16>
    %cst = arith.constant dense<0.000000e+00> : vector<8x192xf32>
    %4 = tpu.matmul %2, %3, %cst {dimension_numbers = #tpu.dot_dimension_numbers<[1], [0], [0], [1], [0, 0, 1, 1], [], []>} : vector<8x192xbf16>, vector<192x192xbf16>, vector<8x192xf32> -> vector<8x192xf32>
    %c0_4 = arith.constant 0 : index
    %c0_5 = arith.constant 0 : index
    %5 = vector.load %arg3[%c0_4, %c0_5] : memref<1x192xf32, #tpu.memory_space<vmem>>, vector<1x192xf32>
    %6 = vector.broadcast %5 : vector<1x192xf32> to vector<8x192xf32>
    %7 = arith.addf %4, %6 : vector<8x192xf32>
    %cst_6 = arith.constant 0.000000e+00 : f32
    %8 = vector.broadcast %cst_6 : f32 to vector<8x192xf32>
    %9 = arith.maximumf %7, %8 : vector<8x192xf32>
    %10 = arith.truncf %9 : vector<8x192xf32> to vector<8x192xbf16>
    %c0_7 = arith.constant 0 : index
    %c0_8 = arith.constant 0 : index
    %c0_9 = arith.constant 0 : index
    %11 = vector.load %arg4[%c0_7, %c0_8, %c0_9] : memref<2x192x576xbf16, #tpu.memory_space<vmem>>, vector<1x192x576xbf16>
    %12 = vector.shape_cast %11 : vector<1x192x576xbf16> to vector<192x576xbf16>
    %cst_10 = arith.constant dense<0.000000e+00> : vector<8x576xf32>
    %13 = tpu.matmul %10, %12, %cst_10 {dimension_numbers = #tpu.dot_dimension_numbers<[1], [0], [0], [1], [0, 0, 1, 1], [], []>} : vector<8x192xbf16>, vector<192x576xbf16>, vector<8x576xf32> -> vector<8x576xf32>
    %c0_11 = arith.constant 0 : index
    %c0_12 = arith.constant 0 : index
    %c0_13 = arith.constant 0 : index
    %14 = vector.load %arg5[%c0_11, %c0_12, %c0_13] : memref<2x1x576xf32, #tpu.memory_space<vmem>>, vector<1x1x576xf32>
    %15 = vector.shape_cast %14 : vector<1x1x576xf32> to vector<1x576xf32>
    %16 = vector.broadcast %15 : vector<1x576xf32> to vector<8x576xf32>
    %17 = arith.addf %13, %16 : vector<8x576xf32>
    %18 = vector.extract_strided_slice %17 {offsets = [0, 0], sizes = [8, 64], strides = [1, 1]} : vector<8x576xf32> to vector<8x64xf32>
    %19 = vector.extract_strided_slice %17 {offsets = [0, 192], sizes = [8, 64], strides = [1, 1]} : vector<8x576xf32> to vector<8x64xf32>
    %20 = vector.extract_strided_slice %17 {offsets = [0, 384], sizes = [8, 64], strides = [1, 1]} : vector<8x576xf32> to vector<8x64xf32>
    %21 = arith.truncf %18 : vector<8x64xf32> to vector<8x64xbf16>
    %22 = arith.truncf %19 : vector<8x64xf32> to vector<8x64xbf16>
    %cst_14 = arith.constant dense<0.000000e+00> : vector<8x8xf32>
    %23 = tpu.matmul %21, %22, %cst_14 {dimension_numbers = #tpu.dot_dimension_numbers<[1], [1], [0], [0], [0, 0, 1, 0], [], []>} : vector<8x64xbf16>, vector<8x64xbf16>, vector<8x8xf32> -> vector<8x8xf32>
    %cst_15 = arith.constant 1.250000e-01 : f32
    %24 = vector.broadcast %cst_15 : f32 to vector<8x8xf32>
    %25 = arith.mulf %23, %24 : vector<8x8xf32>
    %cst_16 = arith.constant dense<0xFF800000> : vector<8xf32>
    %26 = vector.multi_reduction <maximumf>, %25, %cst_16 [1] : vector<8x8xf32> to vector<8xf32>
    %27 = vector.shape_cast %26 : vector<8xf32> to vector<8x1xf32>
    %28 = vector.broadcast %27 : vector<8x1xf32> to vector<8x8xf32>
    %29 = arith.subf %25, %28 : vector<8x8xf32>
    %30 = math.exp %29 : vector<8x8xf32>
    %cst_17 = arith.constant dense<0.000000e+00> : vector<8xf32>
    %31 = vector.multi_reduction <add>, %30, %cst_17 [1] : vector<8x8xf32> to vector<8xf32>
    %32 = vector.shape_cast %31 : vector<8xf32> to vector<8x1xf32>
    %33 = tpu.reciprocal %32 {approx = true} : vector<8x1xf32> -> vector<8x1xf32>
    %34 = vector.broadcast %33 : vector<8x1xf32> to vector<8x8xf32>
    %35 = arith.mulf %30, %34 : vector<8x8xf32>
    %36 = arith.truncf %35 : vector<8x8xf32> to vector<8x8xbf16>
    %37 = arith.truncf %20 : vector<8x64xf32> to vector<8x64xbf16>
    %cst_18 = arith.constant dense<0.000000e+00> : vector<8x64xf32>
    %38 = tpu.matmul %36, %37, %cst_18 {dimension_numbers = #tpu.dot_dimension_numbers<[1], [0], [0], [1], [0, 0, 1, 1], [], []>} : vector<8x8xbf16>, vector<8x64xbf16>, vector<8x64xf32> -> vector<8x64xf32>
    %39 = vector.extract_strided_slice %17 {offsets = [0, 64], sizes = [8, 64], strides = [1, 1]} : vector<8x576xf32> to vector<8x64xf32>
    %40 = vector.extract_strided_slice %17 {offsets = [0, 256], sizes = [8, 64], strides = [1, 1]} : vector<8x576xf32> to vector<8x64xf32>
    %41 = vector.extract_strided_slice %17 {offsets = [0, 448], sizes = [8, 64], strides = [1, 1]} : vector<8x576xf32> to vector<8x64xf32>
    %42 = arith.truncf %39 : vector<8x64xf32> to vector<8x64xbf16>
    %43 = arith.truncf %40 : vector<8x64xf32> to vector<8x64xbf16>
    %cst_19 = arith.constant dense<0.000000e+00> : vector<8x8xf32>
    %44 = tpu.matmul %42, %43, %cst_19 {dimension_numbers = #tpu.dot_dimension_numbers<[1], [1], [0], [0], [0, 0, 1, 0], [], []>} : vector<8x64xbf16>, vector<8x64xbf16>, vector<8x8xf32> -> vector<8x8xf32>
    %cst_20 = arith.constant 1.250000e-01 : f32
    %45 = vector.broadcast %cst_20 : f32 to vector<8x8xf32>
    %46 = arith.mulf %44, %45 : vector<8x8xf32>
    %cst_21 = arith.constant dense<0xFF800000> : vector<8xf32>
    %47 = vector.multi_reduction <maximumf>, %46, %cst_21 [1] : vector<8x8xf32> to vector<8xf32>
    %48 = vector.shape_cast %47 : vector<8xf32> to vector<8x1xf32>
    %49 = vector.broadcast %48 : vector<8x1xf32> to vector<8x8xf32>
    %50 = arith.subf %46, %49 : vector<8x8xf32>
    %51 = math.exp %50 : vector<8x8xf32>
    %cst_22 = arith.constant dense<0.000000e+00> : vector<8xf32>
    %52 = vector.multi_reduction <add>, %51, %cst_22 [1] : vector<8x8xf32> to vector<8xf32>
    %53 = vector.shape_cast %52 : vector<8xf32> to vector<8x1xf32>
    %54 = tpu.reciprocal %53 {approx = true} : vector<8x1xf32> -> vector<8x1xf32>
    %55 = vector.broadcast %54 : vector<8x1xf32> to vector<8x8xf32>
    %56 = arith.mulf %51, %55 : vector<8x8xf32>
    %57 = arith.truncf %56 : vector<8x8xf32> to vector<8x8xbf16>
    %58 = arith.truncf %41 : vector<8x64xf32> to vector<8x64xbf16>
    %cst_23 = arith.constant dense<0.000000e+00> : vector<8x64xf32>
    %59 = tpu.matmul %57, %58, %cst_23 {dimension_numbers = #tpu.dot_dimension_numbers<[1], [0], [0], [1], [0, 0, 1, 1], [], []>} : vector<8x8xbf16>, vector<8x64xbf16>, vector<8x64xf32> -> vector<8x64xf32>
    %60 = vector.extract_strided_slice %17 {offsets = [0, 128], sizes = [8, 64], strides = [1, 1]} : vector<8x576xf32> to vector<8x64xf32>
    %61 = vector.extract_strided_slice %17 {offsets = [0, 320], sizes = [8, 64], strides = [1, 1]} : vector<8x576xf32> to vector<8x64xf32>
    %62 = vector.extract_strided_slice %17 {offsets = [0, 512], sizes = [8, 64], strides = [1, 1]} : vector<8x576xf32> to vector<8x64xf32>
    %63 = arith.truncf %60 : vector<8x64xf32> to vector<8x64xbf16>
    %64 = arith.truncf %61 : vector<8x64xf32> to vector<8x64xbf16>
    %cst_24 = arith.constant dense<0.000000e+00> : vector<8x8xf32>
    %65 = tpu.matmul %63, %64, %cst_24 {dimension_numbers = #tpu.dot_dimension_numbers<[1], [1], [0], [0], [0, 0, 1, 0], [], []>} : vector<8x64xbf16>, vector<8x64xbf16>, vector<8x8xf32> -> vector<8x8xf32>
    %cst_25 = arith.constant 1.250000e-01 : f32
    %66 = vector.broadcast %cst_25 : f32 to vector<8x8xf32>
    %67 = arith.mulf %65, %66 : vector<8x8xf32>
    %cst_26 = arith.constant dense<0xFF800000> : vector<8xf32>
    %68 = vector.multi_reduction <maximumf>, %67, %cst_26 [1] : vector<8x8xf32> to vector<8xf32>
    %69 = vector.shape_cast %68 : vector<8xf32> to vector<8x1xf32>
    %70 = vector.broadcast %69 : vector<8x1xf32> to vector<8x8xf32>
    %71 = arith.subf %67, %70 : vector<8x8xf32>
    %72 = math.exp %71 : vector<8x8xf32>
    %cst_27 = arith.constant dense<0.000000e+00> : vector<8xf32>
    %73 = vector.multi_reduction <add>, %72, %cst_27 [1] : vector<8x8xf32> to vector<8xf32>
    %74 = vector.shape_cast %73 : vector<8xf32> to vector<8x1xf32>
    %75 = tpu.reciprocal %74 {approx = true} : vector<8x1xf32> -> vector<8x1xf32>
    %76 = vector.broadcast %75 : vector<8x1xf32> to vector<8x8xf32>
    %77 = arith.mulf %72, %76 : vector<8x8xf32>
    %78 = arith.truncf %77 : vector<8x8xf32> to vector<8x8xbf16>
    %79 = arith.truncf %62 : vector<8x64xf32> to vector<8x64xbf16>
    %cst_28 = arith.constant dense<0.000000e+00> : vector<8x64xf32>
    %80 = tpu.matmul %78, %79, %cst_28 {dimension_numbers = #tpu.dot_dimension_numbers<[1], [0], [0], [1], [0, 0, 1, 1], [], []>} : vector<8x8xbf16>, vector<8x64xbf16>, vector<8x64xf32> -> vector<8x64xf32>
    %81 = tpu.concatenate %38, %59, %80 in 1 : vector<8x64xf32>, vector<8x64xf32>, vector<8x64xf32> -> vector<8x192xf32>
    %82 = arith.truncf %81 : vector<8x192xf32> to vector<8x192xbf16>
    %c0_29 = arith.constant 0 : index
    %c0_30 = arith.constant 0 : index
    %c0_31 = arith.constant 0 : index
    %83 = vector.load %arg6[%c0_29, %c0_30, %c0_31] : memref<2x192x192xbf16, #tpu.memory_space<vmem>>, vector<1x192x192xbf16>
    %84 = vector.shape_cast %83 : vector<1x192x192xbf16> to vector<192x192xbf16>
    %cst_32 = arith.constant dense<0.000000e+00> : vector<8x192xf32>
    %85 = tpu.matmul %82, %84, %cst_32 {dimension_numbers = #tpu.dot_dimension_numbers<[1], [0], [0], [1], [0, 0, 1, 1], [], []>} : vector<8x192xbf16>, vector<192x192xbf16>, vector<8x192xf32> -> vector<8x192xf32>
    %c0_33 = arith.constant 0 : index
    %c0_34 = arith.constant 0 : index
    %c0_35 = arith.constant 0 : index
    %86 = vector.load %arg7[%c0_33, %c0_34, %c0_35] : memref<2x1x192xf32, #tpu.memory_space<vmem>>, vector<1x1x192xf32>
    %87 = vector.shape_cast %86 : vector<1x1x192xf32> to vector<1x192xf32>
    %88 = vector.broadcast %87 : vector<1x192xf32> to vector<8x192xf32>
    %89 = arith.addf %85, %88 : vector<8x192xf32>
    %90 = arith.addf %9, %89 : vector<8x192xf32>
    %c0_36 = arith.constant 0 : index
    %c0_37 = arith.constant 0 : index
    %c0_38 = arith.constant 0 : index
    %91 = vector.load %arg12[%c0_36, %c0_37, %c0_38] : memref<2x1x192xf32, #tpu.memory_space<vmem>>, vector<1x1x192xf32>
    %92 = vector.shape_cast %91 : vector<1x1x192xf32> to vector<1x192xf32>
    %c0_39 = arith.constant 0 : index
    %c0_40 = arith.constant 0 : index
    %c0_41 = arith.constant 0 : index
    %93 = vector.load %arg13[%c0_39, %c0_40, %c0_41] : memref<2x1x192xf32, #tpu.memory_space<vmem>>, vector<1x1x192xf32>
    %94 = vector.shape_cast %93 : vector<1x1x192xf32> to vector<1x192xf32>
    %cst_42 = arith.constant dense<0.000000e+00> : vector<8xf32>
    %95 = vector.multi_reduction <add>, %90, %cst_42 [1] : vector<8x192xf32> to vector<8xf32>
    %96 = vector.shape_cast %95 : vector<8xf32> to vector<8x1xf32>
    %cst_43 = arith.constant 1.920000e+02 : f32
    %97 = vector.broadcast %cst_43 : f32 to vector<8x1xf32>
    %98 = arith.divf %96, %97 : vector<8x1xf32>
    %99 = vector.broadcast %98 : vector<8x1xf32> to vector<8x192xf32>
    %100 = arith.subf %90, %99 : vector<8x192xf32>
    %101 = arith.mulf %100, %100 : vector<8x192xf32>
    %cst_44 = arith.constant dense<0.000000e+00> : vector<8xf32>
    %102 = vector.multi_reduction <add>, %101, %cst_44 [1] : vector<8x192xf32> to vector<8xf32>
    %103 = vector.shape_cast %102 : vector<8xf32> to vector<8x1xf32>
    %cst_45 = arith.constant 1.920000e+02 : f32
    %104 = vector.broadcast %cst_45 : f32 to vector<8x1xf32>
    %105 = arith.divf %103, %104 : vector<8x1xf32>
    %106 = vector.broadcast %98 : vector<8x1xf32> to vector<8x192xf32>
    %107 = arith.subf %90, %106 : vector<8x192xf32>
    %cst_46 = arith.constant 9.99999974E-6 : f32
    %108 = vector.broadcast %cst_46 : f32 to vector<8x1xf32>
    %109 = arith.addf %105, %108 : vector<8x1xf32>
    %110 = math.rsqrt %109 : vector<8x1xf32>
    %111 = vector.broadcast %110 : vector<8x1xf32> to vector<8x192xf32>
    %112 = arith.mulf %107, %111 : vector<8x192xf32>
    %113 = vector.broadcast %92 : vector<1x192xf32> to vector<8x192xf32>
    %114 = arith.mulf %112, %113 : vector<8x192xf32>
    %115 = vector.broadcast %94 : vector<1x192xf32> to vector<8x192xf32>
    %116 = arith.addf %114, %115 : vector<8x192xf32>
    %117 = arith.truncf %116 : vector<8x192xf32> to vector<8x192xbf16>
    %c0_47 = arith.constant 0 : index
    %c0_48 = arith.constant 0 : index
    %c0_49 = arith.constant 0 : index
    %118 = vector.load %arg8[%c0_47, %c0_48, %c0_49] : memref<2x192x192xbf16, #tpu.memory_space<vmem>>, vector<1x192x192xbf16>
    %119 = vector.shape_cast %118 : vector<1x192x192xbf16> to vector<192x192xbf16>
    %cst_50 = arith.constant dense<0.000000e+00> : vector<8x192xf32>
    %120 = tpu.matmul %117, %119, %cst_50 {dimension_numbers = #tpu.dot_dimension_numbers<[1], [0], [0], [1], [0, 0, 1, 1], [], []>} : vector<8x192xbf16>, vector<192x192xbf16>, vector<8x192xf32> -> vector<8x192xf32>
    %c0_51 = arith.constant 0 : index
    %c0_52 = arith.constant 0 : index
    %c0_53 = arith.constant 0 : index
    %121 = vector.load %arg9[%c0_51, %c0_52, %c0_53] : memref<2x1x192xf32, #tpu.memory_space<vmem>>, vector<1x1x192xf32>
    %122 = vector.shape_cast %121 : vector<1x1x192xf32> to vector<1x192xf32>
    %123 = vector.broadcast %122 : vector<1x192xf32> to vector<8x192xf32>
    %124 = arith.addf %120, %123 : vector<8x192xf32>
    %cst_54 = arith.constant 0.000000e+00 : f32
    %125 = vector.broadcast %cst_54 : f32 to vector<8x192xf32>
    %126 = arith.maximumf %124, %125 : vector<8x192xf32>
    %127 = arith.truncf %126 : vector<8x192xf32> to vector<8x192xbf16>
    %c0_55 = arith.constant 0 : index
    %c0_56 = arith.constant 0 : index
    %c0_57 = arith.constant 0 : index
    %128 = vector.load %arg10[%c0_55, %c0_56, %c0_57] : memref<2x192x192xbf16, #tpu.memory_space<vmem>>, vector<1x192x192xbf16>
    %129 = vector.shape_cast %128 : vector<1x192x192xbf16> to vector<192x192xbf16>
    %cst_58 = arith.constant dense<0.000000e+00> : vector<8x192xf32>
    %130 = tpu.matmul %127, %129, %cst_58 {dimension_numbers = #tpu.dot_dimension_numbers<[1], [0], [0], [1], [0, 0, 1, 1], [], []>} : vector<8x192xbf16>, vector<192x192xbf16>, vector<8x192xf32> -> vector<8x192xf32>
    %c0_59 = arith.constant 0 : index
    %c0_60 = arith.constant 0 : index
    %c0_61 = arith.constant 0 : index
    %131 = vector.load %arg11[%c0_59, %c0_60, %c0_61] : memref<2x1x192xf32, #tpu.memory_space<vmem>>, vector<1x1x192xf32>
    %132 = vector.shape_cast %131 : vector<1x1x192xf32> to vector<1x192xf32>
    %133 = vector.broadcast %132 : vector<1x192xf32> to vector<8x192xf32>
    %134 = arith.addf %130, %133 : vector<8x192xf32>
    %135 = arith.addf %116, %134 : vector<8x192xf32>
    %c0_62 = arith.constant 0 : index
    %c0_63 = arith.constant 0 : index
    %c0_64 = arith.constant 0 : index
    %136 = vector.load %arg14[%c0_62, %c0_63, %c0_64] : memref<2x1x192xf32, #tpu.memory_space<vmem>>, vector<1x1x192xf32>
    %137 = vector.shape_cast %136 : vector<1x1x192xf32> to vector<1x192xf32>
    %c0_65 = arith.constant 0 : index
    %c0_66 = arith.constant 0 : index
    %c0_67 = arith.constant 0 : index
    %138 = vector.load %arg15[%c0_65, %c0_66, %c0_67] : memref<2x1x192xf32, #tpu.memory_space<vmem>>, vector<1x1x192xf32>
    %139 = vector.shape_cast %138 : vector<1x1x192xf32> to vector<1x192xf32>
    %cst_68 = arith.constant dense<0.000000e+00> : vector<8xf32>
    %140 = vector.multi_reduction <add>, %135, %cst_68 [1] : vector<8x192xf32> to vector<8xf32>
    %141 = vector.shape_cast %140 : vector<8xf32> to vector<8x1xf32>
    %cst_69 = arith.constant 1.920000e+02 : f32
    %142 = vector.broadcast %cst_69 : f32 to vector<8x1xf32>
    %143 = arith.divf %141, %142 : vector<8x1xf32>
    %144 = vector.broadcast %143 : vector<8x1xf32> to vector<8x192xf32>
    %145 = arith.subf %135, %144 : vector<8x192xf32>
    %146 = arith.mulf %145, %145 : vector<8x192xf32>
    %cst_70 = arith.constant dense<0.000000e+00> : vector<8xf32>
    %147 = vector.multi_reduction <add>, %146, %cst_70 [1] : vector<8x192xf32> to vector<8xf32>
    %148 = vector.shape_cast %147 : vector<8xf32> to vector<8x1xf32>
    %cst_71 = arith.constant 1.920000e+02 : f32
    %149 = vector.broadcast %cst_71 : f32 to vector<8x1xf32>
    %150 = arith.divf %148, %149 : vector<8x1xf32>
    %151 = vector.broadcast %143 : vector<8x1xf32> to vector<8x192xf32>
    %152 = arith.subf %135, %151 : vector<8x192xf32>
    %cst_72 = arith.constant 9.99999974E-6 : f32
    %153 = vector.broadcast %cst_72 : f32 to vector<8x1xf32>
    %154 = arith.addf %150, %153 : vector<8x1xf32>
    %155 = math.rsqrt %154 : vector<8x1xf32>
    %156 = vector.broadcast %155 : vector<8x1xf32> to vector<8x192xf32>
    %157 = arith.mulf %152, %156 : vector<8x192xf32>
    %158 = vector.broadcast %137 : vector<1x192xf32> to vector<8x192xf32>
    %159 = arith.mulf %157, %158 : vector<8x192xf32>
    %160 = vector.broadcast %139 : vector<1x192xf32> to vector<8x192xf32>
    %161 = arith.addf %159, %160 : vector<8x192xf32>
    %162 = arith.truncf %161 : vector<8x192xf32> to vector<8x192xbf16>
    %c1 = arith.constant 1 : index
    %c0_73 = arith.constant 0 : index
    %c0_74 = arith.constant 0 : index
    %163 = vector.load %arg4[%c1, %c0_73, %c0_74] : memref<2x192x576xbf16, #tpu.memory_space<vmem>>, vector<1x192x576xbf16>
    %164 = vector.shape_cast %163 : vector<1x192x576xbf16> to vector<192x576xbf16>
    %cst_75 = arith.constant dense<0.000000e+00> : vector<8x576xf32>
    %165 = tpu.matmul %162, %164, %cst_75 {dimension_numbers = #tpu.dot_dimension_numbers<[1], [0], [0], [1], [0, 0, 1, 1], [], []>} : vector<8x192xbf16>, vector<192x576xbf16>, vector<8x576xf32> -> vector<8x576xf32>
    %c1_76 = arith.constant 1 : index
    %c0_77 = arith.constant 0 : index
    %c0_78 = arith.constant 0 : index
    %166 = vector.load %arg5[%c1_76, %c0_77, %c0_78] : memref<2x1x576xf32, #tpu.memory_space<vmem>>, vector<1x1x576xf32>
    %167 = vector.shape_cast %166 : vector<1x1x576xf32> to vector<1x576xf32>
    %168 = vector.broadcast %167 : vector<1x576xf32> to vector<8x576xf32>
    %169 = arith.addf %165, %168 : vector<8x576xf32>
    %170 = vector.extract_strided_slice %169 {offsets = [0, 0], sizes = [8, 64], strides = [1, 1]} : vector<8x576xf32> to vector<8x64xf32>
    %171 = vector.extract_strided_slice %169 {offsets = [0, 192], sizes = [8, 64], strides = [1, 1]} : vector<8x576xf32> to vector<8x64xf32>
    %172 = vector.extract_strided_slice %169 {offsets = [0, 384], sizes = [8, 64], strides = [1, 1]} : vector<8x576xf32> to vector<8x64xf32>
    %173 = arith.truncf %170 : vector<8x64xf32> to vector<8x64xbf16>
    %174 = arith.truncf %171 : vector<8x64xf32> to vector<8x64xbf16>
    %cst_79 = arith.constant dense<0.000000e+00> : vector<8x8xf32>
    %175 = tpu.matmul %173, %174, %cst_79 {dimension_numbers = #tpu.dot_dimension_numbers<[1], [1], [0], [0], [0, 0, 1, 0], [], []>} : vector<8x64xbf16>, vector<8x64xbf16>, vector<8x8xf32> -> vector<8x8xf32>
    %cst_80 = arith.constant 1.250000e-01 : f32
    %176 = vector.broadcast %cst_80 : f32 to vector<8x8xf32>
    %177 = arith.mulf %175, %176 : vector<8x8xf32>
    %cst_81 = arith.constant dense<0xFF800000> : vector<8xf32>
    %178 = vector.multi_reduction <maximumf>, %177, %cst_81 [1] : vector<8x8xf32> to vector<8xf32>
    %179 = vector.shape_cast %178 : vector<8xf32> to vector<8x1xf32>
    %180 = vector.broadcast %179 : vector<8x1xf32> to vector<8x8xf32>
    %181 = arith.subf %177, %180 : vector<8x8xf32>
    %182 = math.exp %181 : vector<8x8xf32>
    %cst_82 = arith.constant dense<0.000000e+00> : vector<8xf32>
    %183 = vector.multi_reduction <add>, %182, %cst_82 [1] : vector<8x8xf32> to vector<8xf32>
    %184 = vector.shape_cast %183 : vector<8xf32> to vector<8x1xf32>
    %185 = tpu.reciprocal %184 {approx = true} : vector<8x1xf32> -> vector<8x1xf32>
    %186 = vector.broadcast %185 : vector<8x1xf32> to vector<8x8xf32>
    %187 = arith.mulf %182, %186 : vector<8x8xf32>
    %188 = arith.truncf %187 : vector<8x8xf32> to vector<8x8xbf16>
    %189 = arith.truncf %172 : vector<8x64xf32> to vector<8x64xbf16>
    %cst_83 = arith.constant dense<0.000000e+00> : vector<8x64xf32>
    %190 = tpu.matmul %188, %189, %cst_83 {dimension_numbers = #tpu.dot_dimension_numbers<[1], [0], [0], [1], [0, 0, 1, 1], [], []>} : vector<8x8xbf16>, vector<8x64xbf16>, vector<8x64xf32> -> vector<8x64xf32>
    %191 = vector.extract_strided_slice %169 {offsets = [0, 64], sizes = [8, 64], strides = [1, 1]} : vector<8x576xf32> to vector<8x64xf32>
    %192 = vector.extract_strided_slice %169 {offsets = [0, 256], sizes = [8, 64], strides = [1, 1]} : vector<8x576xf32> to vector<8x64xf32>
    %193 = vector.extract_strided_slice %169 {offsets = [0, 448], sizes = [8, 64], strides = [1, 1]} : vector<8x576xf32> to vector<8x64xf32>
    %194 = arith.truncf %191 : vector<8x64xf32> to vector<8x64xbf16>
    %195 = arith.truncf %192 : vector<8x64xf32> to vector<8x64xbf16>
    %cst_84 = arith.constant dense<0.000000e+00> : vector<8x8xf32>
    %196 = tpu.matmul %194, %195, %cst_84 {dimension_numbers = #tpu.dot_dimension_numbers<[1], [1], [0], [0], [0, 0, 1, 0], [], []>} : vector<8x64xbf16>, vector<8x64xbf16>, vector<8x8xf32> -> vector<8x8xf32>
    %cst_85 = arith.constant 1.250000e-01 : f32
    %197 = vector.broadcast %cst_85 : f32 to vector<8x8xf32>
    %198 = arith.mulf %196, %197 : vector<8x8xf32>
    %cst_86 = arith.constant dense<0xFF800000> : vector<8xf32>
    %199 = vector.multi_reduction <maximumf>, %198, %cst_86 [1] : vector<8x8xf32> to vector<8xf32>
    %200 = vector.shape_cast %199 : vector<8xf32> to vector<8x1xf32>
    %201 = vector.broadcast %200 : vector<8x1xf32> to vector<8x8xf32>
    %202 = arith.subf %198, %201 : vector<8x8xf32>
    %203 = math.exp %202 : vector<8x8xf32>
    %cst_87 = arith.constant dense<0.000000e+00> : vector<8xf32>
    %204 = vector.multi_reduction <add>, %203, %cst_87 [1] : vector<8x8xf32> to vector<8xf32>
    %205 = vector.shape_cast %204 : vector<8xf32> to vector<8x1xf32>
    %206 = tpu.reciprocal %205 {approx = true} : vector<8x1xf32> -> vector<8x1xf32>
    %207 = vector.broadcast %206 : vector<8x1xf32> to vector<8x8xf32>
    %208 = arith.mulf %203, %207 : vector<8x8xf32>
    %209 = arith.truncf %208 : vector<8x8xf32> to vector<8x8xbf16>
    %210 = arith.truncf %193 : vector<8x64xf32> to vector<8x64xbf16>
    %cst_88 = arith.constant dense<0.000000e+00> : vector<8x64xf32>
    %211 = tpu.matmul %209, %210, %cst_88 {dimension_numbers = #tpu.dot_dimension_numbers<[1], [0], [0], [1], [0, 0, 1, 1], [], []>} : vector<8x8xbf16>, vector<8x64xbf16>, vector<8x64xf32> -> vector<8x64xf32>
    %212 = vector.extract_strided_slice %169 {offsets = [0, 128], sizes = [8, 64], strides = [1, 1]} : vector<8x576xf32> to vector<8x64xf32>
    %213 = vector.extract_strided_slice %169 {offsets = [0, 320], sizes = [8, 64], strides = [1, 1]} : vector<8x576xf32> to vector<8x64xf32>
    %214 = vector.extract_strided_slice %169 {offsets = [0, 512], sizes = [8, 64], strides = [1, 1]} : vector<8x576xf32> to vector<8x64xf32>
    %215 = arith.truncf %212 : vector<8x64xf32> to vector<8x64xbf16>
    %216 = arith.truncf %213 : vector<8x64xf32> to vector<8x64xbf16>
    %cst_89 = arith.constant dense<0.000000e+00> : vector<8x8xf32>
    %217 = tpu.matmul %215, %216, %cst_89 {dimension_numbers = #tpu.dot_dimension_numbers<[1], [1], [0], [0], [0, 0, 1, 0], [], []>} : vector<8x64xbf16>, vector<8x64xbf16>, vector<8x8xf32> -> vector<8x8xf32>
    %cst_90 = arith.constant 1.250000e-01 : f32
    %218 = vector.broadcast %cst_90 : f32 to vector<8x8xf32>
    %219 = arith.mulf %217, %218 : vector<8x8xf32>
    %cst_91 = arith.constant dense<0xFF800000> : vector<8xf32>
    %220 = vector.multi_reduction <maximumf>, %219, %cst_91 [1] : vector<8x8xf32> to vector<8xf32>
    %221 = vector.shape_cast %220 : vector<8xf32> to vector<8x1xf32>
    %222 = vector.broadcast %221 : vector<8x1xf32> to vector<8x8xf32>
    %223 = arith.subf %219, %222 : vector<8x8xf32>
    %224 = math.exp %223 : vector<8x8xf32>
    %cst_92 = arith.constant dense<0.000000e+00> : vector<8xf32>
    %225 = vector.multi_reduction <add>, %224, %cst_92 [1] : vector<8x8xf32> to vector<8xf32>
    %226 = vector.shape_cast %225 : vector<8xf32> to vector<8x1xf32>
    %227 = tpu.reciprocal %226 {approx = true} : vector<8x1xf32> -> vector<8x1xf32>
    %228 = vector.broadcast %227 : vector<8x1xf32> to vector<8x8xf32>
    %229 = arith.mulf %224, %228 : vector<8x8xf32>
    %230 = arith.truncf %229 : vector<8x8xf32> to vector<8x8xbf16>
    %231 = arith.truncf %214 : vector<8x64xf32> to vector<8x64xbf16>
    %cst_93 = arith.constant dense<0.000000e+00> : vector<8x64xf32>
    %232 = tpu.matmul %230, %231, %cst_93 {dimension_numbers = #tpu.dot_dimension_numbers<[1], [0], [0], [1], [0, 0, 1, 1], [], []>} : vector<8x8xbf16>, vector<8x64xbf16>, vector<8x64xf32> -> vector<8x64xf32>
    %233 = tpu.concatenate %190, %211, %232 in 1 : vector<8x64xf32>, vector<8x64xf32>, vector<8x64xf32> -> vector<8x192xf32>
    %234 = arith.truncf %233 : vector<8x192xf32> to vector<8x192xbf16>
    %c1_94 = arith.constant 1 : index
    %c0_95 = arith.constant 0 : index
    %c0_96 = arith.constant 0 : index
    %235 = vector.load %arg6[%c1_94, %c0_95, %c0_96] : memref<2x192x192xbf16, #tpu.memory_space<vmem>>, vector<1x192x192xbf16>
    %236 = vector.shape_cast %235 : vector<1x192x192xbf16> to vector<192x192xbf16>
    %cst_97 = arith.constant dense<0.000000e+00> : vector<8x192xf32>
    %237 = tpu.matmul %234, %236, %cst_97 {dimension_numbers = #tpu.dot_dimension_numbers<[1], [0], [0], [1], [0, 0, 1, 1], [], []>} : vector<8x192xbf16>, vector<192x192xbf16>, vector<8x192xf32> -> vector<8x192xf32>
    %c1_98 = arith.constant 1 : index
    %c0_99 = arith.constant 0 : index
    %c0_100 = arith.constant 0 : index
    %238 = vector.load %arg7[%c1_98, %c0_99, %c0_100] : memref<2x1x192xf32, #tpu.memory_space<vmem>>, vector<1x1x192xf32>
    %239 = vector.shape_cast %238 : vector<1x1x192xf32> to vector<1x192xf32>
    %240 = vector.broadcast %239 : vector<1x192xf32> to vector<8x192xf32>
    %241 = arith.addf %237, %240 : vector<8x192xf32>
    %242 = arith.addf %161, %241 : vector<8x192xf32>
    %c1_101 = arith.constant 1 : index
    %c0_102 = arith.constant 0 : index
    %c0_103 = arith.constant 0 : index
    %243 = vector.load %arg12[%c1_101, %c0_102, %c0_103] : memref<2x1x192xf32, #tpu.memory_space<vmem>>, vector<1x1x192xf32>
    %244 = vector.shape_cast %243 : vector<1x1x192xf32> to vector<1x192xf32>
    %c1_104 = arith.constant 1 : index
    %c0_105 = arith.constant 0 : index
    %c0_106 = arith.constant 0 : index
    %245 = vector.load %arg13[%c1_104, %c0_105, %c0_106] : memref<2x1x192xf32, #tpu.memory_space<vmem>>, vector<1x1x192xf32>
    %246 = vector.shape_cast %245 : vector<1x1x192xf32> to vector<1x192xf32>
    %cst_107 = arith.constant dense<0.000000e+00> : vector<8xf32>
    %247 = vector.multi_reduction <add>, %242, %cst_107 [1] : vector<8x192xf32> to vector<8xf32>
    %248 = vector.shape_cast %247 : vector<8xf32> to vector<8x1xf32>
    %cst_108 = arith.constant 1.920000e+02 : f32
    %249 = vector.broadcast %cst_108 : f32 to vector<8x1xf32>
    %250 = arith.divf %248, %249 : vector<8x1xf32>
    %251 = vector.broadcast %250 : vector<8x1xf32> to vector<8x192xf32>
    %252 = arith.subf %242, %251 : vector<8x192xf32>
    %253 = arith.mulf %252, %252 : vector<8x192xf32>
    %cst_109 = arith.constant dense<0.000000e+00> : vector<8xf32>
    %254 = vector.multi_reduction <add>, %253, %cst_109 [1] : vector<8x192xf32> to vector<8xf32>
    %255 = vector.shape_cast %254 : vector<8xf32> to vector<8x1xf32>
    %cst_110 = arith.constant 1.920000e+02 : f32
    %256 = vector.broadcast %cst_110 : f32 to vector<8x1xf32>
    %257 = arith.divf %255, %256 : vector<8x1xf32>
    %258 = vector.broadcast %250 : vector<8x1xf32> to vector<8x192xf32>
    %259 = arith.subf %242, %258 : vector<8x192xf32>
    %cst_111 = arith.constant 9.99999974E-6 : f32
    %260 = vector.broadcast %cst_111 : f32 to vector<8x1xf32>
    %261 = arith.addf %257, %260 : vector<8x1xf32>
    %262 = math.rsqrt %261 : vector<8x1xf32>
    %263 = vector.broadcast %262 : vector<8x1xf32> to vector<8x192xf32>
    %264 = arith.mulf %259, %263 : vector<8x192xf32>
    %265 = vector.broadcast %244 : vector<1x192xf32> to vector<8x192xf32>
    %266 = arith.mulf %264, %265 : vector<8x192xf32>
    %267 = vector.broadcast %246 : vector<1x192xf32> to vector<8x192xf32>
    %268 = arith.addf %266, %267 : vector<8x192xf32>
    %269 = arith.truncf %268 : vector<8x192xf32> to vector<8x192xbf16>
    %c1_112 = arith.constant 1 : index
    %c0_113 = arith.constant 0 : index
    %c0_114 = arith.constant 0 : index
    %270 = vector.load %arg8[%c1_112, %c0_113, %c0_114] : memref<2x192x192xbf16, #tpu.memory_space<vmem>>, vector<1x192x192xbf16>
    %271 = vector.shape_cast %270 : vector<1x192x192xbf16> to vector<192x192xbf16>
    %cst_115 = arith.constant dense<0.000000e+00> : vector<8x192xf32>
    %272 = tpu.matmul %269, %271, %cst_115 {dimension_numbers = #tpu.dot_dimension_numbers<[1], [0], [0], [1], [0, 0, 1, 1], [], []>} : vector<8x192xbf16>, vector<192x192xbf16>, vector<8x192xf32> -> vector<8x192xf32>
    %c1_116 = arith.constant 1 : index
    %c0_117 = arith.constant 0 : index
    %c0_118 = arith.constant 0 : index
    %273 = vector.load %arg9[%c1_116, %c0_117, %c0_118] : memref<2x1x192xf32, #tpu.memory_space<vmem>>, vector<1x1x192xf32>
    %274 = vector.shape_cast %273 : vector<1x1x192xf32> to vector<1x192xf32>
    %275 = vector.broadcast %274 : vector<1x192xf32> to vector<8x192xf32>
    %276 = arith.addf %272, %275 : vector<8x192xf32>
    %cst_119 = arith.constant 0.000000e+00 : f32
    %277 = vector.broadcast %cst_119 : f32 to vector<8x192xf32>
    %278 = arith.maximumf %276, %277 : vector<8x192xf32>
    %279 = arith.truncf %278 : vector<8x192xf32> to vector<8x192xbf16>
    %c1_120 = arith.constant 1 : index
    %c0_121 = arith.constant 0 : index
    %c0_122 = arith.constant 0 : index
    %280 = vector.load %arg10[%c1_120, %c0_121, %c0_122] : memref<2x192x192xbf16, #tpu.memory_space<vmem>>, vector<1x192x192xbf16>
    %281 = vector.shape_cast %280 : vector<1x192x192xbf16> to vector<192x192xbf16>
    %cst_123 = arith.constant dense<0.000000e+00> : vector<8x192xf32>
    %282 = tpu.matmul %279, %281, %cst_123 {dimension_numbers = #tpu.dot_dimension_numbers<[1], [0], [0], [1], [0, 0, 1, 1], [], []>} : vector<8x192xbf16>, vector<192x192xbf16>, vector<8x192xf32> -> vector<8x192xf32>
    %c1_124 = arith.constant 1 : index
    %c0_125 = arith.constant 0 : index
    %c0_126 = arith.constant 0 : index
    %283 = vector.load %arg11[%c1_124, %c0_125, %c0_126] : memref<2x1x192xf32, #tpu.memory_space<vmem>>, vector<1x1x192xf32>
    %284 = vector.shape_cast %283 : vector<1x1x192xf32> to vector<1x192xf32>
    %285 = vector.broadcast %284 : vector<1x192xf32> to vector<8x192xf32>
    %286 = arith.addf %282, %285 : vector<8x192xf32>
    %287 = arith.addf %268, %286 : vector<8x192xf32>
    %c1_127 = arith.constant 1 : index
    %c0_128 = arith.constant 0 : index
    %c0_129 = arith.constant 0 : index
    %288 = vector.load %arg14[%c1_127, %c0_128, %c0_129] : memref<2x1x192xf32, #tpu.memory_space<vmem>>, vector<1x1x192xf32>
    %289 = vector.shape_cast %288 : vector<1x1x192xf32> to vector<1x192xf32>
    %c1_130 = arith.constant 1 : index
    %c0_131 = arith.constant 0 : index
    %c0_132 = arith.constant 0 : index
    %290 = vector.load %arg15[%c1_130, %c0_131, %c0_132] : memref<2x1x192xf32, #tpu.memory_space<vmem>>, vector<1x1x192xf32>
    %291 = vector.shape_cast %290 : vector<1x1x192xf32> to vector<1x192xf32>
    %cst_133 = arith.constant dense<0.000000e+00> : vector<8xf32>
    %292 = vector.multi_reduction <add>, %287, %cst_133 [1] : vector<8x192xf32> to vector<8xf32>
    %293 = vector.shape_cast %292 : vector<8xf32> to vector<8x1xf32>
    %cst_134 = arith.constant 1.920000e+02 : f32
    %294 = vector.broadcast %cst_134 : f32 to vector<8x1xf32>
    %295 = arith.divf %293, %294 : vector<8x1xf32>
    %296 = vector.broadcast %295 : vector<8x1xf32> to vector<8x192xf32>
    %297 = arith.subf %287, %296 : vector<8x192xf32>
    %298 = arith.mulf %297, %297 : vector<8x192xf32>
    %cst_135 = arith.constant dense<0.000000e+00> : vector<8xf32>
    %299 = vector.multi_reduction <add>, %298, %cst_135 [1] : vector<8x192xf32> to vector<8xf32>
    %300 = vector.shape_cast %299 : vector<8xf32> to vector<8x1xf32>
    %cst_136 = arith.constant 1.920000e+02 : f32
    %301 = vector.broadcast %cst_136 : f32 to vector<8x1xf32>
    %302 = arith.divf %300, %301 : vector<8x1xf32>
    %303 = vector.broadcast %295 : vector<8x1xf32> to vector<8x192xf32>
    %304 = arith.subf %287, %303 : vector<8x192xf32>
    %cst_137 = arith.constant 9.99999974E-6 : f32
    %305 = vector.broadcast %cst_137 : f32 to vector<8x1xf32>
    %306 = arith.addf %302, %305 : vector<8x1xf32>
    %307 = math.rsqrt %306 : vector<8x1xf32>
    %308 = vector.broadcast %307 : vector<8x1xf32> to vector<8x192xf32>
    %309 = arith.mulf %304, %308 : vector<8x192xf32>
    %310 = vector.broadcast %289 : vector<1x192xf32> to vector<8x192xf32>
    %311 = arith.mulf %309, %310 : vector<8x192xf32>
    %312 = vector.broadcast %291 : vector<1x192xf32> to vector<8x192xf32>
    %313 = arith.addf %311, %312 : vector<8x192xf32>
    %314 = arith.truncf %313 : vector<8x192xf32> to vector<8x192xbf16>
    %c0_138 = arith.constant 0 : index
    %c0_139 = arith.constant 0 : index
    %315 = vector.load %arg16[%c0_138, %c0_139] : memref<192x448xbf16, #tpu.memory_space<vmem>>, vector<192x448xbf16>
    %cst_140 = arith.constant dense<0.000000e+00> : vector<8x448xf32>
    %316 = tpu.matmul %314, %315, %cst_140 {dimension_numbers = #tpu.dot_dimension_numbers<[1], [0], [0], [1], [0, 0, 1, 1], [], []>} : vector<8x192xbf16>, vector<192x448xbf16>, vector<8x448xf32> -> vector<8x448xf32>
    %c0_141 = arith.constant 0 : index
    %c0_142 = arith.constant 0 : index
    %317 = vector.load %arg17[%c0_141, %c0_142] : memref<1x448xf32, #tpu.memory_space<vmem>>, vector<1x448xf32>
    %318 = vector.broadcast %317 : vector<1x448xf32> to vector<8x448xf32>
    %319 = arith.addf %316, %318 : vector<8x448xf32>
    %320 = vector.extract_strided_slice %319 {offsets = [0, 0], sizes = [8, 192], strides = [1, 1]} : vector<8x448xf32> to vector<8x192xf32>
    %321 = math.tanh %320 : vector<8x192xf32>
    %322 = vector.extract_strided_slice %319 {offsets = [0, 256], sizes = [8, 192], strides = [1, 1]} : vector<8x448xf32> to vector<8x192xf32>
    %cst_143 = arith.constant 0.000000e+00 : f32
    %323 = vector.broadcast %cst_143 : f32 to vector<8x192xf32>
    %324 = arith.subf %323, %322 : vector<8x192xf32>
    %325 = math.exp %324 : vector<8x192xf32>
    %cst_144 = arith.constant 1.000000e+00 : f32
    %326 = vector.broadcast %cst_144 : f32 to vector<8x192xf32>
    %327 = arith.addf %326, %325 : vector<8x192xf32>
    %cst_145 = arith.constant 1.000000e+00 : f32
    %328 = vector.broadcast %cst_145 : f32 to vector<8x192xf32>
    %329 = arith.divf %328, %327 : vector<8x192xf32>
    %330 = arith.mulf %321, %329 : vector<8x192xf32>
    %331 = arith.truncf %330 : vector<8x192xf32> to vector<8x192xbf16>
    %c0_146 = arith.constant 0 : index
    %c0_147 = arith.constant 0 : index
    %332 = vector.load %arg18[%c0_146, %c0_147] : memref<192x1xbf16, #tpu.memory_space<vmem>>, vector<192x1xbf16>
    %cst_148 = arith.constant dense<0.000000e+00> : vector<8x1xf32>
    %333 = tpu.matmul %331, %332, %cst_148 {dimension_numbers = #tpu.dot_dimension_numbers<[1], [0], [0], [1], [0, 0, 1, 1], [], []>} : vector<8x192xbf16>, vector<192x1xbf16>, vector<8x1xf32> -> vector<8x1xf32>
    %c0_149 = arith.constant 0 : index
    %c0_150 = arith.constant 0 : index
    %334 = vector.load %arg19[%c0_149, %c0_150] : memref<1x1xf32, #tpu.memory_space<vmem>>, vector<1x1xf32>
    %335 = vector.broadcast %334 : vector<1x1xf32> to vector<8x1xf32>
    %336 = arith.addf %333, %335 : vector<8x1xf32>
    %cst_151 = arith.constant dense<0xFF800000> : vector<1xf32>
    %337 = vector.multi_reduction <maximumf>, %336, %cst_151 [0] : vector<8x1xf32> to vector<1xf32>
    %338 = vector.shape_cast %337 : vector<1xf32> to vector<1x1xf32>
    %339 = vector.broadcast %338 : vector<1x1xf32> to vector<8x1xf32>
    %340 = arith.subf %336, %339 : vector<8x1xf32>
    %341 = math.exp %340 : vector<8x1xf32>
    %cst_152 = arith.constant dense<0.000000e+00> : vector<1xf32>
    %342 = vector.multi_reduction <add>, %341, %cst_152 [0] : vector<8x1xf32> to vector<1xf32>
    %343 = vector.shape_cast %342 : vector<1xf32> to vector<1x1xf32>
    %344 = tpu.reciprocal %343 {approx = true} : vector<1x1xf32> -> vector<1x1xf32>
    %345 = vector.broadcast %344 : vector<1x1xf32> to vector<8x1xf32>
    %346 = arith.mulf %341, %345 : vector<8x1xf32>
    %cst_153 = arith.constant dense<0.000000e+00> : vector<1x192xf32>
    %347 = tpu.matmul %346, %313, %cst_153 {dimension_numbers = #tpu.dot_dimension_numbers<[0], [0], [1], [1], [0, 1, 1, 1], [], []>} : vector<8x1xf32>, vector<8x192xf32>, vector<1x192xf32> -> vector<1x192xf32>
    %348 = arith.truncf %347 : vector<1x192xf32> to vector<1x192xbf16>
    %c0_154 = arith.constant 0 : index
    %c0_155 = arith.constant 0 : index
    %349 = vector.load %arg20[%c0_154, %c0_155] : memref<192x192xbf16, #tpu.memory_space<vmem>>, vector<192x192xbf16>
    %cst_156 = arith.constant dense<0.000000e+00> : vector<1x192xf32>
    %350 = tpu.matmul %348, %349, %cst_156 {dimension_numbers = #tpu.dot_dimension_numbers<[1], [0], [0], [1], [0, 0, 1, 1], [], []>} : vector<1x192xbf16>, vector<192x192xbf16>, vector<1x192xf32> -> vector<1x192xf32>
    %c0_157 = arith.constant 0 : index
    %c0_158 = arith.constant 0 : index
    %351 = vector.load %arg21[%c0_157, %c0_158] : memref<1x192xf32, #tpu.memory_space<vmem>>, vector<1x192xf32>
    %352 = arith.addf %350, %351 : vector<1x192xf32>
    %cst_159 = arith.constant 0.000000e+00 : f32
    %353 = vector.broadcast %cst_159 : f32 to vector<1x192xf32>
    %354 = arith.maximumf %352, %353 : vector<1x192xf32>
    %355 = arith.truncf %354 : vector<1x192xf32> to vector<1x192xbf16>
    %c0_160 = arith.constant 0 : index
    %c0_161 = arith.constant 0 : index
    %356 = vector.load %arg22[%c0_160, %c0_161] : memref<192x4xbf16, #tpu.memory_space<vmem>>, vector<192x4xbf16>
    %cst_162 = arith.constant dense<0.000000e+00> : vector<1x4xf32>
    %357 = tpu.matmul %355, %356, %cst_162 {dimension_numbers = #tpu.dot_dimension_numbers<[1], [0], [0], [1], [0, 0, 1, 1], [], []>} : vector<1x192xbf16>, vector<192x4xbf16>, vector<1x4xf32> -> vector<1x4xf32>
    %c0_163 = arith.constant 0 : index
    %c0_164 = arith.constant 0 : index
    %358 = vector.load %arg23[%c0_163, %c0_164] : memref<1x4xf32, #tpu.memory_space<vmem>>, vector<1x4xf32>
    %359 = arith.addf %357, %358 : vector<1x4xf32>
    %cst_165 = arith.constant dense<0xFF800000> : vector<1xf32>
    %360 = vector.multi_reduction <maximumf>, %359, %cst_165 [1] : vector<1x4xf32> to vector<1xf32>
    %361 = vector.shape_cast %360 : vector<1xf32> to vector<1x1xf32>
    %362 = vector.broadcast %361 : vector<1x1xf32> to vector<1x4xf32>
    %363 = arith.subf %359, %362 : vector<1x4xf32>
    %364 = math.exp %363 : vector<1x4xf32>
    %cst_166 = arith.constant dense<0.000000e+00> : vector<1xf32>
    %365 = vector.multi_reduction <add>, %364, %cst_166 [1] : vector<1x4xf32> to vector<1xf32>
    %366 = vector.shape_cast %365 : vector<1xf32> to vector<1x1xf32>
    %367 = vector.broadcast %366 : vector<1x1xf32> to vector<1x4xf32>
    %368 = arith.divf %364, %367 : vector<1x4xf32>
    %c0_167 = arith.constant 0 : index
    %c0_168 = arith.constant 0 : index
    %c0_169 = arith.constant 0 : index
    %369 = vector.load %arg24[%c0_167, %c0_168, %c0_169] : memref<1x1x4xf32, #tpu.memory_space<vmem>>, vector<1x1x4xf32>
    %370 = vector.shape_cast %369 : vector<1x1x4xf32> to vector<1x4xf32>
    %371 = vector.shape_cast %359 : vector<1x4xf32> to vector<1x1x4xf32>
    tpu.vector_store %arg24[%c0_167, %c0_168, %c0_169], %371 {strides = array<i32>} : memref<1x1x4xf32, #tpu.memory_space<vmem>>, vector<1x1x4xf32>,
    %c0_170 = arith.constant 0 : index
    %c0_171 = arith.constant 0 : index
    %c0_172 = arith.constant 0 : index
    %372 = vector.load %arg25[%c0_170, %c0_171, %c0_172] : memref<1x1x4xf32, #tpu.memory_space<vmem>>, vector<1x1x4xf32>
    %373 = vector.shape_cast %372 : vector<1x1x4xf32> to vector<1x4xf32>
    %374 = vector.shape_cast %368 : vector<1x4xf32> to vector<1x1x4xf32>
    tpu.vector_store %arg25[%c0_170, %c0_171, %c0_172], %374 {strides = array<i32>} : memref<1x1x4xf32, #tpu.memory_space<vmem>>, vector<1x1x4xf32>,
    %375 = tpu.iota {dimensions = array<i32: 1>} : vector<1x4xi32>
    %376 = vector.broadcast %361 : vector<1x1xf32> to vector<1x4xf32>
    %377 = arith.cmpf oge, %359, %376 : vector<1x4xf32>
    %c1073741824_i32 = arith.constant 1073741824 : i32
    %378 = vector.broadcast %c1073741824_i32 : i32 to vector<1x4xi32>
    %379 = arith.select %377, %375, %378 : vector<1x4xi1>, vector<1x4xi32>
    %cst_173 = arith.constant dense<2147483647> : vector<1xi32>
    %380 = vector.multi_reduction <minsi>, %379, %cst_173 [1] : vector<1x4xi32> to vector<1xi32>
    %381 = vector.shape_cast %380 : vector<1xi32> to vector<1x1xi32>
    %c0_174 = arith.constant 0 : index
    %c0_175 = arith.constant 0 : index
    %c0_176 = arith.constant 0 : index
    %382 = vector.load %arg26[%c0_174, %c0_175, %c0_176] : memref<1x1x1xi32, #tpu.memory_space<vmem>>, vector<1x1x1xi32>
    %383 = vector.shape_cast %382 : vector<1x1x1xi32> to vector<1x1xi32>
    %384 = vector.shape_cast %381 : vector<1x1xi32> to vector<1x1x1xi32>
    tpu.vector_store %arg26[%c0_174, %c0_175, %c0_176], %384 {strides = array<i32>} : memref<1x1x1xi32, #tpu.memory_space<vmem>>, vector<1x1x1xi32>,
    return
  }
  func.func @transform_0(%arg0: i32) -> (i32, i32, i32) {
    %c0_i32 = arith.constant 0 : i32
    %c0_i32_0 = arith.constant 0 : i32
    %c0_i32_1 = arith.constant 0 : i32
    return %arg0, %c0_i32, %c0_i32_0 : i32, i32, i32
  }
  func.func @transform_1(%arg0: i32) -> (i32, i32) {
    %c0_i32 = arith.constant 0 : i32
    %c0_i32_0 = arith.constant 0 : i32
    %c0_i32_1 = arith.constant 0 : i32
    return %c0_i32, %c0_i32_0 : i32, i32
  }
  func.func @transform_2(%arg0: i32) -> (i32, i32) {
    %c0_i32 = arith.constant 0 : i32
    %c0_i32_0 = arith.constant 0 : i32
    %c0_i32_1 = arith.constant 0 : i32
    return %c0_i32, %c0_i32_0 : i32, i32
  }
  func.func @transform_3(%arg0: i32) -> (i32, i32, i32) {
    %c0_i32 = arith.constant 0 : i32
    %c0_i32_0 = arith.constant 0 : i32
    %c0_i32_1 = arith.constant 0 : i32
    %c0_i32_2 = arith.constant 0 : i32
    return %c0_i32, %c0_i32_0, %c0_i32_1 : i32, i32, i32
  }
  func.func @transform_4(%arg0: i32) -> (i32, i32, i32) {
    %c0_i32 = arith.constant 0 : i32
    %c0_i32_0 = arith.constant 0 : i32
    %c0_i32_1 = arith.constant 0 : i32
    %c0_i32_2 = arith.constant 0 : i32
    return %c0_i32, %c0_i32_0, %c0_i32_1 : i32, i32, i32
  }
  func.func @transform_5(%arg0: i32) -> (i32, i32, i32) {
    %c0_i32 = arith.constant 0 : i32
    %c0_i32_0 = arith.constant 0 : i32
    %c0_i32_1 = arith.constant 0 : i32
    %c0_i32_2 = arith.constant 0 : i32
    return %c0_i32, %c0_i32_0, %c0_i32_1 : i32, i32, i32
  }
  func.func @transform_6(%arg0: i32) -> (i32, i32, i32) {
    %c0_i32 = arith.constant 0 : i32
    %c0_i32_0 = arith.constant 0 : i32
    %c0_i32_1 = arith.constant 0 : i32
    %c0_i32_2 = arith.constant 0 : i32
    return %c0_i32, %c0_i32_0, %c0_i32_1 : i32, i32, i32
  }
  func.func @transform_7(%arg0: i32) -> (i32, i32, i32) {
    %c0_i32 = arith.constant 0 : i32
    %c0_i32_0 = arith.constant 0 : i32
    %c0_i32_1 = arith.constant 0 : i32
    %c0_i32_2 = arith.constant 0 : i32
    return %c0_i32, %c0_i32_0, %c0_i32_1 : i32, i32, i32
  }
  func.func @transform_8(%arg0: i32) -> (i32, i32, i32) {
    %c0_i32 = arith.constant 0 : i32
    %c0_i32_0 = arith.constant 0 : i32
    %c0_i32_1 = arith.constant 0 : i32
    %c0_i32_2 = arith.constant 0 : i32
    return %c0_i32, %c0_i32_0, %c0_i32_1 : i32, i32, i32
  }
  func.func @transform_9(%arg0: i32) -> (i32, i32, i32) {
    %c0_i32 = arith.constant 0 : i32
    %c0_i32_0 = arith.constant 0 : i32
    %c0_i32_1 = arith.constant 0 : i32
    %c0_i32_2 = arith.constant 0 : i32
    return %c0_i32, %c0_i32_0, %c0_i32_1 : i32, i32, i32
  }
  func.func @transform_10(%arg0: i32) -> (i32, i32, i32) {
    %c0_i32 = arith.constant 0 : i32
    %c0_i32_0 = arith.constant 0 : i32
    %c0_i32_1 = arith.constant 0 : i32
    %c0_i32_2 = arith.constant 0 : i32
    return %c0_i32, %c0_i32_0, %c0_i32_1 : i32, i32, i32
  }
  func.func @transform_11(%arg0: i32) -> (i32, i32, i32) {
    %c0_i32 = arith.constant 0 : i32
    %c0_i32_0 = arith.constant 0 : i32
    %c0_i32_1 = arith.constant 0 : i32
    %c0_i32_2 = arith.constant 0 : i32
    return %c0_i32, %c0_i32_0, %c0_i32_1 : i32, i32, i32
  }
  func.func @transform_12(%arg0: i32) -> (i32, i32, i32) {
    %c0_i32 = arith.constant 0 : i32
    %c0_i32_0 = arith.constant 0 : i32
    %c0_i32_1 = arith.constant 0 : i32
    %c0_i32_2 = arith.constant 0 : i32
    return %c0_i32, %c0_i32_0, %c0_i32_1 : i32, i32, i32
  }
  func.func @transform_13(%arg0: i32) -> (i32, i32, i32) {
    %c0_i32 = arith.constant 0 : i32
    %c0_i32_0 = arith.constant 0 : i32
    %c0_i32_1 = arith.constant 0 : i32
    %c0_i32_2 = arith.constant 0 : i32
    return %c0_i32, %c0_i32_0, %c0_i32_1 : i32, i32, i32
  }
  func.func @transform_14(%arg0: i32) -> (i32, i32, i32) {
    %c0_i32 = arith.constant 0 : i32
    %c0_i32_0 = arith.constant 0 : i32
    %c0_i32_1 = arith.constant 0 : i32
    %c0_i32_2 = arith.constant 0 : i32
    return %c0_i32, %c0_i32_0, %c0_i32_1 : i32, i32, i32
  }
  func.func @transform_15(%arg0: i32) -> (i32, i32) {
    %c0_i32 = arith.constant 0 : i32
    %c0_i32_0 = arith.constant 0 : i32
    %c0_i32_1 = arith.constant 0 : i32
    return %c0_i32, %c0_i32_0 : i32, i32
  }
  func.func @transform_16(%arg0: i32) -> (i32, i32) {
    %c0_i32 = arith.constant 0 : i32
    %c0_i32_0 = arith.constant 0 : i32
    %c0_i32_1 = arith.constant 0 : i32
    return %c0_i32, %c0_i32_0 : i32, i32
  }
  func.func @transform_17(%arg0: i32) -> (i32, i32) {
    %c0_i32 = arith.constant 0 : i32
    %c0_i32_0 = arith.constant 0 : i32
    %c0_i32_1 = arith.constant 0 : i32
    return %c0_i32, %c0_i32_0 : i32, i32
  }
  func.func @transform_18(%arg0: i32) -> (i32, i32) {
    %c0_i32 = arith.constant 0 : i32
    %c0_i32_0 = arith.constant 0 : i32
    %c0_i32_1 = arith.constant 0 : i32
    return %c0_i32, %c0_i32_0 : i32, i32
  }
  func.func @transform_19(%arg0: i32) -> (i32, i32) {
    %c0_i32 = arith.constant 0 : i32
    %c0_i32_0 = arith.constant 0 : i32
    %c0_i32_1 = arith.constant 0 : i32
    return %c0_i32, %c0_i32_0 : i32, i32
  }
  func.func @transform_20(%arg0: i32) -> (i32, i32) {
    %c0_i32 = arith.constant 0 : i32
    %c0_i32_0 = arith.constant 0 : i32
    %c0_i32_1 = arith.constant 0 : i32
    return %c0_i32, %c0_i32_0 : i32, i32
  }
  func.func @transform_21(%arg0: i32) -> (i32, i32) {
    %c0_i32 = arith.constant 0 : i32
    %c0_i32_0 = arith.constant 0 : i32
    %c0_i32_1 = arith.constant 0 : i32
    return %c0_i32, %c0_i32_0 : i32, i32
  }
  func.func @transform_22(%arg0: i32) -> (i32, i32) {
    %c0_i32 = arith.constant 0 : i32
    %c0_i32_0 = arith.constant 0 : i32
    %c0_i32_1 = arith.constant 0 : i32
    return %c0_i32, %c0_i32_0 : i32, i32
  }
  func.func @transform_23(%arg0: i32) -> (i32, i32, i32) {
    %c0_i32 = arith.constant 0 : i32
    %c0_i32_0 = arith.constant 0 : i32
    %c0_i32_1 = arith.constant 0 : i32
    return %arg0, %c0_i32, %c0_i32_0 : i32, i32, i32
  }
  func.func @transform_24(%arg0: i32) -> (i32, i32, i32) {
    %c0_i32 = arith.constant 0 : i32
    %c0_i32_0 = arith.constant 0 : i32
    %c0_i32_1 = arith.constant 0 : i32
    return %arg0, %c0_i32, %c0_i32_0 : i32, i32, i32
  }
  func.func @transform_25(%arg0: i32) -> (i32, i32, i32) {
    %c0_i32 = arith.constant 0 : i32
    %c0_i32_0 = arith.constant 0 : i32
    %c0_i32_1 = arith.constant 0 : i32
    return %arg0, %c0_i32, %c0_i32_0 : i32, i32, i32
  }
}

</mosaic_0001>

<bundles_post_ra>
// kernel: hipt_gp_fc_forward.1
= control target key start
LH: loop header
LB: loop body
LE: loop exit
PB: predicated region body
PF: predicated region fallthrough
CT: control target
= control target key end

     0   :  { %s8588_s0 = inlined_call_operand.vmem [shape: f32[2,8,192], index: 0, kind: input, shape index: {}]   ;;  %s8589_s1 = inlined_call_operand.vmem [shape: bf16[192,192], index: 1, kind: input, shape index: {}]   ;;  %s8590_s2 = inlined_call_operand.hbm [shape: f32[1,192], index: 2, kind: input, shape index: {}]   ;;  %s8591_s3 = inlined_call_operand.hbm [shape: bf16[2,192,576], index: 3, kind: input, shape index: {}]   ;;  %s8592_s4 = inlined_call_operand.vmem [shape: f32[2,1,576], index: 4, kind: input, shape index: {}]   ;;  %s8593_s5 = inlined_call_operand.hbm [shape: bf16[2,192,192], index: 5, kind: input, shape index: {}]   ;;  %s8594_s6 = inlined_call_operand.vmem [shape: f32[2,1,192], index: 6, kind: input, shape index: {}]   ;;  %s8595_s7 = inlined_call_operand.hbm [shape: bf16[2,192,192], index: 7, kind: input, shape index: {}]   ;;  %s8596_s8 = inlined_call_operand.vmem [shape: f32[2,1,192], index: 8, kind: input, shape index: {}]   ;;  %s8597_s9 = inlined_call_operand.hbm [shape: bf16[2,192,192], index: 9, kind: input, shape index: {}]   ;;  %s8598_s10 = inlined_call_operand.vmem [shape: f32[2,1,192], index: 10, kind: input, shape index: {}]   ;;  %s8599_s11 = inlined_call_operand.vmem [shape: f32[2,1,192], index: 11, kind: input, shape index: {}]   ;;  %s8600_s12 = inlined_call_operand.hbm [shape: f32[2,1,192], index: 12, kind: input, shape index: {}]   ;;  %s8601_s13 = inlined_call_operand.hbm [shape: f32[2,1,192], index: 13, kind: input, shape index: {}]   ;;  %s8602_s14 = inlined_call_operand.hbm [shape: f32[2,1,192], index: 14, kind: input, shape index: {}]   ;;  %s8603_s15 = inlined_call_operand.hbm [shape: bf16[192,448], index: 15, kind: input, shape index: {}]   ;;  %s8604_s16 = inlined_call_operand.hbm [shape: f32[1,448], index: 16, kind: input, shape index: {}]   ;;  %s8605_s17 = inlined_call_operand.vmem [shape: bf16[192,1], index: 17, kind: input, shape index: {}]   ;;  %s8606_s18 = inlined_call_operand.<no memory space> [shape: f32[1,1], index: 18, kind: input, shape index: {}]   ;;  %s8607_s19 = inlined_call_operand.hbm [shape: bf16[192,192], index: 19, kind: input, shape index: {}]   ;;  %s8608_s20 = inlined_call_operand.hbm [shape: f32[1,192], index: 20, kind: input, shape index: {}]   ;;  %s8609_s21 = inlined_call_operand.vmem [shape: bf16[192,4], index: 21, kind: input, shape index: {}]   ;;  %s8610_s22 = inlined_call_operand.hbm [shape: f32[1,4], index: 22, kind: input, shape index: {}]   ;;  %s8611_s23 = inlined_call_operand.hbm [shape: f32[2,1,4], index: 23, kind: output, shape index: {0}]   ;;  %s8612_s24 = inlined_call_operand.hbm [shape: f32[2,1,4], index: 24, kind: output, shape index: {1}]   ;;  %s8613_s25 = inlined_call_operand.vmem [shape: s32[2,1,1], index: 25, kind: output, shape index: {2}]  }
   0x1   :  { %8649 = sst [smem:[#allocation44_spill]] %s8588_s0  ;;  %v31_v0 = vstv %s8606_s18 }
   0x2   :  { %8650 = sst [smem:[#allocation45_spill]] %s8589_s1  ;;  %32 = vst [vmem:[#allocation2] sm:$0x1] %v31_v0 }
   0x3   :  { %8651 = sst [smem:[#allocation46_spill]] %s8590_s2 }
   0x4   :  { %8652 = sst [smem:[#allocation47_spill]] %s8591_s3 }
   0x5   :  { %8653 = sst [smem:[#allocation48_spill]] %s8592_s4 }
   0x6   :  { %8654 = sst [smem:[#allocation49_spill]] %s8593_s5 }
   0x7   :  { %8655 = sst [smem:[#allocation50_spill]] %s8594_s6 }
   0x8   :  { %8656 = sst [smem:[#allocation51_spill]] %s8595_s7 }
   0x9   :  { %8657 = sst [smem:[#allocation52_spill]] %s8596_s8 }
   0xa   :  { %8658 = sst [smem:[#allocation53_spill]] %s8597_s9 }
   0xb   :  { %8659 = sst [smem:[#allocation54_spill]] %s8598_s10 }
   0xc   :  { %8660 = sst [smem:[#allocation55_spill]] %s8599_s11 }
   0xd   :  { %8661 = sst [smem:[#allocation56_spill]] %s8600_s12 }
   0xe   :  { %8662 = sst [smem:[#allocation57_spill]] %s8601_s13 }
   0xf   :  { %8663 = sst [smem:[#allocation58_spill]] %s8602_s14 }
  0x10   :  { %8664 = sst [smem:[#allocation59_spill]] %s8604_s16 }
  0x11   :  { %8665 = sst [smem:[#allocation60_spill]] %s8605_s17 }
  0x12   :  { %8666 = sst [smem:[#allocation61_spill]] %s8609_s21 }
  0x13   :  { %8667 = sst [smem:[#allocation62_spill]] %s8611_s23 }
  0x14   :  { %8668 = sst [smem:[#allocation63_spill]] %s8612_s24 }
  0x15   :  { %8669 = sst [smem:[#allocation64_spill]] %s8613_s25 }
  0x16   :  { %33 = vsyncpa [#allocation4], 0 }
  0x17   :  { %34 = vsyncpa [#allocation7], 0 }
  0x18   :  { %35 = vsyncpa [#allocation10], 0 }
  0x19   :  { %36 = vsyncpa [#allocation13], 0 }
  0x1a   :  { %37 = vsyncpa [#allocation16], 0 }
  0x1b   :  { %38 = vsyncpa [#allocation19], 0 }
  0x1c   :  { %39 = vsyncpa [#allocation22], 0 }
  0x1d   :  { %40 = vsyncpa [#allocation5], 0 }
  0x1e   :  { %42 = vsyncpa [#allocation5 + $0x1], 0 }
  0x1f   :  { %43 = vsyncpa [#allocation26], 0 }
  0x20   :  { %45 = vsyncpa [#allocation26 + $0x1], 0  ;;  %s7669_s6 = smov 0   ;;  %s7671_s30 = smov 0  }
  0x21   :  { %s7673_s7 = smov 0   ;;  %s7675_s3 = smov 0  }
  0x22 LB: > { %8670 = sst [smem:[#allocation36_spill]] %s7495_s6  ;;  %s7690_s18 = sadd.s32 4294967295, %s7507_s3   ;;  %s7507_s3 = sphi %s7675_s3, %s8735_s3   ;;  %s7503_s7 = sphi %s7673_s7, %s8738_s7   ;;  %s7499_s30 = sphi %s7671_s30, %s8737_s30   ;;  %s7495_s6 = sphi %s7669_s6, %s8736_s6  }
  0x23   : > { %8671 = sst [smem:[#allocation37_spill]] %s7499_s30  ;;  %s5676_s26 = sadd.s32 4294967294, %s7507_s3  }
  0x24   : > { %8672 = sst [smem:[#allocation38_spill]] %s7503_s7  ;;  %s7694_s1 = sadd.s32 1, %s7507_s3  }
  0x25   : > { %8673 = sst [smem:[#allocation39_spill]] %s7507_s3  ;;  %s546_s8 = sadd.s32 1, %s7503_s7 }
  0x26   : > { %8674 = sst [smem:[#allocation40_spill]] %s7694_s1  ;;  %s543_s27 = ssub.s32 %s7507_s3, %s7694_s1 }
  0x27   : > { %p556_p0 = scmp.ne.s32.totalorder %s7503_s7, %s7499_s30  ;;  %p544_p1 = scmp.eq.s32.totalorder %s543_s27, 0 }
  0x28   : > { %p557_p2 = scmp.eq.s32.totalorder %s7690_s18, 1  ;;  %p562_p3 = scmp.ne.s32.totalorder %s7499_s30, %s7495_s6 }
  0x29   : > { %p563_p4 = scmp.eq.s32.totalorder %s5676_s26, 1  ;;  %p5677_p7 = scmp.ge.s32.totalorder %s7507_s3, 1 }
  0x2a   : > { %s7705_s4 = scalar_select %p544_p1, %s7503_s7, %s546_s8  }
  0x2b   : > { %p7707_p5 = por %p557_p2, %p556_p0  ;;  %p7711_p6 = por %p563_p4, %p562_p3 }
  0x2c   : > { %8675 = sst [smem:[#allocation41_spill]] %s7705_s4  ;;  %p622_p8 = scmp.lt.s32.totalorder %s7507_s3, 3 }
  0x2d   : > { %s8676_s28 = scalar_select %p7707_p5, 1, 0 }
  0x2e   : > { %s8678_s9 = scalar_select %p7711_p6, 1, 0 }
  0x2f   : > { %8677 = sst [smem:[#allocation42_spill]] %s8676_s28  ;;  %p8630_p9 = scmp.eq.s32.totalorder %s7690_s18, 0 }
  0x30   : > { %8679 = sst [smem:[#allocation43_spill]] %s8678_s9  ;;  %p7718_p10 = pnand %p5677_p7, %p622_p8 }
  0x31   : > { %s7509_s0 = smov [#allocation6]   ;;  %s7510_s26 = smov [#allocation9]  }
  0x32   : > { %s8680_s5 = scalar_select %p7718_p10, 1, 0 }
  0x33   : > { %s648_s29 = sshll.u32 %s7509_s0, 4  ;;  %p6286_p11 = pneg %p7718_p10  ;;  %s649_s29 = int_to_ptr.vmem [resolvable:$true] %s648_s29 }
  0x34   : > { %s680_s8 = sshll.u32 %s7510_s26, 4  ;;  %s8682_s7 = sld [smem:[#allocation47_spill]]  ;;  %s681_s8 = int_to_ptr.vmem [resolvable:$true] %s680_s8 }
  0x35   : > { %p7726_p12 = pnand %p8630_p9, %p6286_p11 }
  0x37   : > { %p7738_p0 = pneg %p7726_p12 }
  0x3a   : > { %s8683_s1 = smov %s8682_s7  ;;  %s7021_s9 = scalar_lea.hbm %s8682_s7, 15360 }
  0x3b   : > { %p7022_p13 = scmp.ne.s32.totalorder %s8683_s1, %s7021_s9  ;;  %p7028_p3 = scmp.lt.u32.totalorder %s7021_s9, %s8683_s1 }
  0x3d   : > { %p7024_p1 = pnand %p7738_p0, %p7022_p13 }
  0x3f   : > { %p7025_p2 = pneg %p7024_p1 }
  0x41   : > { %p7030_p4 = pnand %p7028_p3, %p7025_p2 }
  0x43   : > { %7033 = shalt.err (!%p7030_p4)
}
  0x44   : > { %s7034_s7 = scalar_lea.vmem %s649_s29, 15360  ;;  %p7042_p9 = scmp.lt.s32.totalorder %s649_s29, %s649_s29 }
  0x45   : > { %p7035_p7 = scmp.ne.s32.totalorder %s649_s29, %s7034_s7  ;;  %p7043_p6 = scmp.lt.s32.totalorder %s7034_s7, %s7034_s7 }
  0x47   : > { %p7037_p8 = pnand %p7035_p7, %p7738_p0  ;;  %p7044_p5 = por %p7043_p6, %p7042_p9 }
  0x49   : > { %p7038_p11 = pneg %p7037_p8 }
  0x4b   : > { %p7045_p10 = pnand %p7044_p5, %p7038_p11 }
  0x4d   : > { %7048 = shalt.err (!%p7045_p10)
}
  0x4e   : > { %s7511_s6 = smov 320   ;;  %s7512_s3 = smov 20  }
  0x4f   : > { %6292 = dma.hbm_to_vmem [thread:$0]  (!%p7726_p12), %s8683_s1, 15360, %s649_s29, [#allocation7], %s7511_s6, %s7511_s6, %s7512_s3  }
  0x50   : > { %s7513_s4 = smov [#allocation12]   ;;  %s8685_s23 = sld [smem:[#allocation51_spill]] }
  0x51   : > { %s715_s9 = sshll.u32 %s7513_s4, 4  ;;  %s716_s9 = int_to_ptr.vmem [resolvable:$true] %s715_s9 }
  0x56   : > { %s7049_s28 = scalar_lea.hbm %s8685_s23, 6144 }
  0x57   : > { %p7050_p5 = scmp.ne.s32.totalorder %s8685_s23, %s7049_s28  ;;  %p7056_p10 = scmp.lt.u32.totalorder %s7049_s28, %s8685_s23 }
  0x59   : > { %p7052_p6 = pnand %p7050_p5, %p7738_p0 }
  0x5b   : > { %p7053_p9 = pneg %p7052_p6 }
  0x5d   : > { %p7058_p13 = pnand %p7056_p10, %p7053_p9 }
  0x5f   : > { %7061 = shalt.err (!%p7058_p13)
}
  0x60   : > { %s7062_s29 = scalar_lea.vmem %s681_s8, 6144  ;;  %p7070_p4 = scmp.lt.s32.totalorder %s681_s8, %s681_s8 }
  0x61   : > { %p7063_p1 = scmp.ne.s32.totalorder %s681_s8, %s7062_s29  ;;  %p7071_p7 = scmp.lt.s32.totalorder %s7062_s29, %s7062_s29 }
  0x63   : > { %p7065_p2 = pnand %p7063_p1, %p7738_p0  ;;  %p7072_p8 = por %p7071_p7, %p7070_p4 }
  0x65   : > { %p7066_p3 = pneg %p7065_p2 }
  0x67   : > { %p7073_p11 = pnand %p7072_p8, %p7066_p3 }
  0x69   : > { %7076 = shalt.err (!%p7073_p11)
}
  0x6a   : > { %s8639_s30 = smov 128   ;;  %s8641_s6 = smov 8  }
  0x6b   : > { %6298 = dma.hbm_to_vmem [thread:$0]  (!%p7726_p12), %s8685_s23, 6144, %s681_s8, [#allocation10], %s8639_s30, %s8639_s30, %s8641_s6  }
  0x6c   : > { %s8686_s12 = sld [smem:[#allocation56_spill]] }
  0x72   : > { %s7077_s24 = scalar_lea.hbm %s8686_s12, 64 }
  0x73   : > { %p7078_p5 = scmp.ne.s32.totalorder %s8686_s12, %s7077_s24  ;;  %p7084_p10 = scmp.lt.u32.totalorder %s7077_s24, %s8686_s12 }
  0x75   : > { %p7080_p6 = pnand %p7078_p5, %p7738_p0 }
  0x77   : > { %p7081_p9 = pneg %p7080_p6 }
  0x79   : > { %p7086_p13 = pnand %p7084_p10, %p7081_p9 }
  0x7b   : > { %7089 = shalt.err (!%p7086_p13)
}
  0x7c   : > { %s7090_s7 = scalar_lea.vmem %s716_s9, 64  ;;  %p7098_p4 = scmp.lt.s32.totalorder %s716_s9, %s716_s9 }
  0x7d   : > { %p7091_p1 = scmp.ne.s32.totalorder %s716_s9, %s7090_s7  ;;  %p7099_p7 = scmp.lt.s32.totalorder %s7090_s7, %s7090_s7 }
  0x7f   : > { %p7093_p2 = pnand %p7091_p1, %p7738_p0  ;;  %p7100_p8 = por %p7099_p7, %p7098_p4 }
  0x81   : > { %p7094_p3 = pneg %p7093_p2 }
  0x83   : > { %p7101_p11 = pnand %p7100_p8, %p7094_p3 }
  0x85   : > { %7104 = shalt.err (!%p7101_p11)
}
  0x86   : > { %s8644_s8 = smov 32   ;;  %s8645_s29 = smov 2  }
  0x87   : > { %6304 = dma.hbm_to_vmem [thread:$0]  (!%p7726_p12), %s8686_s12, 64, %s716_s9, [#allocation13], %s8644_s8, %s8644_s8, %s8645_s29  }
  0x88   : > { %s7518_s28 = smov [#allocation15]   ;;  %s7519_s24 = smov [#allocation18]  }
  0x89   : > { %s741_s3 = sshll.u32 %s7518_s28, 4  ;;  %s768_s25 = sshll.u32 %s7519_s24, 4  ;;  %s742_s3 = int_to_ptr.vmem [resolvable:$true] %s741_s3  ;;  %s769_s25 = int_to_ptr.vmem [resolvable:$true] %s768_s25 }
  0x8a   : > { %s8687_s14 = sld [smem:[#allocation58_spill]] }
  0x90   : > { %s7105_s27 = scalar_lea.hbm %s8687_s14, 64 }
  0x91   : > { %p7106_p5 = scmp.ne.s32.totalorder %s8687_s14, %s7105_s27  ;;  %p7112_p10 = scmp.lt.u32.totalorder %s7105_s27, %s8687_s14 }
  0x93   : > { %p7108_p6 = pnand %p7106_p5, %p7738_p0 }
  0x95   : > { %p7109_p9 = pneg %p7108_p6 }
  0x97   : > { %p7114_p13 = pnand %p7112_p10, %p7109_p9 }
  0x99   : > { %7117 = shalt.err (!%p7114_p13)
}
  0x9a   : > { %s7118_s9 = scalar_lea.vmem %s742_s3, 64  ;;  %p7126_p4 = scmp.lt.s32.totalorder %s742_s3, %s742_s3 }
  0x9b   : > { %p7119_p1 = scmp.ne.s32.totalorder %s742_s3, %s7118_s9  ;;  %p7127_p7 = scmp.lt.s32.totalorder %s7118_s9, %s7118_s9 }
  0x9d   : > { %p7121_p2 = pnand %p7119_p1, %p7738_p0  ;;  %p7128_p8 = por %p7127_p7, %p7126_p4 }
  0x9f   : > { %p7122_p3 = pneg %p7121_p2 }
  0xa1   : > { %p7129_p11 = pnand %p7128_p8, %p7122_p3 }
  0xa3   : > { %7132 = shalt.err (!%p7129_p11)
}
  0xa4   : > { %6310 = dma.hbm_to_vmem [thread:$0]  (!%p7726_p12), %s8687_s14, 64, %s742_s3, [#allocation16], %s8644_s8, %s8644_s8, %s8645_s29  }
  0xa5   : > { %s8688_s16 = sld [smem:[#allocation59_spill]] }
  0xab   : > { %s7133_s21 = scalar_lea.hbm %s8688_s16, 64 }
  0xac   : > { %p7134_p5 = scmp.ne.s32.totalorder %s8688_s16, %s7133_s21  ;;  %p7140_p10 = scmp.lt.u32.totalorder %s7133_s21, %s8688_s16 }
  0xae   : > { %p7136_p6 = pnand %p7134_p5, %p7738_p0 }
  0xb0   : > { %p7137_p9 = pneg %p7136_p6 }
  0xb2   : > { %p7142_p13 = pnand %p7140_p10, %p7137_p9 }
  0xb4   : > { %7145 = shalt.err (!%p7142_p13)
}
  0xb5   : > { %s7146_s27 = scalar_lea.vmem %s769_s25, 64  ;;  %p7154_p4 = scmp.lt.s32.totalorder %s769_s25, %s769_s25 }
  0xb6   : > { %p7147_p1 = scmp.ne.s32.totalorder %s769_s25, %s7146_s27  ;;  %p7155_p7 = scmp.lt.s32.totalorder %s7146_s27, %s7146_s27 }
  0xb8   : > { %p7149_p2 = pnand %p7147_p1, %p7738_p0  ;;  %p7156_p8 = por %p7155_p7, %p7154_p4 }
  0xba   : > { %p7150_p3 = pneg %p7149_p2 }
  0xbc   : > { %p7157_p11 = pnand %p7156_p8, %p7150_p3 }
  0xbe   : > { %7160 = shalt.err (!%p7157_p11)
}
  0xbf   : > { %6316 = dma.hbm_to_vmem [thread:$0]  (!%p7726_p12), %s8688_s16, 64, %s769_s25, [#allocation19]  }
  0xc0   : > { %s7520_s9 = smov [#allocation21]   ;;  %s7521_s30 = smov [#allocation3]  }
  0xc1   : > { %s798_s1 = sshll.u32 %s7520_s9, 4  ;;  %s638_s6 = sshll.u32 %s7521_s30, 4  ;;  %s799_s1 = int_to_ptr.vmem [resolvable:$true] %s798_s1  ;;  %s639_s6 = int_to_ptr.vmem [resolvable:$true] %s638_s6 }
  0xc2   : > { %s7161_s28 = scalar_lea.hbm %s8608_s20, 32 }
  0xc3   : > { %p7162_p5 = scmp.ne.s32.totalorder %s8608_s20, %s7161_s28  ;;  %p7168_p10 = scmp.lt.u32.totalorder %s7161_s28, %s8608_s20 }
  0xc5   : > { %p7164_p6 = pnand %p7162_p5, %p7738_p0 }
  0xc7   : > { %p7165_p9 = pneg %p7164_p6 }
  0xc9   : > { %p7170_p13 = pnand %p7168_p10, %p7165_p9 }
  0xcb   : > { %7173 = shalt.err (!%p7170_p13)
}
  0xcc   : > { %s7174_s25 = scalar_lea.vmem %s799_s1, 32  ;;  %p7182_p4 = scmp.lt.s32.totalorder %s799_s1, %s799_s1 }
  0xcd   : > { %p7175_p1 = scmp.ne.s32.totalorder %s799_s1, %s7174_s25  ;;  %p7183_p7 = scmp.lt.s32.totalorder %s7174_s25, %s7174_s25 }
  0xcf   : > { %p7177_p2 = pnand %p7175_p1, %p7738_p0  ;;  %p7184_p8 = por %p7183_p7, %p7182_p4 }
  0xd1   : > { %p7178_p3 = pneg %p7177_p2 }
  0xd3   : > { %p7185_p11 = pnand %p7184_p8, %p7178_p3 }
  0xd5   : > { %7188 = shalt.err (!%p7185_p11)
}
  0xd6   : > { %6322 = dma.hbm_to_vmem [thread:$0]  (!%p7726_p12), %s8608_s20, 32, %s799_s1, [#allocation22]  }
  0xd7   : > { %s8689_s17 = sld [smem:[#allocation46_spill]] }
  0xdd   : > { %s7189_s21 = scalar_lea.hbm %s8689_s17, 32 }
  0xde   : > { %p7190_p5 = scmp.ne.s32.totalorder %s8689_s17, %s7189_s21  ;;  %p7196_p10 = scmp.lt.u32.totalorder %s7189_s21, %s8689_s17 }
  0xe0   : > { %p7192_p6 = pnand %p7190_p5, %p7738_p0 }
  0xe2   : > { %p7193_p9 = pneg %p7192_p6 }
  0xe4   : > { %p7198_p13 = pnand %p7196_p10, %p7193_p9 }
  0xe6   : > { %7201 = shalt.err (!%p7198_p13)
}
  0xe7   : > { %s7202_s27 = scalar_lea.vmem %s639_s6, 32  ;;  %p7210_p4 = scmp.lt.s32.totalorder %s639_s6, %s639_s6 }
  0xe8   : > { %p7203_p1 = scmp.ne.s32.totalorder %s639_s6, %s7202_s27  ;;  %p7211_p7 = scmp.lt.s32.totalorder %s7202_s27, %s7202_s27 }
  0xea   : > { %p7205_p2 = pnand %p7203_p1, %p7738_p0  ;;  %p7212_p8 = por %p7211_p7, %p7210_p4 }
  0xec   : > { %p7206_p3 = pneg %p7205_p2 }
  0xee   : > { %p7213_p11 = pnand %p7212_p8, %p7206_p3 }
  0xf0   : > { %7216 = shalt.err (!%p7213_p11)
}
  0xf1   : > { %6289 = dma.hbm_to_vmem [thread:$0]  (!%p7726_p12), %s8689_s17, 32, %s639_s6, [#allocation4]  }
  0xf2   : > { %s7522_s3 = smov [#allocation8]   ;;  %s7523_s9 = smov [#allocation11]  }
  0xf3   : > { %s664_s7 = sshll.u32 %s7522_s3, 4  ;;  %s696_s30 = sshll.u32 %s7523_s9, 4  ;;  %s665_s7 = int_to_ptr.vmem [resolvable:$true] %s664_s7  ;;  %s697_s30 = int_to_ptr.vmem [resolvable:$true] %s696_s30 }
  0xf4   : > { %s8690_s24 = sld [smem:[#allocation49_spill]] }
  0xfa   : > { %s7217_s4 = scalar_lea.hbm %s8690_s24, 6144 }
  0xfb   : > { %p7218_p5 = scmp.ne.s32.totalorder %s8690_s24, %s7217_s4  ;;  %p7224_p10 = scmp.lt.u32.totalorder %s7217_s4, %s8690_s24 }
  0xfd   : > { %p7220_p6 = pnand %p7218_p5, %p7738_p0 }
  0xff   : > { %p7221_p9 = pneg %p7220_p6 }
 0x101   : > { %p7226_p13 = pnand %p7224_p10, %p7221_p9 }
 0x103   : > { %7229 = shalt.err (!%p7226_p13)
}
 0x104   : > { %s7230_s6 = scalar_lea.vmem %s665_s7, 6144  ;;  %p7238_p4 = scmp.lt.s32.totalorder %s665_s7, %s665_s7 }
 0x105   : > { %p7231_p1 = scmp.ne.s32.totalorder %s665_s7, %s7230_s6  ;;  %p7239_p7 = scmp.lt.s32.totalorder %s7230_s6, %s7230_s6 }
 0x107   : > { %p7233_p2 = pnand %p7231_p1, %p7738_p0  ;;  %p7240_p8 = por %p7239_p7, %p7238_p4 }
 0x109   : > { %p7234_p3 = pneg %p7233_p2 }
 0x10b   : > { %p7241_p11 = pnand %p7240_p8, %p7234_p3 }
 0x10d   : > { %7244 = shalt.err (!%p7241_p11)
}
 0x10e   : > { %s8691_s25 = smov 8   ;;  %s8692_s3 = smov 128  }
 0x10f   : > { %6295 = dma.hbm_to_vmem [thread:$0]  (!%p7726_p12), %s8690_s24, 6144, %s665_s7, [#allocation7], %s8692_s3, %s8692_s3, %s8691_s25  }
 0x110   : > { %s8693_s4 = sld [smem:[#allocation53_spill]] }
 0x116   : > { %s7245_s26 = scalar_lea.hbm %s8693_s4, 6144 }
 0x117   : > { %p7246_p5 = scmp.ne.s32.totalorder %s8693_s4, %s7245_s26  ;;  %p7252_p10 = scmp.lt.u32.totalorder %s7245_s26, %s8693_s4 }
 0x119   : > { %p7248_p6 = pnand %p7246_p5, %p7738_p0 }
 0x11b   : > { %p7249_p9 = pneg %p7248_p6 }
 0x11d   : > { %p7254_p13 = pnand %p7252_p10, %p7249_p9 }
 0x11f   : > { %7257 = shalt.err (!%p7254_p13)
}
 0x120   : > { %s7258_s8 = scalar_lea.vmem %s697_s30, 6144  ;;  %p7266_p4 = scmp.lt.s32.totalorder %s697_s30, %s697_s30 }
 0x121   : > { %p7259_p1 = scmp.ne.s32.totalorder %s697_s30, %s7258_s8  ;;  %p7267_p7 = scmp.lt.s32.totalorder %s7258_s8, %s7258_s8 }
 0x123   : > { %p7261_p2 = pnand %p7259_p1, %p7738_p0  ;;  %p7268_p8 = por %p7267_p7, %p7266_p4 }
 0x125   : > { %p7262_p3 = pneg %p7261_p2 }
 0x127   : > { %p7269_p11 = pnand %p7268_p8, %p7262_p3 }
 0x129   : > { %7272 = shalt.err (!%p7269_p11)
}
 0x12a   : > { %6301 = dma.hbm_to_vmem [thread:$0]  (!%p7726_p12), %s8693_s4, 6144, %s697_s30, [#allocation10], %s8692_s3, %s8692_s3, %s8691_s25  }
 0x12b   : > { %s7524_s9 = smov [#allocation14]   ;;  %s7525_s28 = smov [#allocation17]  }
 0x12c   : > { %s728_s21 = sshll.u32 %s7524_s9, 4  ;;  %s754_s26 = sshll.u32 %s7525_s28, 4  ;;  %s729_s21 = int_to_ptr.vmem [resolvable:$true] %s728_s21  ;;  %s755_s26 = int_to_ptr.vmem [resolvable:$true] %s754_s26 }
 0x12d   : > { %s8694_s13 = sld [smem:[#allocation57_spill]] }
 0x133   : > { %s7273_s6 = scalar_lea.hbm %s8694_s13, 64 }
 0x134   : > { %p7274_p5 = scmp.ne.s32.totalorder %s8694_s13, %s7273_s6  ;;  %p7280_p10 = scmp.lt.u32.totalorder %s7273_s6, %s8694_s13 }
 0x136   : > { %p7276_p6 = pnand %p7274_p5, %p7738_p0 }
 0x138   : > { %p7277_p9 = pneg %p7276_p6 }
 0x13a   : > { %p7282_p13 = pnand %p7280_p10, %p7277_p9 }
 0x13c   : > { %7285 = shalt.err (!%p7282_p13)
}
 0x13d   : > { %s7286_s30 = scalar_lea.vmem %s729_s21, 64  ;;  %p7294_p4 = scmp.lt.s32.totalorder %s729_s21, %s729_s21 }
 0x13e   : > { %p7287_p1 = scmp.ne.s32.totalorder %s729_s21, %s7286_s30  ;;  %p7295_p7 = scmp.lt.s32.totalorder %s7286_s30, %s7286_s30 }
 0x140   : > { %p7289_p2 = pnand %p7287_p1, %p7738_p0  ;;  %p7296_p8 = por %p7295_p7, %p7294_p4 }
 0x142   : > { %p7290_p3 = pneg %p7289_p2 }
 0x144   : > { %p7297_p11 = pnand %p7296_p8, %p7290_p3 }
 0x146   : > { %7300 = shalt.err (!%p7297_p11)
}
 0x147   : > { %s8695_s12 = smov 2   ;;  %s8696_s7 = smov 32  }
 0x148   : > { %6307 = dma.hbm_to_vmem [thread:$0]  (!%p7726_p12), %s8694_s13, 64, %s729_s21, [#allocation13], %s8696_s7, %s8696_s7, %s8695_s12  }
 0x149   : > { %s7301_s1 = scalar_lea.hbm %s8603_s15, 6144 }
 0x14a   : > { %p7302_p5 = scmp.ne.s32.totalorder %s8603_s15, %s7301_s1  ;;  %p7308_p10 = scmp.lt.u32.totalorder %s7301_s1, %s8603_s15 }
 0x14c   : > { %p7304_p6 = pnand %p7302_p5, %p7738_p0 }
 0x14e   : > { %p7305_p9 = pneg %p7304_p6 }
 0x150   : > { %p7310_p13 = pnand %p7308_p10, %p7305_p9 }
 0x152   : > { %7313 = shalt.err (!%p7310_p13)
}
 0x153   : > { %s7314_s14 = scalar_lea.vmem %s755_s26, 6144  ;;  %p7322_p4 = scmp.lt.s32.totalorder %s755_s26, %s755_s26 }
 0x154   : > { %p7315_p1 = scmp.ne.s32.totalorder %s755_s26, %s7314_s14  ;;  %p7323_p7 = scmp.lt.s32.totalorder %s7314_s14, %s7314_s14 }
 0x156   : > { %p7317_p2 = pnand %p7315_p1, %p7738_p0  ;;  %p7324_p8 = por %p7323_p7, %p7322_p4 }
 0x158   : > { %p7318_p3 = pneg %p7317_p2 }
 0x15a   : > { %p7325_p11 = pnand %p7324_p8, %p7318_p3 }
 0x15c   : > { %7328 = shalt.err (!%p7325_p11)
}
 0x15d   : > { %s7526_s21 = smov 256   ;;  %s7527_s12 = smov 16  }
 0x15e   : > { %6313 = dma.hbm_to_vmem [thread:$0]  (!%p7726_p12), %s8603_s15, 6144, %s755_s26, [#allocation16], %s7526_s21, %s7526_s21, %s7527_s12  }
 0x15f   : > { %s7528_s28 = smov [#allocation20]   ;;  %s7529_s1 = smov [#allocation23]  }
 0x160   : > { %s784_s27 = sshll.u32 %s7528_s28, 4  ;;  %s812_s6 = sshll.u32 %s7529_s1, 4  ;;  %s785_s27 = int_to_ptr.vmem [resolvable:$true] %s784_s27  ;;  %s813_s6 = int_to_ptr.vmem [resolvable:$true] %s812_s6 }
 0x161   : > { %s7329_s30 = scalar_lea.hbm %s8607_s19, 3072 }
 0x162   : > { %p7330_p5 = scmp.ne.s32.totalorder %s8607_s19, %s7329_s30  ;;  %p7336_p10 = scmp.lt.u32.totalorder %s7329_s30, %s8607_s19 }
 0x164   : > { %p7332_p6 = pnand %p7330_p5, %p7738_p0 }
 0x166   : > { %p7333_p9 = pneg %p7332_p6 }
 0x168   : > { %p7338_p13 = pnand %p7336_p10, %p7333_p9 }
 0x16a   : > { %7341 = shalt.err (!%p7338_p13)
}
 0x16b   : > { %s7342_s26 = scalar_lea.vmem %s785_s27, 3072  ;;  %p7350_p4 = scmp.lt.s32.totalorder %s785_s27, %s785_s27 }
 0x16c   : > { %p7343_p1 = scmp.ne.s32.totalorder %s785_s27, %s7342_s26  ;;  %p7351_p7 = scmp.lt.s32.totalorder %s7342_s26, %s7342_s26 }
 0x16e   : > { %p7345_p2 = pnand %p7343_p1, %p7738_p0  ;;  %p7352_p8 = por %p7351_p7, %p7350_p4 }
 0x170   : > { %p7346_p3 = pneg %p7345_p2 }
 0x172   : > { %p7353_p11 = pnand %p7352_p8, %p7346_p3 }
 0x174   : > { %7356 = shalt.err (!%p7353_p11)
}
 0x175   : > { %6319 = dma.hbm_to_vmem [thread:$0]  (!%p7726_p12), %s8607_s19, 3072, %s785_s27, [#allocation19], %s8692_s3, %s8692_s3, %s8691_s25  }
 0x176   : > { %s7357_s12 = scalar_lea.hbm %s8610_s22, 16 }
 0x177   : > { %p7358_p5 = scmp.ne.s32.totalorder %s8610_s22, %s7357_s12  ;;  %p7364_p10 = scmp.lt.u32.totalorder %s7357_s12, %s8610_s22 }
 0x179   : > { %p7360_p6 = pnand %p7358_p5, %p7738_p0 }
 0x17b   : > { %p7361_p9 = pneg %p7360_p6 }
 0x17d   : > { %p7366_p13 = pnand %p7364_p10, %p7361_p9 }
 0x17f   : > { %7369 = shalt.err (!%p7366_p13)
}
 0x180   : > { %s7370_s8 = scalar_lea.vmem %s813_s6, 16  ;;  %s7377_s25 = scalar_lea.vmem %s813_s6, 32 }
 0x181   : > { %p7371_p1 = scmp.ne.s32.totalorder %s813_s6, %s7370_s8  ;;  %p7378_p4 = scmp.lt.s32.totalorder %s813_s6, %s813_s6 }
 0x182   : > { %p7379_p7 = scmp.lt.s32.totalorder %s7377_s25, %s7370_s8 }
 0x183   : > { %p7373_p2 = pnand %p7371_p1, %p7738_p0 }
 0x184   : > { %p7380_p8 = por %p7379_p7, %p7378_p4 }
 0x185   : > { %p7374_p3 = pneg %p7373_p2 }
 0x187   : > { %p7381_p11 = pnand %p7380_p8, %p7374_p3 }
 0x189   : > { %7384 = shalt.err (!%p7381_p11)
}
 0x18a   : > { %6325 = dma.hbm_to_vmem [thread:$0]  (!%p7726_p12), %s8610_s22, 16, %s813_s6, [#allocation22]  }
 0x18b   : > { %p8697_p5 = scmp.ne.s32.totalorder %s8680_s5, 0 }
 0x18c   : > { %p8698_p6 = scmp.eq.s32.totalorder (!%p8697_p5), %s7690_s18, 0 }
 0x18d   : > { %833 = sbr.rel (%p8697_p5) target bundleno = 7439 (0x1d0f), region = 112 }
 0x194   : > { %7458 = dma.done.wait (%p8698_p6), [#allocation4], 32   ;;  %p8699_p0 = pmov %p8698_p6 }
 0x196   : > { %7460 = vsyncadd (%p8699_p0), [#allocation4], 4294967264  ;;  %p8700_p9 = pmov %p8699_p0 }
 0x197   : > { %p8701_p10 = pmov %p8699_p0 }
 0x198   : > { %7462 = dma.done.wait (%p8700_p9), [#allocation7], 21504  }
 0x199   : > { %7464 = vsyncadd (%p8701_p10), [#allocation7], 4294945792  ;;  %p8702_p13 = pmov %p8699_p0 }
 0x19a   : > { %p8703_p12 = pmov %p8699_p0 }
 0x19b   : > { %7466 = dma.done.wait (%p8702_p13), [#allocation10], 12288  }
 0x19c   : > { %7468 = vsyncadd (%p8703_p12), [#allocation10], 4294955008  ;;  %p8704_p1 = pmov %p8699_p0 }
 0x19d   : > { %p8705_p2 = pmov %p8699_p0 }
 0x19e   : > { %7470 = dma.done.wait (%p8704_p1), [#allocation13], 128  }
 0x19f   : > { %7472 = vsyncadd (%p8705_p2), [#allocation13], 4294967168  ;;  %p8706_p3 = pmov %p8699_p0 }
 0x1a0   : > { %p8707_p4 = pmov %p8699_p0 }
 0x1a1   : > { %7474 = dma.done.wait (%p8706_p3), [#allocation16], 6208  }
 0x1a2   : > { %7476 = vsyncadd (%p8707_p4), [#allocation16], 4294961088  ;;  %p8708_p7 = pmov %p8699_p0 }
 0x1a3   : > { %p8709_p8 = pmov %p8699_p0 }
 0x1a4   : > { %7478 = dma.done.wait (%p8708_p7), [#allocation19], 3136  }
 0x1a5   : > { %7480 = vsyncadd (%p8709_p8), [#allocation19], 4294964160  ;;  %p8710_p11 = pmov %p8699_p0 }
 0x1a6   : > { %p8711_p5 = pmov %p8699_p0 }
 0x1a7   : > { %7482 = dma.done.wait (%p8710_p11), [#allocation22], 48  }
 0x1a8   : > { %7484 = vsyncadd (%p8711_p5), [#allocation22], 4294967248  ;;  %s8712_s0 = sld [smem:[#allocation45_spill]]  ;;  %p955_p6 = scmp.lt.s32.totalorder %s7690_s18, 1  ;;  %vm1124_vm0 = vcmask 523264   ;;  %vm7532_vm1 = vmmov 0  }
 0x1a9   : > { %s8713_s6 = sld [smem:[#allocation44_spill]]  ;;  %v6453_v14 = vld [vmem:[#allocation6 + $0x4] ss:$20 sps:$4 sm:$0xff]   ;;  %v6455_v15 = vld [vmem:[#allocation6] ss:$20 sps:$4 sm:$0xff]   ;;  %s8714_s3 = sld [smem:[#allocation48_spill]] }
 0x1aa   : > { %s8038_s21 = scalar_select %p955_p6, %s7690_s18, 1  ;;  %1587 = vmatprep.subr.bf16.mxu1 %v6453_v14  ;;  %v6459_v18 = vld [vmem:[#allocation6 + $0x2c] ss:$20 sps:$4 sm:$0xff]   ;;  %v6461_v19 = vld [vmem:[#allocation6 + $0x28] ss:$20 sps:$4 sm:$0xff]   ;;  %v994_v14 = vlaneseq  ;;  %vm1778_vm2 = vcmask 1043456  }
 0x1ab   : > { %1588 = vmatpush1.bf16.msra.mxu1 %v6455_v15  ;;  %v6465_v20 = vld [vmem:[#allocation6 + $0x54] ss:$20 sps:$4 sm:$0xff]   ;;  %v6467_v23 = vld [vmem:[#allocation6 + $0x50] ss:$20 sps:$4 sm:$0xff]   ;;  %v6473_v27 = vld [vmem:[#allocation6 + $0x78] ss:$20 sps:$4 sm:$0xff]  }
 0x1ac   : > { %s6133_s1 = sshll.u32 %s8038_s21, 4  ;;  %1589 = vmatprep.subr.bf16.mxu1 %v6459_v18  ;;  %v6471_v24 = vld [vmem:[#allocation6 + $0x7c] ss:$20 sps:$4 sm:$0xff]   ;;  %v6477_v28 = vld [vmem:[#allocation6 + $0xa4] ss:$20 sps:$4 sm:$0xff]   ;;  %v8108_v15 = vshrl.u32 %v994_v14, 7 }
 0x1ad   : > { %v6479_v31 = vld [vmem:[#allocation6 + $0xa0] ss:$20 sps:$4 sm:$0xff]   ;;  %v6485_v35 = vld [vmem:[#allocation6 + $0xc8] ss:$20 sps:$4 sm:$0xff]   ;;  %v6491_v41 = vld [vmem:[#allocation6 + $0xf0] ss:$20 sps:$4 sm:$0xff]  }
 0x1ae   : > { %v6417_v1 = vld [vmem:[%s8712_s0 + $0x4] ss:$8 sps:$4 sm:$0xff]   ;;  %v6419_v2 = vld [vmem:[%s8712_s0] ss:$8 sps:$4 sm:$0xff]   ;;  %v6420_v3 = vld [vmem:[%s8712_s0 + $0x14] ss:$8 sps:$4 sm:$0xff]  }
 0x1af   : > { %1128 = vmatprep.subr.bf16.mxu0 %v6417_v1  ;;  %v6422_v4 = vld [vmem:[%s8712_s0 + $0x10] ss:$8 sps:$4 sm:$0xff]   ;;  %v6423_v5 = vld [vmem:[%s8712_s0 + $0x24] ss:$8 sps:$4 sm:$0xff]   ;;  %v6425_v6 = vld [vmem:[%s8712_s0 + $0x20] ss:$8 sps:$4 sm:$0xff]   ;;  %s8056_s29 = scalar_lea.vmem %s8713_s6, %s6133_s1  ;;  %1590 = vmatpush1.bf16.msra.mxu1 %v6461_v19  ;;  %s8715_s27 = smov %s8714_s3 }
 0x1b0   : > { %1129 = vmatpush1.bf16.msra.mxu0 %v6419_v2  ;;  %v6426_v7 = vld [vmem:[%s8712_s0 + $0x34] ss:$8 sps:$4 sm:$0xff]   ;;  %v6428_v8 = vld [vmem:[%s8712_s0 + $0x30] ss:$8 sps:$4 sm:$0xff]   ;;  %v6429_v9 = vld [vmem:[%s8712_s0 + $0x44] ss:$8 sps:$4 sm:$0xff]   ;;  %1591 = vmatprep.subr.bf16.mxu1 %v6465_v20 }
 0x1b1   : > { %1130 = vmatprep.subr.bf16.mxu0 %v6420_v3  ;;  %v6431_v10 = vld [vmem:[%s8712_s0 + $0x40] ss:$8 sps:$4 sm:$0xff]   ;;  %v6432_v11 = vld [vmem:[%s8712_s0 + $0x54] ss:$8 sps:$4 sm:$0xff]   ;;  %v6434_v16 = vld [vmem:[%s8712_s0 + $0x50] ss:$8 sps:$4 sm:$0xff]  }
 0x1b2   : > { %v965_v12 = vld [vmem:[%s8056_s29 + $0x8] sm:$0xff]  ;;  %v6438_v22 = vld [vmem:[%s8712_s0 + $0x74] ss:$8 sps:$4 sm:$0xff]   ;;  %v6440_v25 = vld [vmem:[%s8712_s0 + $0x70] ss:$8 sps:$4 sm:$0xff]   ;;  %v8114_v18 = vsub.s32 1, %v8108_v15 }
 0x1b3   : > { %v967_v13 = vpack.c.bf16 %v965_v12, %v965_v12  ;;  %v6435_v17 = vld [vmem:[%s8712_s0 + $0x64] ss:$8 sps:$4 sm:$0xff]   ;;  %v6437_v21 = vld [vmem:[%s8712_s0 + $0x60] ss:$8 sps:$4 sm:$0xff]   ;;  %1592 = vmatpush1.bf16.msra.mxu1 %v6467_v23  ;;  %v6444_v30 = vld [vmem:[%s8712_s0 + $0x94] ss:$8 sps:$4 sm:$0xff]  }
 0x1b4   : > { %1131 = vmatpush1.bf16.msra.mxu0 %v6422_v4  ;;  %v6441_v26 = vld [vmem:[%s8712_s0 + $0x84] ss:$8 sps:$4 sm:$0xff]   ;;  %1593 = vmatprep.subr.bf16.mxu1 %v6471_v24  ;;  %v6443_v29 = vld [vmem:[%s8712_s0 + $0x80] ss:$8 sps:$4 sm:$0xff]   ;;  %v6446_v33 = vld [vmem:[%s8712_s0 + $0x90] ss:$8 sps:$4 sm:$0xff]  }
 0x1b5   : > { %1132 = vmatprep.subr.bf16.mxu0 %v6423_v5  ;;  %5732 = vmatprep.mubr.msk.bf16.mxu0 %vm1124_vm0, %v967_v13  ;;  %v6483_v32 = vld [vmem:[#allocation6 + $0xcc] ss:$20 sps:$4 sm:$0xff]   ;;  %v6489_v36 = vld [vmem:[#allocation6 + $0xf4] ss:$20 sps:$4 sm:$0xff]   ;;  %v6495_v42 = vld [vmem:[#allocation6 + $0x11c] ss:$20 sps:$4 sm:$0xff]  }
 0x1b6   : > { %v6447_v34 = vld [vmem:[%s8712_s0 + $0xa4] ss:$8 sps:$4 sm:$0xff]   ;;  %v6449_v37 = vld [vmem:[%s8712_s0 + $0xa0] ss:$8 sps:$4 sm:$0xff]   ;;  %v6450_v38 = vld [vmem:[%s8712_s0 + $0xb4] ss:$8 sps:$4 sm:$0xff]  }
 0x1b7   : > { %1594 = vmatpush1.bf16.msra.mxu1 %v6473_v27  ;;  %v6452_v39 = vld [vmem:[%s8712_s0 + $0xb0] ss:$8 sps:$4 sm:$0xff]   ;;  %v964_v40 = vld [vmem:[%s8056_s29] sm:$0xff]  ;;  %v7530_v13 = vmov 0   ;;  %s7533_s5 = smov 64   ;;  %vm1761_vm3 = vcmask 64512  }
 0x1b8   : > { %1133 = vmatpush1.bf16.msra.mxu0 %v6425_v6  ;;  %1595 = vmatprep.subr.bf16.mxu1 %v6477_v28  ;;  %v6458_v43 = vld [vmem:[#allocation6 + $0xc] ss:$20 sps:$4 sm:$0xff]   ;;  %v6501_v45 = vld [vmem:[#allocation6 + $0x144] ss:$20 sps:$4 sm:$0xff]   ;;  %v6456_v46 = vld [vmem:[#allocation6 + $0x8] ss:$20 sps:$4 sm:$0xff]   ;;  %v966_v47 = vpack.c.bf16 %v964_v40, %v964_v40 }
 0x1b9   : > { %1134 = vmatprep.subr.bf16.mxu0 %v6426_v7  ;;  %v6497_v44 = vld [vmem:[#allocation6 + $0x118] ss:$20 sps:$4 sm:$0xff]   ;;  %v6464_v48 = vld [vmem:[#allocation6 + $0x34] ss:$20 sps:$4 sm:$0xff]   ;;  %v6462_v51 = vld [vmem:[#allocation6 + $0x30] ss:$20 sps:$4 sm:$0xff]  }
 0x1ba   : > { %v6503_v49 = vld [vmem:[#allocation6 + $0x140] ss:$20 sps:$4 sm:$0xff]   ;;  %v6470_v52 = vld [vmem:[#allocation6 + $0x5c] ss:$20 sps:$4 sm:$0xff]   ;;  %v6468_v54 = vld [vmem:[#allocation6 + $0x58] ss:$20 sps:$4 sm:$0xff]  }
 0x1bb   : > { %1596 = vmatpush1.bf16.msra.mxu1 %v6479_v31  ;;  %v6507_v50 = vld [vmem:[#allocation6 + $0x16c] ss:$20 sps:$4 sm:$0xff]   ;;  %v6509_v53 = vld [vmem:[#allocation6 + $0x168] ss:$20 sps:$4 sm:$0xff]   ;;  %v6476_v55 = vld [vmem:[#allocation6 + $0x84] ss:$20 sps:$4 sm:$0xff]  }
 0x1bc   : > { %1135 = vmatpush1.bf16.msra.mxu0 %v6428_v8  ;;  %1597 = vmatprep.subr.bf16.mxu1 %v6483_v32  ;;  %v6474_v56 = vld [vmem:[#allocation6 + $0x80] ss:$20 sps:$4 sm:$0xff]   ;;  %v6480_v58 = vld [vmem:[#allocation6 + $0xa8] ss:$20 sps:$4 sm:$0xff]   ;;  %v6486_v60 = vld [vmem:[#allocation6 + $0xd0] ss:$20 sps:$4 sm:$0xff]  }
 0x1bd   : > { %1136 = vmatprep.subr.bf16.mxu0 %v6429_v9  ;;  %v6482_v57 = vld [vmem:[#allocation6 + $0xac] ss:$20 sps:$4 sm:$0xff]   ;;  %v6488_v59 = vld [vmem:[#allocation6 + $0xd4] ss:$20 sps:$4 sm:$0xff]   ;;  %v6494_v61 = vld [vmem:[#allocation6 + $0xfc] ss:$20 sps:$4 sm:$0xff]  }
 0x1be   : > { %v6492_v62 = vld [vmem:[#allocation6 + $0xf8] ss:$20 sps:$4 sm:$0xff]   ;;  %v6498_v0 = vld [vmem:[#allocation6 + $0x120] ss:$20 sps:$4 sm:$0xff]   ;;  %v6504_v2 = vld [vmem:[#allocation6 + $0x148] ss:$20 sps:$4 sm:$0xff]  }
 0x1bf   : > { %1598 = vmatpush1.bf16.msra.mxu1 %v6485_v35  ;;  %v6500_v63 = vld [vmem:[#allocation6 + $0x124] ss:$20 sps:$4 sm:$0xff]   ;;  %v6506_v1 = vld [vmem:[#allocation6 + $0x14c] ss:$20 sps:$4 sm:$0xff]   ;;  %v6512_v3 = vld [vmem:[#allocation6 + $0x174] ss:$20 sps:$4 sm:$0xff]  }
 0x1c0   : > { %1137 = vmatpush1.bf16.msra.mxu0 %v6431_v10  ;;  %1599 = vmatprep.subr.bf16.mxu1 %v6489_v36  ;;  %v6510_v4 = vld [vmem:[#allocation6 + $0x170] ss:$20 sps:$4 sm:$0xff]   ;;  %v6513_v5 = vld [vmem:[#allocation6 + $0x194] ss:$20 sps:$4 sm:$0xff]   ;;  %v6516_v8 = vld [vmem:[#allocation6 + $0x198] ss:$20 sps:$4 sm:$0xff]  }
 0x1c1   : > { %1138 = vmatprep.subr.bf16.mxu0 %v6432_v11  ;;  %v6515_v6 = vld [vmem:[#allocation6 + $0x190] ss:$20 sps:$4 sm:$0xff]   ;;  %v6521_v10 = vld [vmem:[#allocation6 + $0x1b8] ss:$20 sps:$4 sm:$0xff]   ;;  %v6522_v12 = vld [vmem:[#allocation6 + $0x1c0] ss:$20 sps:$4 sm:$0xff]  }
 0x1c2   : > { %v6518_v7 = vld [vmem:[#allocation6 + $0x19c] ss:$20 sps:$4 sm:$0xff]   ;;  %v6524_v11 = vld [vmem:[#allocation6 + $0x1c4] ss:$20 sps:$4 sm:$0xff]   ;;  %s8716_s30 = sld [smem:[#allocation50_spill]]  ;;  %s8718_s11 = sld [smem:[#allocation55_spill]] }
 0x1c3   : > { %1600 = vmatpush1.bf16.msra.mxu1 %v6491_v41  ;;  %v6519_v9 = vld [vmem:[#allocation6 + $0x1bc] ss:$20 sps:$4 sm:$0xff]   ;;  %v6526_v32 = vld [vmem:[#allocation6 + $0x38] ss:$20 sps:$4 sm:$0xff]   ;;  %v6535_v41 = vld [vmem:[#allocation6 + $0x1a0] ss:$20 sps:$4 sm:$0xff]  }
 0x1c4   : > { %1139 = vmatpush1.bf16.msra.mxu0 %v6434_v16  ;;  %1601 = vmatprep.subr.bf16.mxu1 %v6495_v42  ;;  %v8111_v16 = vsub.s32 0, %v8108_v15  ;;  %v6529_v35 = vld [vmem:[#allocation6 + $0xb0] ss:$20 sps:$4 sm:$0xff]   ;;  %v6530_v36 = vld [vmem:[#allocation6 + $0xd8] ss:$20 sps:$4 sm:$0xff]   ;;  %s8719_s12 = sld [smem:[#allocation52_spill]] }
 0x1c5   : > { %1140 = vmatprep.subr.bf16.mxu0 %v6435_v17  ;;  %v992_v17 = vld [vmem:[#allocation3] sm:$0x3]  ;;  %v6534_v40 = vld [vmem:[#allocation6 + $0x178] ss:$20 sps:$4 sm:$0xff]   ;;  %s8720_s10 = sld [smem:[#allocation54_spill]]  ;;  %s8721_s16 = sld [smem:[#allocation60_spill]] }
 0x1c6   : > { %v997_v19 = vrot.slane %v992_v17, %v8111_v16  ;;  %v1001_v20 = vrot.slane %v992_v17, %v8114_v18  ;;  %v6536_v42 = vld [vmem:[#allocation6 + $0x1c8] ss:$20 sps:$4 sm:$0xff]   ;;  %vm4905_vm4 = vcmask 7168   ;;  %s8723_s28 = sld [smem:[#allocation37_spill]]  ;;  %vm5377_vm5 = vcmask 24576   ;;  %s8724_s29 = sld [smem:[#allocation42_spill]] }
 0x1c7   : > { %1602 = vmatpush1.bf16.msra.mxu1 %v6497_v44  ;;  %v8143_v44 = vsub.s32 2, %v8108_v15  ;;  %s6129_s25 = sshll.u32 %s7690_s18, 4  ;;  %s7534_s9 = smov [#allocation24]  }
 0x1c8   : > { %1141 = vmatpush1.bf16.msra.mxu0 %v6437_v21  ;;  %1603 = vmatprep.subr.bf16.mxu1 %v6501_v45  ;;  %v8148_v45 = vld [vmem:[%s8714_s3] sm:$0x1f]  ;;  %s8717_s14 = smov %s8716_s30 }
 0x1c9   : > { %1142 = vmatprep.subr.bf16.mxu0 %v6438_v22 }
 0x1cb   : > { %1604 = vmatpush1.bf16.msra.mxu1 %v6503_v49 }
 0x1cc   : > { %1143 = vmatpush1.bf16.msra.mxu0 %v6440_v25  ;;  %1605 = vmatprep.subr.bf16.mxu1 %v6507_v50  ;;  %v1250_v50 = vrot.slane %v8148_v45, %v8111_v16  ;;  %s8502_s1 = sand.u32 1, %s8723_s28   ;;  %p8727_p9 = scmp.ne.s32.totalorder %s8724_s29, 0 }
 0x1cd   : > { %1144 = vmatprep.subr.bf16.mxu0 %v6441_v26  ;;  %s943_s8 = scalar_lea.vmem [#allocation24], %s8502_s1  ;;  %s5413_s4 = scalar_lea.sflag [#allocation5], %s8502_s1 }
 0x1ce   : > { %s5432_s3 = sshll.u32 %s943_s8, 4  ;;  %s7389_s28 = sshll.u32 %s7534_s9, 4  ;;  %s5433_s3 = int_to_ptr.vmem [resolvable:$true] %s5432_s3  ;;  %s7390_s28 = int_to_ptr.vmem [resolvable:$false] %s7389_s28 }
 0x1cf   : > { %1606 = vmatpush1.bf16.msra.mxu1 %v6509_v53  ;;  %s7385_s7 = scalar_lea.vmem %s5433_s3, 16  ;;  %s7391_s0 = scalar_lea.vmem %s7390_s28, 32 }
 0x1d0   : > { %1145 = vmatpush1.bf16.msra.mxu0 %v6443_v29  ;;  %1607 = vmatprep.subr.bf16.mxu1 %v6513_v5  ;;  %p7386_p0 = scmp.ne.s32.totalorder %s5433_s3, %s7385_s7  ;;  %p7392_p12 = scmp.lt.s32.totalorder %s5433_s3, %s7390_s28 }
 0x1d1   : > { %1146 = vmatprep.subr.bf16.mxu0 %v6444_v30  ;;  %v6525_v30 = vld [vmem:[#allocation6 + $0x10] ss:$20 sps:$4 sm:$0xff]   ;;  %p7393_p1 = scmp.lt.s32.totalorder %s7391_s0, %s7385_s7 }
 0x1d2   : > { %p7387_p10 = pnand %p7386_p0, %p8727_p9 }
 0x1d3   : > { %1608 = vmatpush1.bf16.msra.mxu1 %v6515_v6  ;;  %p7394_p2 = por %p7393_p1, %p7392_p12 }
 0x1d4   : > { %1147 = vmatpush1.bf16.msra.mxu0 %v6446_v33  ;;  %1609 = vmatprep.subr.bf16.mxu1 %v6519_v9  ;;  %v6527_v33 = vld [vmem:[#allocation6 + $0x60] ss:$20 sps:$4 sm:$0xff]   ;;  %p7388_p13 = pneg %p7387_p10 }
 0x1d5   : > { %1148 = vmatprep.subr.bf16.mxu0 %v6447_v34  ;;  %v6528_v34 = vld [vmem:[#allocation6 + $0x88] ss:$20 sps:$4 sm:$0xff]  }
 0x1d6   : > { %p7395_p3 = pnand %p7394_p2, %p7388_p13 }
 0x1d7   : > { %1610 = vmatpush1.bf16.msra.mxu1 %v6521_v10 }
 0x1d8   : > { %1149 = vmatpush1.bf16.msra.mxu0 %v6449_v37  ;;  %1669 = vmatprep.subr.bf16.mxu1 %v7530_v13  ;;  %v6531_v37 = vld [vmem:[#allocation6 + $0x100] ss:$20 sps:$4 sm:$0xff]  }
 0x1d9   : > { %1150 = vmatprep.subr.bf16.mxu0 %v6450_v38  ;;  %v6532_v38 = vld [vmem:[#allocation6 + $0x128] ss:$20 sps:$4 sm:$0xff]  }
 0x1dc   : > { %1151 = vmatpush1.bf16.msra.mxu0 %v6452_v39  ;;  %v6533_v39 = vld [vmem:[#allocation6 + $0x150] ss:$20 sps:$4 sm:$0xff]  }
 0x1dd   : > { %1628 = vmatprep.subr.bf16.mxu0 %v6458_v43  ;;  %v7531_v43 = vmov 0.0  }
 0x1df   : > { %1161 = vmatmul.mubr.bf16.vlgmr.msra.gmra.mrb[0].mxu0 %v966_v47  ;;  %v1258_v47 = vrot.slane %v8148_v45, %v8143_v44 }
 0x1e0   : > { %1629 = vmatpush1.bf16.msra.mxu0 %v6456_v46  ;;  %v8151_v46 = vsub.s32 3, %v8108_v15 }
 0x1e1   : > { %1630 = vmatprep.subr.bf16.mxu0 %v6464_v48  ;;  %v1254_v48 = vrot.slane %v8148_v45, %v8114_v18 }
 0x1e2   : > { %v1262_v49 = vrot.slane %v8148_v45, %v8151_v46 }
 0x1e4   : > { %1631 = vmatpush1.bf16.msra.mxu0 %v6462_v51 }
 0x1e5   : > { %1632 = vmatprep.subr.bf16.mxu0 %v6470_v52 }
 0x1e8   : > { %1633 = vmatpush1.bf16.msra.mxu0 %v6468_v54 }
 0x1e9   : > { %1634 = vmatprep.subr.bf16.mxu0 %v6476_v55 }
 0x1ec   : > { %1635 = vmatpush1.bf16.msra.mxu0 %v6474_v56 }
 0x1ed   : > { %1636 = vmatprep.subr.bf16.mxu0 %v6482_v57 }
 0x1f0   : > { %1637 = vmatpush1.bf16.msra.mxu0 %v6480_v58 }
 0x1f1   : > { %1638 = vmatprep.subr.bf16.mxu0 %v6488_v59 }
 0x1f4   : > { %1639 = vmatpush1.bf16.msra.mxu0 %v6486_v60 }
 0x1f5   : > { %1640 = vmatprep.subr.bf16.mxu0 %v6494_v61 }
 0x1f8   : > { %1641 = vmatpush1.bf16.msra.mxu0 %v6492_v62 }
 0x1f9   : > { %1642 = vmatprep.subr.bf16.mxu0 %v6500_v63 }
 0x1fc   : > { %1643 = vmatpush1.bf16.msra.mxu0 %v6498_v0 }
 0x1fd   : > { %1644 = vmatprep.subr.bf16.mxu0 %v6506_v1 }
 0x200   : > { %1645 = vmatpush1.bf16.msra.mxu0 %v6504_v2 }
 0x201   : > { %1646 = vmatprep.subr.bf16.mxu0 %v6512_v3 }
 0x204   : > { %1647 = vmatpush1.bf16.msra.mxu0 %v6510_v4 }
 0x205   : > { %1648 = vmatprep.subr.bf16.mxu0 %v6518_v7 }
 0x208   : > { %1649 = vmatpush1.bf16.msra.mxu0 %v6516_v8 }
 0x209   : > { %1650 = vmatprep.subr.bf16.mxu0 %v6524_v11 }
 0x20c   : > { %1651 = vmatpush1.bf16.msra.mxu0 %v6522_v12 }
 0x20d   : > { %6158 = vmatprep.subr.bf16.mxu0 %v7531_v43 }
 0x2b2   : > { %v1162_v21 = vpop.f32.mrb[0].mxu0 }
 0x2b3   : > { %v1163_v22 = vadd.f32 %v1162_v21, %v997_v19  ;;  %v1164_v23 = vpop.f32.mrb[1].mxu0 }
 0x2b4   : > { %v1165_v24 = vadd.f32 %v1164_v23, %v1001_v20  ;;  %v1166_v25 = vpop.f32.mrb[2].mxu0 }
 0x2b5   : > { %v8118_v26 = vmax.f32 %v1163_v22, 0.0  ;;  %v1167_v27 = vpop.f32.mrb[3].mxu0 }
 0x2b6   : > { %v8120_v28 = vmax.f32 %v1165_v24, 0.0 }
 0x2b7   : > { %v1171_v31 = vpack.c.bf16 %v8118_v26, %v8118_v26 }
 0x2b8   : > { %v1172_v29 = vpack.c.bf16 %v8120_v28, %v8120_v28 }
 0x2ba   : > { %5793 = vmatprep.mubr.msk.bf16.mxu1 %vm1124_vm0, %v1172_v29  ;;  %5794 = vmatprep.mubr.msk.bf16.mxu0 %vm1124_vm0, %v1172_v29 }
 0x2bb   : > { %1620 = vmatmul.mubr.bf16.vlgmr.msra.gmra.mrb[0].mxu1 %v1171_v31  ;;  %1661 = vmatmul.mubr.bf16.vlgmr.msra.gmra.mrb[4].mxu0 %v1171_v31 }
 0x2bc   : > { %1670 = vmatpush1.bf16.msra.mxu1 %v6525_v30  ;;  %5795 = vmatprep.mubr.msk.bf16.mxu1 %vm1124_vm0, %v1172_v29 }
 0x2bd   : > { %1671 = vmatprep.subr.bf16.mxu1 %v7530_v13  ;;  %6160 = vmatprep.mubr.msk.bf16.mxu0 %vm7532_vm1, %v7531_v43 }
 0x2c0   : > { %1672 = vmatpush1.bf16.msra.mxu1 %v6526_v32 }
 0x2c1   : > { %1673 = vmatprep.subr.bf16.mxu1 %v7530_v13 }
 0x2c4   : > { %1674 = vmatpush1.bf16.msra.mxu1 %v6527_v33 }
 0x2c5   : > { %1675 = vmatprep.subr.bf16.mxu1 %v7530_v13 }
 0x2c8   : > { %1676 = vmatpush1.bf16.msra.mxu1 %v6528_v34 }
 0x2c9   : > { %1677 = vmatprep.subr.bf16.mxu1 %v7530_v13 }
 0x2cc   : > { %1678 = vmatpush1.bf16.msra.mxu1 %v6529_v35 }
 0x2cd   : > { %1679 = vmatprep.subr.bf16.mxu1 %v7530_v13 }
 0x2d0   : > { %1680 = vmatpush1.bf16.msra.mxu1 %v6530_v36 }
 0x2d1   : > { %1681 = vmatprep.subr.bf16.mxu1 %v7530_v13 }
 0x2d4   : > { %1682 = vmatpush1.bf16.msra.mxu1 %v6531_v37 }
 0x2d5   : > { %1683 = vmatprep.subr.bf16.mxu1 %v7530_v13 }
 0x2d8   : > { %1684 = vmatpush1.bf16.msra.mxu1 %v6532_v38 }
 0x2d9   : > { %1685 = vmatprep.subr.bf16.mxu1 %v7530_v13 }
 0x2dc   : > { %1686 = vmatpush1.bf16.msra.mxu1 %v6533_v39 }
 0x2dd   : > { %1687 = vmatprep.subr.bf16.mxu1 %v7530_v13 }
 0x2e0   : > { %1688 = vmatpush1.bf16.msra.mxu1 %v6534_v40 }
 0x2e1   : > { %1689 = vmatprep.subr.bf16.mxu1 %v7530_v13 }
 0x2e4   : > { %1690 = vmatpush1.bf16.msra.mxu1 %v6535_v41 }
 0x2e5   : > { %1691 = vmatprep.subr.bf16.mxu1 %v7530_v13 }
 0x2e8   : > { %1692 = vmatpush1.bf16.msra.mxu1 %v6536_v42 }
 0x2e9   : > { %6164 = vmatprep.subr.bf16.mxu1 %v7531_v43 }
 0x2eb   : > { %1702 = vmatmul.mubr.bf16.vlgmr.msra.gmra.mrb[4].mxu1 %v1171_v31 }
 0x2ec   : > { %6166 = vmatprep.mubr.msk.bf16.mxu1 %vm7532_vm1, %v7531_v43 }
 0x38e   : > { %v1621_v51 = vpop.f32.mrb[0].mxu1  ;;  %v1662_v52 = vpop.f32.mrb[4].mxu0 }
 0x38f   : > { %v1663_v53 = vadd.f32 %v1662_v52, %v1258_v47  ;;  %v1623_v54 = vpop.f32.mrb[1].mxu1  ;;  %v1664_v55 = vpop.f32.mrb[5].mxu0  ;;  %v1622_v63 = vadd.f32 %v1621_v51, %v1250_v50 }
 0x390   : > { %v1624_v56 = vadd.f32 %v1623_v54, %v1254_v48  ;;  %v1665_v57 = vadd.f32 %v1664_v55, %v1262_v49  ;;  %v1625_v58 = vpop.f32.mrb[2].mxu1  ;;  %v1666_v59 = vpop.f32.mrb[6].mxu0 }
 0x391   : > { %v1822_v60 = vpack.c.bf16 %v1663_v53, %v1663_v53  ;;  %v1626_v61 = vpop.f32.mrb[3].mxu1  ;;  %v1667_v62 = vpop.f32.mrb[7].mxu0  ;;  %v1709_v3 = vpack.c.bf16 %v1622_v63, %v1622_v63  ;;  %v1265_v59 = vsub.s32 4, %v8108_v15 }
 0x392   : > { %v1710_v0 = vpack.c.bf16 %v1624_v56, %v1624_v56  ;;  %v8165_v1 = vpack.c.bf16 %v1665_v57, %v1665_v57 }
 0x393   : > { %1935 = vrot.lane.b32.xlu1 %v1822_v60, %s7533_s5  ;;  %v1830_v10 = vsel %vm1124_vm0, %v1822_v60, 0  ;;  %v1266_v62 = vrot.slane %v8148_v45, %v1265_v59 }
 0x394   : > { %v1780_v2 = vsel %vm1778_vm2, %v8165_v1, 0  ;;  %1712 = vrot.lane.b32.xlu0 %v1710_v0, %s7533_s5 }
 0x395   : > { %6165 = vmatpush3.bf16.msra.mxu1 %v1780_v2 }
 0x396   : > { %6176 = vmatprep.subr.bf16.mxu1 %v7531_v43 }
 0x398   : > { %1824 = vrot.lane.b32.xlu0 %v1709_v3, %s7533_s5 }
 0x3be   : > { %v8173_v4 = vpop.f32.mrb[4].mxu1 }
 0x3bf   : > { %v1705_v5 = vpop.f32.mrb[5].mxu1 }
 0x3c0   : > { %v1706_v6 = vpop.f32.mrb[6].mxu1 }
 0x3c1   : > { %v1707_v7 = vpop.f32.mrb[7].mxu1 }
 0x405   : > { %v1936_v11 = vpop.permute.xlu1 %1935 }
 0x406   : > { %v1713_v8 = vpop.permute.xlu0 %1712  ;;  %v1941_v17 = vsel %vm1124_vm0, %v1936_v11, 0 }
 0x407   : > { %v1718_v9 = vsel %vm1124_vm0, %v1713_v8, 0 }
 0x408   : > { %6159 = vmatpush3.bf16.xpose.msra.mxu0 %v1718_v9 }
 0x409   : > { %6170 = vmatprep.subr.bf16.mxu0 %v7531_v43 }
 0x40a   : > { %v1825_v12 = vpop.permute.xlu0 %1824 }
 0x40f   : > { %6161 = vmatmul.mubr.msk.bf16.vlgmr.msra.gmra.mrb[8].mxu0 %vm1124_vm0, %v1709_v3  ;;  %v1704_v3 = vadd.f32 %v8173_v4, %v1266_v62 }
 0x410   : > { %6171 = vmatpush3.bf16.xpose.msra.mxu0 %v1830_v10  ;;  %6172 = vmatprep.mubr.msk.bf16.mxu0 %vm7532_vm1, %v7531_v43 }
 0x411   : > { %6182 = vmatprep.subr.bf16.mxu0 %v7531_v43  ;;  %v1996_v7 = vpack.c.bf16 %v1704_v3, %v1704_v3 }
 0x413   : > { %v2001_v9 = vsel %vm1778_vm2, %v1996_v7, 0 }
 0x417   : > { %6173 = vmatmul.mubr.msk.bf16.vlgmr.msra.gmra.mrb[12].mxu0 %vm1124_vm0, %v1825_v12  ;;  %v6537_v12 = vld [vmem:[#allocation8] ss:$8 sps:$4 sm:$0xff]  }
 0x418   : > { %6183 = vmatpush3.bf16.xpose.msra.mxu0 %v1941_v17  ;;  %6184 = vmatprep.mubr.msk.bf16.mxu0 %vm7532_vm1, %v7531_v43  ;;  %v6539_v17 = vld [vmem:[#allocation8 + $0x4] ss:$8 sps:$4 sm:$0xff]  }
 0x419   : > { %2209 = vmatprep.subr.bf16.mxu0 %v6539_v17  ;;  %v6575_v17 = vld [vmem:[#allocation9 + $0x4] ss:$8 sps:$4 sm:$0xff]  }
 0x41f   : > { %6185 = vmatmul.mubr.msk.bf16.vlgmr.msra.gmra.mrb[16].mxu0 %vm1124_vm0, %v1710_v0 }
 0x420   : > { %2210 = vmatpush1.bf16.msra.mxu0 %v6537_v12  ;;  %v6573_v12 = vld [vmem:[#allocation9] ss:$8 sps:$4 sm:$0xff]  }
 0x4e2   : > { %v1754_v19 = vpop.f32.mrb[8].mxu0 }
 0x4e3   : > { %v1760_v20 = vmul.f32 0.125, %v1754_v19  ;;  %v6162_v21 = vpop.f32.mrb[9].mxu0  ;;  %v6542_v19 = vld [vmem:[#allocation8 + $0x14] ss:$8 sps:$4 sm:$0xff]  }
 0x4e4   : > { %v1757_v22 = vpop.f32.mrb[10].mxu0  ;;  %2211 = vmatprep.subr.bf16.mxu0 %v6542_v19  ;;  %v6545_v21 = vld [vmem:[#allocation8 + $0x24] ss:$8 sps:$4 sm:$0xff]   ;;  %v6578_v19 = vld [vmem:[#allocation9 + $0x14] ss:$8 sps:$4 sm:$0xff]  }
 0x4e5   : > { %v6163_v23 = vpop.f32.mrb[11].mxu0  ;;  %v1762_v24 = vsel %vm1761_vm3, %v1760_v20, -inf  ;;  %v6543_v22 = vld [vmem:[#allocation8 + $0x20] ss:$8 sps:$4 sm:$0xff]  }
 0x4e6   : > { %1763 = vmax.xlane.f32.xlu1 %v1762_v24  ;;  %v6548_v23 = vld [vmem:[#allocation8 + $0x34] ss:$8 sps:$4 sm:$0xff]   ;;  %v6546_v24 = vld [vmem:[#allocation8 + $0x30] ss:$8 sps:$4 sm:$0xff]  }
 0x4ea   : > { %v1866_v25 = vpop.f32.mrb[12].mxu0 }
 0x4eb   : > { %v1872_v27 = vmul.f32 0.125, %v1866_v25  ;;  %v6174_v29 = vpop.f32.mrb[13].mxu0  ;;  %v6551_v25 = vld [vmem:[#allocation8 + $0x44] ss:$8 sps:$4 sm:$0xff]  }
 0x4ec   : > { %v1869_v30 = vpop.f32.mrb[14].mxu0  ;;  %v6554_v29 = vld [vmem:[#allocation8 + $0x54] ss:$8 sps:$4 sm:$0xff]  }
 0x4ed   : > { %v6175_v31 = vpop.f32.mrb[15].mxu0  ;;  %v1873_v32 = vsel %vm1761_vm3, %v1872_v27, -inf  ;;  %v6552_v30 = vld [vmem:[#allocation8 + $0x50] ss:$8 sps:$4 sm:$0xff]  }
 0x4ee   : > { %1874 = vmax.xlane.f32.xlu0 %v1873_v32  ;;  %v6557_v31 = vld [vmem:[#allocation8 + $0x64] ss:$8 sps:$4 sm:$0xff]   ;;  %v6555_v32 = vld [vmem:[#allocation8 + $0x60] ss:$8 sps:$4 sm:$0xff]  }
 0x4f2   : > { %v1977_v33 = vpop.f32.mrb[16].mxu0 }
 0x4f3   : > { %v1983_v34 = vmul.f32 0.125, %v1977_v33  ;;  %v6186_v35 = vpop.f32.mrb[17].mxu0  ;;  %v6560_v33 = vld [vmem:[#allocation8 + $0x74] ss:$8 sps:$4 sm:$0xff]  }
 0x4f4   : > { %v1980_v36 = vpop.f32.mrb[18].mxu0  ;;  %v6563_v35 = vld [vmem:[#allocation8 + $0x84] ss:$8 sps:$4 sm:$0xff]  }
 0x4f5   : > { %v6187_v37 = vpop.f32.mrb[19].mxu0  ;;  %v1984_v38 = vsel %vm1761_vm3, %v1983_v34, -inf  ;;  %v6561_v36 = vld [vmem:[#allocation8 + $0x80] ss:$8 sps:$4 sm:$0xff]  }
 0x4f6   : > { %1985 = vmax.xlane.f32.xlu0 %v1984_v38  ;;  %v6566_v37 = vld [vmem:[#allocation8 + $0x94] ss:$8 sps:$4 sm:$0xff]   ;;  %v6564_v38 = vld [vmem:[#allocation8 + $0x90] ss:$8 sps:$4 sm:$0xff]  }
 0x573   : > { %v1764_v39 = vpop.xlane.xlu1 %1763 }
 0x574   : > { %v1765_v40 = vsub.f32 %v1760_v20, %v1764_v39  ;;  %v6540_v20 = vld [vmem:[#allocation8 + $0x10] ss:$8 sps:$4 sm:$0xff]   ;;  %v6569_v39 = vld [vmem:[#allocation8 + $0xa4] ss:$8 sps:$4 sm:$0xff]  }
 0x575   : > { %2212 = vmatpush1.bf16.msra.mxu0 %v6540_v20  ;;  %v6576_v20 = vld [vmem:[#allocation9 + $0x10] ss:$8 sps:$4 sm:$0xff]  }
 0x576   : > { %v1766_v41 = vmul.f32 1.442695, %v1765_v40  ;;  %2213 = vmatprep.subr.bf16.mxu0 %v6545_v21  ;;  %v6567_v40 = vld [vmem:[#allocation8 + $0xa0] ss:$8 sps:$4 sm:$0xff]   ;;  %v6581_v21 = vld [vmem:[#allocation9 + $0x24] ss:$8 sps:$4 sm:$0xff]  }
 0x578   : > { %6969 = vpow2.f32 %v1766_v41  ;;  %v6572_v41 = vld [vmem:[#allocation8 + $0xb4] ss:$8 sps:$4 sm:$0xff]  }
 0x579   : > { %2214 = vmatpush1.bf16.msra.mxu0 %v6543_v22  ;;  %v6579_v22 = vld [vmem:[#allocation9 + $0x20] ss:$8 sps:$4 sm:$0xff]  }
 0x57a   : > { %2215 = vmatprep.subr.bf16.mxu0 %v6548_v23  ;;  %v6584_v23 = vld [vmem:[#allocation9 + $0x34] ss:$8 sps:$4 sm:$0xff]  }
 0x57b   : > { %v1875_v42 = vpop.xlane.xlu0 %1874 }
 0x57c   : > { %v1876_v47 = vsub.f32 %v1872_v27, %v1875_v42  ;;  %v6549_v27 = vld [vmem:[#allocation8 + $0x40] ss:$8 sps:$4 sm:$0xff]   ;;  %v6570_v42 = vld [vmem:[#allocation8 + $0xb0] ss:$8 sps:$4 sm:$0xff]  }
 0x57d   : > { %2216 = vmatpush1.bf16.msra.mxu0 %v6546_v24  ;;  %v6585_v24 = vld [vmem:[#allocation9 + $0x40] ss:$8 sps:$4 sm:$0xff]  }
 0x57e   : > { %v1877_v48 = vmul.f32 1.442695, %v1876_v47  ;;  %2217 = vmatprep.subr.bf16.mxu0 %v6551_v25  ;;  %v6590_v25 = vld [vmem:[#allocation9 + $0x54] ss:$8 sps:$4 sm:$0xff]  }
 0x580   : > { %6971 = vpow2.f32 %v1877_v48 }
 0x581   : > { %2218 = vmatpush1.bf16.msra.mxu0 %v6549_v27  ;;  %v6588_v27 = vld [vmem:[#allocation9 + $0x50] ss:$8 sps:$4 sm:$0xff]  }
 0x582   : > { %v6970_v49 = vpop.eup %6969  ;;  %2219 = vmatprep.subr.bf16.mxu0 %v6554_v29 }
 0x583   : > { %v1986_v50 = vpop.xlane.xlu0 %1985  ;;  %v1768_v51 = vsel %vm1761_vm3, %v6970_v49, 0.0 }
 0x584   : > { %v1987_v52 = vsub.f32 %v1983_v34, %v1986_v50  ;;  %1769 = vadd.xlane.f32.xlu1 %v1768_v51  ;;  %v6558_v34 = vld [vmem:[#allocation8 + $0x70] ss:$8 sps:$4 sm:$0xff]  }
 0x585   : > { %2220 = vmatpush1.bf16.msra.mxu0 %v6552_v30 }
 0x586   : > { %v1988_v53 = vmul.f32 1.442695, %v1987_v52  ;;  %2221 = vmatprep.subr.bf16.mxu0 %v6557_v31 }
 0x588   : > { %6973 = vpow2.f32 %v1988_v53 }
 0x589   : > { %2222 = vmatpush1.bf16.msra.mxu0 %v6555_v32 }
 0x58a   : > { %v6972_v54 = vpop.eup %6971  ;;  %2223 = vmatprep.subr.bf16.mxu0 %v6560_v33 }
 0x58b   : > { %v1879_v55 = vsel %vm1761_vm3, %v6972_v54, 0.0 }
 0x58c   : > { %1880 = vadd.xlane.f32.xlu0 %v1879_v55 }
 0x58d   : > { %2224 = vmatpush1.bf16.msra.mxu0 %v6558_v34 }
 0x58e   : > { %2225 = vmatprep.subr.bf16.mxu0 %v6563_v35 }
 0x591   : > { %2226 = vmatpush1.bf16.msra.mxu0 %v6561_v36 }
 0x592   : > { %v6974_v56 = vpop.eup %6973  ;;  %2227 = vmatprep.subr.bf16.mxu0 %v6566_v37  ;;  %v6593_v37 = vld [vmem:[#allocation9 + $0x64] ss:$8 sps:$4 sm:$0xff]  }
 0x593   : > { %v1990_v57 = vsel %vm1761_vm3, %v6974_v56, 0.0 }
 0x594   : > { %1991 = vadd.xlane.f32.xlu0 %v1990_v57 }
 0x595   : > { %1886 = vrot.lane.b32.xlu1 %v8165_v1, %s7533_s5  ;;  %2228 = vmatpush1.bf16.msra.mxu0 %v6564_v38  ;;  %v6591_v38 = vld [vmem:[#allocation9 + $0x60] ss:$8 sps:$4 sm:$0xff]  }
 0x596   : > { %2229 = vmatprep.subr.bf16.mxu0 %v6569_v39  ;;  %v6596_v39 = vld [vmem:[#allocation9 + $0x74] ss:$8 sps:$4 sm:$0xff]  }
 0x599   : > { %2230 = vmatpush1.bf16.msra.mxu0 %v6567_v40  ;;  %v6594_v40 = vld [vmem:[#allocation9 + $0x70] ss:$8 sps:$4 sm:$0xff]  }
 0x59a   : > { %2231 = vmatprep.subr.bf16.mxu0 %v6572_v41  ;;  %v6599_v41 = vld [vmem:[#allocation9 + $0x84] ss:$8 sps:$4 sm:$0xff]  }
 0x59d   : > { %2232 = vmatpush1.bf16.msra.mxu0 %v6570_v42  ;;  %v6597_v42 = vld [vmem:[#allocation9 + $0x80] ss:$8 sps:$4 sm:$0xff]  }
 0x611   : > { %v1770_v58 = vpop.xlane.xlu1 %1769 }
 0x612   : > { %6975 = vrcp.f32 %v1770_v58 }
 0x615   : > { %v1887_v0 = vpop.permute.xlu1 %1886 }
 0x616   : > { %v1892_v5 = vsel %vm1778_vm2, %v1887_v0, 0  ;;  %v2074_v0 = vld [vmem:[%s8716_s30] sm:$0x3]  ;;  %s8725_s30 = sld [smem:[#allocation62_spill]] }
 0x617   : > { %v2083_v3 = vrot.slane %v2074_v0, %v8114_v18 }
 0x619   : > { %v1881_v60 = vpop.xlane.xlu0 %1880 }
 0x61a   : > { %6977 = vrcp.f32 %v1881_v60 }
 0x61c   : > { %v6976_v61 = vpop.eup %6975  ;;  %s8726_s26 = smov %s8725_s30  ;;  %s8519_s13 = scalar_lea.hbm %s8725_s30, %s6129_s25 }
 0x61d   : > { %v1772_v63 = vmul.f32 %v6976_v61, %v6970_v49 }
 0x61f   : > { %v1773_v2 = vpack.c.bf16 %v1772_v63, %v1772_v63 }
 0x621   : > { %6167 = vmatmul.mubr.msk.bf16.vlgmr.msra.gmra.mrb[8].mxu1 %vm1761_vm3, %v1773_v2  ;;  %v1992_v1 = vpop.xlane.xlu0 %1991  ;;  %v2079_v2 = vrot.slane %v2074_v0, %v8111_v16  ;;  %v6626_v0 = vld [vmem:[#allocation11 + $0x54] ss:$8 sps:$4 sm:$0xff]  }
 0x622   : > { %6177 = vmatpush3.bf16.msra.mxu1 %v1892_v5  ;;  %6979 = vrcp.f32 %v1992_v1  ;;  %6178 = vmatprep.mubr.msk.bf16.mxu1 %vm7532_vm1, %v7531_v43 }
 0x623   : > { %6188 = vmatprep.subr.bf16.mxu1 %v7531_v43 }
 0x624   : > { %v6978_v6 = vpop.eup %6977 }
 0x625   : > { %v1883_v45 = vmul.f32 %v6978_v6, %v6972_v54 }
 0x627   : > { %v1884_v8 = vpack.c.bf16 %v1883_v45, %v1883_v45 }
 0x629   : > { %6179 = vmatmul.mubr.msk.bf16.vlgmr.msra.gmra.mrb[12].mxu1 %vm1761_vm3, %v1884_v8 }
 0x62a   : > { %6189 = vmatpush3.bf16.msra.mxu1 %v2001_v9  ;;  %6190 = vmatprep.mubr.msk.bf16.mxu1 %vm7532_vm1, %v7531_v43 }
 0x62b   : > { %2460 = vmatprep.subr.bf16.mxu1 %v6575_v17  ;;  %v2253_v17 = vld [vmem:[#allocation12] sm:$0x3] }
 0x62c   : > { %v6980_v4 = vpop.eup %6979 }
 0x62d   : > { %v1994_v10 = vmul.f32 %v6980_v4, %v6974_v56 }
 0x62f   : > { %v1995_v11 = vpack.c.bf16 %v1994_v10, %v1994_v10 }
 0x631   : > { %6191 = vmatmul.mubr.msk.bf16.vlgmr.msra.gmra.mrb[16].mxu1 %vm1761_vm3, %v1995_v11 }
 0x632   : > { %2461 = vmatpush1.bf16.msra.mxu1 %v6573_v12  ;;  %v2252_v12 = vld [vmem:[%s8718_s11] sm:$0x3] }
 0x633   : > { %2462 = vmatprep.subr.bf16.mxu1 %v6578_v19  ;;  %v2281_v19 = vrot.slane %v2252_v12, %v8114_v18 }
 0x636   : > { %2463 = vmatpush1.bf16.msra.mxu1 %v6576_v20  ;;  %v2277_v20 = vrot.slane %v2252_v12, %v8111_v16  ;;  %v6657_v12 = vld [vmem:[#allocation6 + $0x230] ss:$20 sps:$4 sm:$0xff]  }
 0x637   : > { %2464 = vmatprep.subr.bf16.mxu1 %v6581_v21 }
 0x63a   : > { %2465 = vmatpush1.bf16.msra.mxu1 %v6579_v22 }
 0x63b   : > { %2466 = vmatprep.subr.bf16.mxu1 %v6584_v23 }
 0x6f4   : > { %v1816_v47 = vpop.f32.mrb[8].mxu1 }
 0x6f5   : > { %v6168_v48 = vpop.f32.mrb[9].mxu1 }
 0x6f6   : > { %v1819_v49 = vpop.f32.mrb[10].mxu1  ;;  %v6600_v48 = vld [vmem:[#allocation9 + $0x90] ss:$8 sps:$4 sm:$0xff]  }
 0x6f7   : > { %v6169_v50 = vpop.f32.mrb[11].mxu1  ;;  %v6603_v49 = vld [vmem:[#allocation9 + $0xa0] ss:$8 sps:$4 sm:$0xff]  }
 0x6f8   : > { %v6605_v50 = vld [vmem:[#allocation9 + $0xa4] ss:$8 sps:$4 sm:$0xff]  }
 0x6fc   : > { %v1928_v51 = vpop.f32.mrb[12].mxu1 }
 0x6fd   : > { %2044 = vrot.lane.b32.xlu0 %v1928_v51, %s7533_s5  ;;  %v6180_v52 = vpop.f32.mrb[13].mxu1  ;;  %v6608_v51 = vld [vmem:[#allocation9 + $0xb4] ss:$8 sps:$4 sm:$0xff]  }
 0x6fe   : > { %v1931_v53 = vpop.f32.mrb[14].mxu1  ;;  %v6606_v52 = vld [vmem:[#allocation9 + $0xb0] ss:$8 sps:$4 sm:$0xff]  }
 0x6ff   : > { %v6181_v54 = vpop.f32.mrb[15].mxu1  ;;  %v6609_v53 = vld [vmem:[#allocation11] ss:$8 sps:$4 sm:$0xff]  }
 0x700   : > { %v6611_v54 = vld [vmem:[#allocation11 + $0x4] ss:$8 sps:$4 sm:$0xff]  }
 0x701   : > { %2664 = vmatprep.subr.bf16.mxu0 %v6611_v54 }
 0x704   : > { %v2037_v55 = vpop.f32.mrb[16].mxu1 }
 0x705   : > { %v2049_v56 = vpack.c.bf16 %v2037_v55, %v2037_v55  ;;  %v6192_v57 = vpop.f32.mrb[17].mxu1  ;;  %v6614_v55 = vld [vmem:[#allocation11 + $0x14] ss:$8 sps:$4 sm:$0xff]  }
 0x706   : > { %v2040_v58 = vpop.f32.mrb[18].mxu1  ;;  %v6617_v57 = vld [vmem:[#allocation11 + $0x24] ss:$8 sps:$4 sm:$0xff]  }
 0x707   : > { %v6193_v60 = vpop.f32.mrb[19].mxu1  ;;  %5826 = vmatprep.mubr.msk.bf16.mxu0 %vm1124_vm0, %v2049_v56  ;;  %v6612_v56 = vld [vmem:[#allocation11 + $0x10] ss:$8 sps:$4 sm:$0xff]   ;;  %v6615_v58 = vld [vmem:[#allocation11 + $0x20] ss:$8 sps:$4 sm:$0xff]  }
 0x708   : > { %v6620_v60 = vld [vmem:[#allocation11 + $0x34] ss:$8 sps:$4 sm:$0xff]  }
 0x76f   : > { %v2045_v61 = vpop.permute.xlu0 %2044 }
 0x770   : > { %v2047_v62 = vsel %vm1124_vm0, %v1816_v47, %v2045_v61  ;;  %v6602_v47 = vld [vmem:[#allocation9 + $0x94] ss:$8 sps:$4 sm:$0xff]   ;;  %v6618_v61 = vld [vmem:[#allocation11 + $0x30] ss:$8 sps:$4 sm:$0xff]  }
 0x771   : > { %v2048_v63 = vpack.c.bf16 %v2047_v62, %v2047_v62  ;;  %v6623_v62 = vld [vmem:[#allocation11 + $0x44] ss:$8 sps:$4 sm:$0xff]  }
 0x773   : > { %2242 = vmatmul.mubr.bf16.vlgmr.msra.gmra.mrb[20].mxu0 %v2048_v63  ;;  %v6621_v63 = vld [vmem:[#allocation11 + $0x40] ss:$8 sps:$4 sm:$0xff]  }
 0x774   : > { %2665 = vmatpush1.bf16.msra.mxu0 %v6609_v53  ;;  %v2529_v53 = vld [vmem:[%s8720_s10] sm:$0x3] }
 0x775   : > { %2666 = vmatprep.subr.bf16.mxu0 %v6614_v55  ;;  %v2534_v54 = vrot.slane %v2529_v53, %v8111_v16  ;;  %v2538_v55 = vrot.slane %v2529_v53, %v8114_v18  ;;  %v6698_v53 = vld [vmem:[#allocation6 + $0x32c] ss:$20 sps:$4 sm:$0xff]  }
 0x778   : > { %2667 = vmatpush1.bf16.msra.mxu0 %v6612_v56 }
 0x779   : > { %2668 = vmatprep.subr.bf16.mxu0 %v6617_v57 }
 0x77c   : > { %2669 = vmatpush1.bf16.msra.mxu0 %v6615_v58 }
 0x77d   : > { %2670 = vmatprep.subr.bf16.mxu0 %v6620_v60 }
 0x780   : > { %2671 = vmatpush1.bf16.msra.mxu0 %v6618_v61 }
 0x781   : > { %2672 = vmatprep.subr.bf16.mxu0 %v6623_v62 }
 0x784   : > { %2673 = vmatpush1.bf16.msra.mxu0 %v6621_v63 }
 0x785   : > { %2674 = vmatprep.subr.bf16.mxu0 %v6626_v0 }
 0x846   : > { %v2243_v5 = vpop.f32.mrb[20].mxu0 }
 0x847   : > { %v2244_v1 = vadd.f32 %v2243_v5, %v2079_v2  ;;  %v2245_v6 = vpop.f32.mrb[21].mxu0  ;;  %v6624_v2 = vld [vmem:[#allocation11 + $0x50] ss:$8 sps:$4 sm:$0xff]   ;;  %v6627_v5 = vld [vmem:[#allocation11 + $0x60] ss:$8 sps:$4 sm:$0xff]  }
 0x848   : > { %v2246_v7 = vadd.f32 %v2245_v6, %v2083_v3  ;;  %v2247_v45 = vpop.f32.mrb[22].mxu0  ;;  %v6629_v3 = vld [vmem:[#allocation11 + $0x64] ss:$8 sps:$4 sm:$0xff]   ;;  %2675 = vmatpush1.bf16.msra.mxu0 %v6624_v2  ;;  %v6630_v6 = vld [vmem:[#allocation11 + $0x70] ss:$8 sps:$4 sm:$0xff]  }
 0x849   : > { %v2248_v8 = vpop.f32.mrb[23].mxu0  ;;  %v2250_v4 = vadd.f32 %v2244_v1, %v8118_v26  ;;  %v6587_v26 = vld [vmem:[#allocation9 + $0x44] ss:$8 sps:$4 sm:$0xff]   ;;  %2676 = vmatprep.subr.bf16.mxu0 %v6629_v3  ;;  %v6632_v1 = vld [vmem:[#allocation11 + $0x74] ss:$8 sps:$4 sm:$0xff]  }
 0x84a   : > { %v2251_v9 = vadd.f32 %v2246_v7, %v8120_v28  ;;  %v6582_v28 = vld [vmem:[#allocation9 + $0x30] ss:$8 sps:$4 sm:$0xff]   ;;  %v6635_v7 = vld [vmem:[#allocation11 + $0x84] ss:$8 sps:$4 sm:$0xff]   ;;  %v6633_v45 = vld [vmem:[#allocation11 + $0x80] ss:$8 sps:$4 sm:$0xff]  }
 0x84b   : > { %2467 = vmatpush1.bf16.msra.mxu1 %v6582_v28  ;;  %v6638_v8 = vld [vmem:[#allocation11 + $0x94] ss:$8 sps:$4 sm:$0xff]   ;;  %v2294_v28 = vrot.slane %v2253_v17, %v8114_v18 }
 0x84c   : > { %v2254_v10 = vsel %vm1124_vm0, %v2251_v9, 0.0  ;;  %2468 = vmatprep.subr.bf16.mxu1 %v6587_v26  ;;  %2677 = vmatpush1.bf16.msra.mxu0 %v6627_v5  ;;  %v2290_v26 = vrot.slane %v2253_v17, %v8111_v16  ;;  %v6645_v5 = vld [vmem:[#allocation6 + $0x1e0] ss:$20 sps:$4 sm:$0xff]   ;;  %v6660_v17 = vld [vmem:[#allocation6 + $0x238] ss:$20 sps:$4 sm:$0xff]  }
 0x84d   : > { %v2255_v11 = vadd.f32 %v2254_v10, %v2250_v4  ;;  %2678 = vmatprep.subr.bf16.mxu0 %v6632_v1  ;;  %v6647_v1 = vld [vmem:[#allocation6 + $0x1e4] ss:$20 sps:$4 sm:$0xff]  }
 0x84f   : > { %2256 = vadd.xlane.f32.xlu1 %v2255_v11  ;;  %2469 = vmatpush1.bf16.msra.mxu1 %v6585_v24 }
 0x850   : > { %2470 = vmatprep.subr.bf16.mxu1 %v6590_v25  ;;  %2679 = vmatpush1.bf16.msra.mxu0 %v6630_v6  ;;  %v6648_v6 = vld [vmem:[#allocation6 + $0x1e8] ss:$20 sps:$4 sm:$0xff]  }
 0x851   : > { %2680 = vmatprep.subr.bf16.mxu0 %v6635_v7  ;;  %v6650_v7 = vld [vmem:[#allocation6 + $0x1ec] ss:$20 sps:$4 sm:$0xff]  }
 0x853   : > { %2471 = vmatpush1.bf16.msra.mxu1 %v6588_v27 }
 0x854   : > { %2472 = vmatprep.subr.bf16.mxu1 %v6593_v37  ;;  %2681 = vmatpush1.bf16.msra.mxu0 %v6633_v45  ;;  %v6653_v45 = vld [vmem:[#allocation6 + $0x20c] ss:$20 sps:$4 sm:$0xff]  }
 0x855   : > { %2682 = vmatprep.subr.bf16.mxu0 %v6638_v8  ;;  %v6656_v8 = vld [vmem:[#allocation6 + $0x214] ss:$20 sps:$4 sm:$0xff]  }
 0x857   : > { %2473 = vmatpush1.bf16.msra.mxu1 %v6591_v38 }
 0x858   : > { %2474 = vmatprep.subr.bf16.mxu1 %v6596_v39 }
 0x85b   : > { %2475 = vmatpush1.bf16.msra.mxu1 %v6594_v40 }
 0x85c   : > { %2476 = vmatprep.subr.bf16.mxu1 %v6599_v41 }
 0x85f   : > { %2477 = vmatpush1.bf16.msra.mxu1 %v6597_v42 }
 0x860   : > { %2478 = vmatprep.subr.bf16.mxu1 %v6602_v47 }
 0x863   : > { %2479 = vmatpush1.bf16.msra.mxu1 %v6600_v48 }
 0x864   : > { %2480 = vmatprep.subr.bf16.mxu1 %v6605_v50 }
 0x867   : > { %2481 = vmatpush1.bf16.msra.mxu1 %v6603_v49 }
 0x868   : > { %2482 = vmatprep.subr.bf16.mxu1 %v6608_v51 }
 0x86b   : > { %2483 = vmatpush1.bf16.msra.mxu1 %v6606_v52 }
 0x86c   : > { %3171 = vmatprep.subr.bf16.mxu1 %v6647_v1 }
 0x8dc   : > { %v2257_v29 = vpop.xlane.xlu1 %2256 }
 0x8dd   : > { %v2259_v30 = vmul.f32 0.0052083335, %v2257_v29 }
 0x8df   : > { %v8221_v31 = vsub.f32 %v2250_v4, %v2259_v30  ;;  %v8223_v32 = vsub.f32 %v2251_v9, %v2259_v30  ;;  %v6636_v9 = vld [vmem:[#allocation11 + $0x90] ss:$8 sps:$4 sm:$0xff]  }
 0x8e0   : > { %2683 = vmatpush1.bf16.msra.mxu0 %v6636_v9  ;;  %v6651_v9 = vld [vmem:[#allocation6 + $0x208] ss:$20 sps:$4 sm:$0xff]  }
 0x8e1   : > { %v2262_v33 = vmul.f32 %v8221_v31, %v8221_v31  ;;  %v2263_v34 = vmul.f32 %v8223_v32, %v8223_v32 }
 0x8e3   : > { %v2264_v35 = vsel %vm1124_vm0, %v2263_v34, 0.0  ;;  %v6641_v34 = vld [vmem:[#allocation11 + $0xa4] ss:$8 sps:$4 sm:$0xff]  }
 0x8e4   : > { %v2265_v36 = vadd.f32 %v2264_v35, %v2262_v33  ;;  %v6639_v35 = vld [vmem:[#allocation11 + $0xa0] ss:$8 sps:$4 sm:$0xff]   ;;  %2684 = vmatprep.subr.bf16.mxu0 %v6641_v34  ;;  %v6681_v34 = vld [vmem:[#allocation6 + $0x2d0] ss:$20 sps:$4 sm:$0xff]  }
 0x8e5   : > { %2685 = vmatpush1.bf16.msra.mxu0 %v6639_v35 }
 0x8e6   : > { %2266 = vadd.xlane.f32.xlu0 %v2265_v36  ;;  %v6642_v36 = vld [vmem:[#allocation11 + $0xb0] ss:$8 sps:$4 sm:$0xff]  }
 0x973   : > { %v2267_v4 = vpop.xlane.xlu0 %2266 }
 0x974   : > { %v2268_v10 = vmul.f32 0.0052083335, %v2267_v4  ;;  %v6654_v4 = vld [vmem:[#allocation6 + $0x210] ss:$20 sps:$4 sm:$0xff]  }
 0x976   : > { %v2269_v11 = vadd.f32 1e-05, %v2268_v10  ;;  %v6659_v10 = vld [vmem:[#allocation6 + $0x234] ss:$20 sps:$4 sm:$0xff]  }
 0x978   : > { %6981 = vrsqrt.f32 %v2269_v11  ;;  %v6662_v11 = vld [vmem:[#allocation6 + $0x23c] ss:$20 sps:$4 sm:$0xff]  }
 0x982   : > { %v6982_v21 = vpop.eup %6981 }
 0x983   : > { %v2271_v22 = vmul.f32 %v6982_v21, %v8221_v31  ;;  %v2272_v23 = vmul.f32 %v6982_v21, %v8223_v32  ;;  %v6644_v31 = vld [vmem:[#allocation11 + $0xb4] ss:$8 sps:$4 sm:$0xff]   ;;  %v6663_v21 = vld [vmem:[#allocation6 + $0x258] ss:$20 sps:$4 sm:$0xff]  }
 0x984   : > { %2686 = vmatprep.subr.bf16.mxu0 %v6644_v31  ;;  %v2325_v32 = vld [vmem:[%s8719_s12] sm:$0x3] }
 0x985   : > { %v2285_v24 = vmul.f32 %v2281_v19, %v2272_v23  ;;  %v2284_v25 = vmul.f32 %v2277_v20, %v2271_v22  ;;  %2687 = vmatpush1.bf16.msra.mxu0 %v6642_v36  ;;  %v2330_v37 = vrot.slane %v2325_v32, %v8111_v16  ;;  %v2334_v38 = vrot.slane %v2325_v32, %v8114_v18  ;;  %v6665_v19 = vld [vmem:[#allocation6 + $0x25c] ss:$20 sps:$4 sm:$0xff]   ;;  %v6668_v20 = vld [vmem:[#allocation6 + $0x264] ss:$20 sps:$4 sm:$0xff]   ;;  %v6666_v22 = vld [vmem:[#allocation6 + $0x260] ss:$20 sps:$4 sm:$0xff]  }
 0x986   : > { %3212 = vmatprep.subr.bf16.mxu0 %v6650_v7  ;;  %v6671_v23 = vld [vmem:[#allocation6 + $0x284] ss:$20 sps:$4 sm:$0xff]  }
 0x987   : > { %v2298_v27 = vadd.f32 %v2294_v28, %v2285_v24  ;;  %v2297_v29 = vadd.f32 %v2290_v26, %v2284_v25  ;;  %v6674_v28 = vld [vmem:[#allocation6 + $0x28c] ss:$20 sps:$4 sm:$0xff]   ;;  %v6672_v24 = vld [vmem:[#allocation6 + $0x288] ss:$20 sps:$4 sm:$0xff]  }
 0x988   : > { %v6669_v26 = vld [vmem:[#allocation6 + $0x280] ss:$20 sps:$4 sm:$0xff]  }
 0x989   : > { %v2300_v30 = vpack.c.bf16 %v2298_v27, %v2298_v27  ;;  %v2299_v33 = vpack.c.bf16 %v2297_v29, %v2297_v29  ;;  %v6677_v25 = vld [vmem:[#allocation6 + $0x2ac] ss:$20 sps:$4 sm:$0xff]  }
 0x98b   : > { %5851 = vmatprep.mubr.msk.bf16.mxu1 %vm1124_vm0, %v2300_v30  ;;  %v6678_v30 = vld [vmem:[#allocation6 + $0x2b0] ss:$20 sps:$4 sm:$0xff]  }
 0x98c   : > { %2493 = vmatmul.mubr.bf16.vlgmr.msra.gmra.mrb[20].mxu1 %v2299_v33  ;;  %v6683_v33 = vld [vmem:[#allocation6 + $0x2d4] ss:$20 sps:$4 sm:$0xff]  }
 0x98d   : > { %3172 = vmatpush1.bf16.msra.mxu1 %v6645_v5  ;;  %v6714_v5 = vld [vmem:[#allocation6 + $0x3a0] ss:$20 sps:$4 sm:$0xff]  }
 0x98e   : > { %3173 = vmatprep.subr.bf16.mxu1 %v6653_v45  ;;  %v2707_v45 = vld [vmem:[#allocation14] sm:$0x3] }
 0x991   : > { %3174 = vmatpush1.bf16.msra.mxu1 %v6651_v9  ;;  %v2735_v9 = vrot.slane %v2707_v45, %v8114_v18 }
 0x992   : > { %3175 = vmatprep.subr.bf16.mxu1 %v6659_v10 }
 0x995   : > { %3176 = vmatpush1.bf16.msra.mxu1 %v6657_v12 }
 0x996   : > { %3177 = vmatprep.subr.bf16.mxu1 %v6665_v19 }
 0x999   : > { %3178 = vmatpush1.bf16.msra.mxu1 %v6663_v21 }
 0x99a   : > { %3179 = vmatprep.subr.bf16.mxu1 %v6671_v23 }
 0x99d   : > { %3180 = vmatpush1.bf16.msra.mxu1 %v6669_v26 }
 0x99e   : > { %3181 = vmatprep.subr.bf16.mxu1 %v6677_v25  ;;  %v6718_v25 = vld [vmem:[#allocation6 + $0x218] ss:$20 sps:$4 sm:$0xff]  }
 0xa5f   : > { %v2494_v39 = vpop.f32.mrb[20].mxu1 }
 0xa60   : > { %v2495_v40 = vadd.f32 %v2494_v39, %v2330_v37  ;;  %v2496_v41 = vpop.f32.mrb[21].mxu1 }
 0xa61   : > { %v2497_v42 = vadd.f32 %v2496_v41, %v2334_v38  ;;  %v2498_v47 = vpop.f32.mrb[22].mxu1  ;;  %v6686_v41 = vld [vmem:[#allocation6 + $0x2dc] ss:$20 sps:$4 sm:$0xff]  }
 0xa62   : > { %v2501_v48 = vmax.f32 %v2495_v40, 0.0  ;;  %v2499_v49 = vpop.f32.mrb[23].mxu1  ;;  %v6689_v47 = vld [vmem:[#allocation6 + $0x2fc] ss:$20 sps:$4 sm:$0xff]  }
 0xa63   : > { %v2502_v50 = vmax.f32 %v2497_v42, 0.0  ;;  %v6684_v42 = vld [vmem:[#allocation6 + $0x2d8] ss:$20 sps:$4 sm:$0xff]  }
 0xa64   : > { %v2503_v52 = vpack.c.bf16 %v2501_v48, %v2501_v48  ;;  %v6687_v48 = vld [vmem:[#allocation6 + $0x2f8] ss:$20 sps:$4 sm:$0xff]  }
 0xa65   : > { %v2504_v51 = vpack.c.bf16 %v2502_v50, %v2502_v50  ;;  %v6692_v49 = vld [vmem:[#allocation6 + $0x304] ss:$20 sps:$4 sm:$0xff]   ;;  %v6690_v50 = vld [vmem:[#allocation6 + $0x300] ss:$20 sps:$4 sm:$0xff]  }
 0xa67   : > { %5876 = vmatprep.mubr.msk.bf16.mxu0 %vm1124_vm0, %v2504_v51  ;;  %v6695_v51 = vld [vmem:[#allocation6 + $0x324] ss:$20 sps:$4 sm:$0xff]  }
 0xa68   : > { %2697 = vmatmul.mubr.bf16.vlgmr.msra.gmra.mrb[24].mxu0 %v2503_v52  ;;  %v6693_v52 = vld [vmem:[#allocation6 + $0x320] ss:$20 sps:$4 sm:$0xff]  }
 0xa69   : > { %3213 = vmatpush1.bf16.msra.mxu0 %v6648_v6 }
 0xa6a   : > { %3214 = vmatprep.subr.bf16.mxu0 %v6656_v8  ;;  %v2708_v8 = vld [vmem:[#allocation15] sm:$0x3] }
 0xa6b   : > { %v2744_v19 = vrot.slane %v2708_v8, %v8111_v16 }
 0xa6d   : > { %3215 = vmatpush1.bf16.msra.mxu0 %v6654_v4  ;;  %v2731_v4 = vrot.slane %v2707_v45, %v8111_v16 }
 0xa6e   : > { %3216 = vmatprep.subr.bf16.mxu0 %v6662_v11 }
 0xa71   : > { %3217 = vmatpush1.bf16.msra.mxu0 %v6660_v17  ;;  %v2748_v17 = vrot.slane %v2708_v8, %v8114_v18 }
 0xa72   : > { %3218 = vmatprep.subr.bf16.mxu0 %v6668_v20 }
 0xa75   : > { %3219 = vmatpush1.bf16.msra.mxu0 %v6666_v22 }
 0xa76   : > { %3220 = vmatprep.subr.bf16.mxu0 %v6674_v28 }
 0xa79   : > { %3221 = vmatpush1.bf16.msra.mxu0 %v6672_v24  ;;  %v6717_v24 = vld [vmem:[#allocation6 + $0x1f0] ss:$20 sps:$4 sm:$0xff]  }
 0xb3b   : > { %v2698_v56 = vpop.f32.mrb[24].mxu0 }
 0xb3c   : > { %v2699_v57 = vadd.f32 %v2698_v56, %v2534_v54  ;;  %v2700_v58 = vpop.f32.mrb[25].mxu0  ;;  %v6696_v54 = vld [vmem:[#allocation6 + $0x328] ss:$20 sps:$4 sm:$0xff]  }
 0xb3d   : > { %v2701_v60 = vadd.f32 %v2700_v58, %v2538_v55  ;;  %v2702_v61 = vpop.f32.mrb[26].mxu0  ;;  %v6701_v55 = vld [vmem:[#allocation6 + $0x34c] ss:$20 sps:$4 sm:$0xff]   ;;  %v6699_v56 = vld [vmem:[#allocation6 + $0x348] ss:$20 sps:$4 sm:$0xff]  }
 0xb3e   : > { %v2703_v62 = vpop.f32.mrb[27].mxu0  ;;  %v2705_v0 = vadd.f32 %v2699_v57, %v2297_v29  ;;  %v6675_v29 = vld [vmem:[#allocation6 + $0x2a8] ss:$20 sps:$4 sm:$0xff]   ;;  %v6702_v58 = vld [vmem:[#allocation6 + $0x350] ss:$20 sps:$4 sm:$0xff]  }
 0xb3f   : > { %v2706_v63 = vadd.f32 %v2701_v60, %v2298_v27  ;;  %v6680_v27 = vld [vmem:[#allocation6 + $0x2b4] ss:$20 sps:$4 sm:$0xff]   ;;  %3182 = vmatpush1.bf16.msra.mxu1 %v6675_v29  ;;  %v6705_v61 = vld [vmem:[#allocation6 + $0x370] ss:$20 sps:$4 sm:$0xff]   ;;  %v6708_v62 = vld [vmem:[#allocation6 + $0x378] ss:$20 sps:$4 sm:$0xff]  }
 0xb40   : > { %3222 = vmatprep.subr.bf16.mxu0 %v6680_v27  ;;  %3183 = vmatprep.subr.bf16.mxu1 %v6683_v33  ;;  %v6704_v57 = vld [vmem:[#allocation6 + $0x354] ss:$20 sps:$4 sm:$0xff]   ;;  %v6722_v33 = vld [vmem:[#allocation6 + $0x2b8] ss:$20 sps:$4 sm:$0xff]  }
 0xb41   : > { %v2709_v2 = vsel %vm1124_vm0, %v2706_v63, 0.0  ;;  %3223 = vmatpush1.bf16.msra.mxu0 %v6678_v30  ;;  %v6707_v60 = vld [vmem:[#allocation6 + $0x374] ss:$20 sps:$4 sm:$0xff]   ;;  %v6721_v30 = vld [vmem:[#allocation6 + $0x290] ss:$20 sps:$4 sm:$0xff]  }
 0xb42   : > { %v2710_v3 = vadd.f32 %v2709_v2, %v2705_v0  ;;  %3224 = vmatprep.subr.bf16.mxu0 %v6686_v41  ;;  %v6711_v2 = vld [vmem:[#allocation6 + $0x398] ss:$20 sps:$4 sm:$0xff]   ;;  %v6719_v27 = vld [vmem:[#allocation6 + $0x240] ss:$20 sps:$4 sm:$0xff]   ;;  %v6720_v29 = vld [vmem:[#allocation6 + $0x268] ss:$20 sps:$4 sm:$0xff]  }
 0xb43   : > { %3184 = vmatpush1.bf16.msra.mxu1 %v6681_v34  ;;  %v6723_v34 = vld [vmem:[#allocation6 + $0x2e0] ss:$20 sps:$4 sm:$0xff]  }
 0xb44   : > { %2711 = vadd.xlane.f32.xlu1 %v2710_v3  ;;  %3185 = vmatprep.subr.bf16.mxu1 %v6689_v47  ;;  %v6716_v3 = vld [vmem:[#allocation6 + $0x3a4] ss:$20 sps:$4 sm:$0xff]  }
 0xb45   : > { %3225 = vmatpush1.bf16.msra.mxu0 %v6684_v42 }
 0xb46   : > { %3226 = vmatprep.subr.bf16.mxu0 %v6692_v49 }
 0xb47   : > { %3186 = vmatpush1.bf16.msra.mxu1 %v6687_v48 }
 0xb48   : > { %3187 = vmatprep.subr.bf16.mxu1 %v6695_v51 }
 0xb49   : > { %3227 = vmatpush1.bf16.msra.mxu0 %v6690_v50 }
 0xb4a   : > { %3228 = vmatprep.subr.bf16.mxu0 %v6698_v53 }
 0xb4b   : > { %3188 = vmatpush1.bf16.msra.mxu1 %v6693_v52 }
 0xb4c   : > { %3189 = vmatprep.subr.bf16.mxu1 %v6701_v55 }
 0xb4d   : > { %3229 = vmatpush1.bf16.msra.mxu0 %v6696_v54 }
 0xb4e   : > { %3230 = vmatprep.subr.bf16.mxu0 %v6704_v57 }
 0xb4f   : > { %3190 = vmatpush1.bf16.msra.mxu1 %v6699_v56 }
 0xb50   : > { %3191 = vmatprep.subr.bf16.mxu1 %v6707_v60 }
 0xb51   : > { %3231 = vmatpush1.bf16.msra.mxu0 %v6702_v58 }
 0xb53   : > { %3192 = vmatpush1.bf16.msra.mxu1 %v6705_v61 }
 0xbd1   : > { %v2712_v35 = vpop.xlane.xlu1 %2711 }
 0xbd2   : > { %v2713_v31 = vmul.f32 0.0052083335, %v2712_v35  ;;  %v6724_v35 = vld [vmem:[#allocation6 + $0x308] ss:$20 sps:$4 sm:$0xff]  }
 0xbd4   : > { %v2714_v36 = vsub.f32 %v2705_v0, %v2713_v31  ;;  %v2715_v32 = vsub.f32 %v2706_v63, %v2713_v31  ;;  %v6710_v63 = vld [vmem:[#allocation6 + $0x37c] ss:$20 sps:$4 sm:$0xff]  }
 0xbd5   : > { %v6713_v0 = vld [vmem:[#allocation6 + $0x39c] ss:$20 sps:$4 sm:$0xff]   ;;  %3232 = vmatprep.subr.bf16.mxu0 %v6710_v63 }
 0xbd6   : > { %v2716_v37 = vmul.f32 %v2714_v36, %v2714_v36  ;;  %v2717_v38 = vmul.f32 %v2715_v32, %v2715_v32  ;;  %3233 = vmatpush1.bf16.msra.mxu0 %v6708_v62  ;;  %3193 = vmatprep.subr.bf16.mxu1 %v6713_v0  ;;  %v6725_v31 = vld [vmem:[#allocation6 + $0x330] ss:$20 sps:$4 sm:$0xff]  }
 0xbd7   : > { %3234 = vmatprep.subr.bf16.mxu0 %v6716_v3  ;;  %3194 = vmatpush1.bf16.msra.mxu1 %v6711_v2 }
 0xbd8   : > { %v2718_v39 = vsel %vm1124_vm0, %v2717_v38, 0.0  ;;  %3253 = vmatprep.subr.bf16.mxu1 %v7530_v13  ;;  %v8289_v38 = vld [vmem:[%s8715_s27 + $0x5] sm:$0x1f] }
 0xbd9   : > { %v2719_v40 = vadd.f32 %v2718_v39, %v2716_v37  ;;  %v6728_v37 = vld [vmem:[#allocation6 + $0x3a8] ss:$20 sps:$4 sm:$0xff]   ;;  %v2834_v39 = vrot.slane %v8289_v38, %v8111_v16  ;;  %v2846_v41 = vrot.slane %v8289_v38, %v8151_v46  ;;  %v2842_v42 = vrot.slane %v8289_v38, %v8143_v44 }
 0xbda   : > { %3235 = vmatpush1.bf16.msra.mxu0 %v6714_v5 }
 0xbdb   : > { %2720 = vadd.xlane.f32.xlu1 %v2719_v40  ;;  %6194 = vmatprep.subr.bf16.mxu0 %v7531_v43  ;;  %v2838_v40 = vrot.slane %v8289_v38, %v8114_v18 }
 0xc68   : > { %v2721_v1 = vpop.xlane.xlu1 %2720 }
 0xc69   : > { %v2722_v6 = vmul.f32 0.0052083335, %v2721_v1 }
 0xc6b   : > { %v2723_v7 = vadd.f32 1e-05, %v2722_v6 }
 0xc6d   : > { %6983 = vrsqrt.f32 %v2723_v7 }
 0xc77   : > { %v6984_v10 = vpop.eup %6983 }
 0xc78   : > { %v2725_v11 = vmul.f32 %v6984_v10, %v2714_v36  ;;  %v2726_v12 = vmul.f32 %v6984_v10, %v2715_v32  ;;  %v6726_v36 = vld [vmem:[#allocation6 + $0x358] ss:$20 sps:$4 sm:$0xff]   ;;  %v6727_v32 = vld [vmem:[#allocation6 + $0x380] ss:$20 sps:$4 sm:$0xff]  }
 0xc7a   : > { %v2739_v20 = vmul.f32 %v2735_v9, %v2726_v12  ;;  %v2738_v21 = vmul.f32 %v2731_v4, %v2725_v11 }
 0xc7c   : > { %v8259_v22 = vadd.f32 %v2748_v17, %v2739_v20  ;;  %v8261_v23 = vadd.f32 %v2744_v19, %v2738_v21 }
 0xc7e   : > { %v2754_v28 = vpack.c.bf16 %v8259_v22, %v8259_v22  ;;  %v2753_v26 = vpack.c.bf16 %v8261_v23, %v8261_v23 }
 0xc80   : > { %5938 = vmatprep.mubr.msk.bf16.mxu1 %vm1124_vm0, %v2754_v28  ;;  %5939 = vmatprep.mubr.msk.bf16.mxu0 %vm1124_vm0, %v2754_v28 }
 0xc81   : > { %3204 = vmatmul.mubr.bf16.vlgmr.msra.gmra.mrb[24].mxu1 %v2753_v26  ;;  %3245 = vmatmul.mubr.bf16.vlgmr.msra.gmra.mrb[28].mxu0 %v2753_v26 }
 0xc82   : > { %3254 = vmatpush1.bf16.msra.mxu1 %v6717_v24  ;;  %5940 = vmatprep.mubr.msk.bf16.mxu1 %vm1124_vm0, %v2754_v28 }
 0xc83   : > { %3255 = vmatprep.subr.bf16.mxu1 %v7530_v13  ;;  %6196 = vmatprep.mubr.msk.bf16.mxu0 %vm7532_vm1, %v7531_v43 }
 0xc86   : > { %3256 = vmatpush1.bf16.msra.mxu1 %v6718_v25 }
 0xc87   : > { %3257 = vmatprep.subr.bf16.mxu1 %v7530_v13 }
 0xc8a   : > { %3258 = vmatpush1.bf16.msra.mxu1 %v6719_v27 }
 0xc8b   : > { %3259 = vmatprep.subr.bf16.mxu1 %v7530_v13 }
 0xc8e   : > { %3260 = vmatpush1.bf16.msra.mxu1 %v6720_v29 }
 0xc8f   : > { %3261 = vmatprep.subr.bf16.mxu1 %v7530_v13 }
 0xc92   : > { %3262 = vmatpush1.bf16.msra.mxu1 %v6721_v30 }
 0xc93   : > { %3263 = vmatprep.subr.bf16.mxu1 %v7530_v13 }
 0xc96   : > { %3264 = vmatpush1.bf16.msra.mxu1 %v6722_v33 }
 0xc97   : > { %3265 = vmatprep.subr.bf16.mxu1 %v7530_v13 }
 0xc9a   : > { %3266 = vmatpush1.bf16.msra.mxu1 %v6723_v34 }
 0xc9b   : > { %3267 = vmatprep.subr.bf16.mxu1 %v7530_v13 }
 0xc9e   : > { %3268 = vmatpush1.bf16.msra.mxu1 %v6724_v35 }
 0xc9f   : > { %3269 = vmatprep.subr.bf16.mxu1 %v7530_v13 }
 0xca2   : > { %3270 = vmatpush1.bf16.msra.mxu1 %v6725_v31 }
 0xca3   : > { %3271 = vmatprep.subr.bf16.mxu1 %v7530_v13 }
 0xca6   : > { %3272 = vmatpush1.bf16.msra.mxu1 %v6726_v36 }
 0xca7   : > { %3273 = vmatprep.subr.bf16.mxu1 %v7530_v13 }
 0xcaa   : > { %3274 = vmatpush1.bf16.msra.mxu1 %v6727_v32 }
 0xcab   : > { %3275 = vmatprep.subr.bf16.mxu1 %v7530_v13 }
 0xcae   : > { %3276 = vmatpush1.bf16.msra.mxu1 %v6728_v37 }
 0xcaf   : > { %6200 = vmatprep.subr.bf16.mxu1 %v7531_v43 }
 0xcb1   : > { %3286 = vmatmul.mubr.bf16.vlgmr.msra.gmra.mrb[28].mxu1 %v2753_v26 }
 0xcb2   : > { %6202 = vmatprep.mubr.msk.bf16.mxu1 %vm7532_vm1, %v7531_v43 }
 0xd54   : > { %v3205_v47 = vpop.f32.mrb[24].mxu1  ;;  %v3246_v48 = vpop.f32.mrb[28].mxu0 }
 0xd55   : > { %v3206_v49 = vadd.f32 %v3205_v47, %v2834_v39  ;;  %v3207_v50 = vpop.f32.mrb[25].mxu1  ;;  %v3248_v51 = vpop.f32.mrb[29].mxu0  ;;  %v3247_v57 = vadd.f32 %v3246_v48, %v2842_v42 }
 0xd56   : > { %v3208_v52 = vadd.f32 %v3207_v50, %v2838_v40  ;;  %v3249_v53 = vadd.f32 %v3248_v51, %v2846_v41  ;;  %v3209_v54 = vpop.f32.mrb[26].mxu1  ;;  %v3250_v55 = vpop.f32.mrb[30].mxu0 }
 0xd57   : > { %v3293_v56 = vpack.c.bf16 %v3206_v49, %v3206_v49  ;;  %v3210_v58 = vpop.f32.mrb[27].mxu1  ;;  %v3251_v60 = vpop.f32.mrb[31].mxu0  ;;  %v3404_v0 = vpack.c.bf16 %v3247_v57, %v3247_v57 }
 0xd58   : > { %v3294_v61 = vpack.c.bf16 %v3208_v52, %v3208_v52  ;;  %v8299_v62 = vpack.c.bf16 %v3249_v53, %v3249_v53  ;;  %v2850_v58 = vrot.slane %v8289_v38, %v1265_v59 }
 0xd59   : > { %3406 = vrot.lane.b32.xlu1 %v3293_v56, %s7533_s5  ;;  %v3412_v8 = vsel %vm1124_vm0, %v3404_v0, 0 }
 0xd5a   : > { %v3362_v63 = vsel %vm1778_vm2, %v8299_v62, 0  ;;  %3296 = vrot.lane.b32.xlu0 %v3294_v61, %s7533_s5 }
 0xd5b   : > { %6201 = vmatpush3.bf16.msra.mxu1 %v3362_v63 }
 0xd5c   : > { %6212 = vmatprep.subr.bf16.mxu1 %v7531_v43 }
 0xd5d   : > { %3517 = vrot.lane.b32.xlu1 %v3404_v0, %s7533_s5 }
 0xd84   : > { %v8307_v2 = vpop.f32.mrb[28].mxu1 }
 0xd85   : > { %v3289_v3 = vpop.f32.mrb[29].mxu1  ;;  %v3288_v0 = vadd.f32 %v8307_v2, %v2850_v58  ;;  %v5947_v58 = vld [vmem:[%s8717_s14 + $0x2] sm:$0x3] }
 0xd86   : > { %v3290_v5 = vpop.f32.mrb[30].mxu1 }
 0xd87   : > { %v3291_v1 = vpop.f32.mrb[31].mxu1 }
 0xdcb   : > { %v3407_v45 = vpop.permute.xlu1 %3406 }
 0xdcc   : > { %v3297_v6 = vpop.permute.xlu0 %3296 }
 0xdcd   : > { %v3302_v7 = vsel %vm1124_vm0, %v3297_v6, 0 }
 0xdce   : > { %6195 = vmatpush3.bf16.xpose.msra.mxu0 %v3302_v7 }
 0xdcf   : > { %6206 = vmatprep.subr.bf16.mxu0 %v7531_v43  ;;  %v3518_v9 = vpop.permute.xlu1 %3517 }
 0xdd0   : > { %v3523_v4 = vsel %vm1124_vm0, %v3518_v9, 0  ;;  %v6734_v9 = vld [vmem:[#allocation8 + $0xd4] ss:$8 sps:$4 sm:$0xff]  }
 0xdd5   : > { %6197 = vmatmul.mubr.msk.bf16.vlgmr.msra.gmra.mrb[32].mxu0 %vm1124_vm0, %v3293_v56 }
 0xdd6   : > { %6207 = vmatpush3.bf16.xpose.msra.mxu0 %v3412_v8  ;;  %6208 = vmatprep.mubr.msk.bf16.mxu0 %vm7532_vm1, %v7531_v43  ;;  %v6731_v8 = vld [vmem:[#allocation8 + $0xc4] ss:$8 sps:$4 sm:$0xff]  }
 0xdd7   : > { %6218 = vmatprep.subr.bf16.mxu0 %v7531_v43 }
 0xddd   : > { %6209 = vmatmul.mubr.msk.bf16.vlgmr.msra.gmra.mrb[36].mxu0 %vm1124_vm0, %v3407_v45  ;;  %v6729_v45 = vld [vmem:[#allocation8 + $0xc0] ss:$8 sps:$4 sm:$0xff]  }
 0xdde   : > { %6219 = vmatpush3.bf16.xpose.msra.mxu0 %v3523_v4  ;;  %6220 = vmatprep.mubr.msk.bf16.mxu0 %vm7532_vm1, %v7531_v43  ;;  %v6732_v4 = vld [vmem:[#allocation8 + $0xd0] ss:$8 sps:$4 sm:$0xff]  }
 0xddf   : > { %3793 = vmatprep.subr.bf16.mxu0 %v6731_v8  ;;  %v6768_v8 = vld [vmem:[#allocation9 + $0xd0] ss:$8 sps:$4 sm:$0xff]  }
 0xde5   : > { %6221 = vmatmul.mubr.msk.bf16.vlgmr.msra.gmra.mrb[40].mxu0 %vm1124_vm0, %v3294_v61 }
 0xde6   : > { %3794 = vmatpush1.bf16.msra.mxu0 %v6729_v45  ;;  %v6770_v45 = vld [vmem:[#allocation9 + $0xd4] ss:$8 sps:$4 sm:$0xff]  }
 0xde7   : > { %3795 = vmatprep.subr.bf16.mxu0 %v6734_v9  ;;  %v6773_v9 = vld [vmem:[#allocation9 + $0xe4] ss:$8 sps:$4 sm:$0xff]  }
 0xdea   : > { %3796 = vmatpush1.bf16.msra.mxu0 %v6732_v4  ;;  %v6771_v4 = vld [vmem:[#allocation9 + $0xe0] ss:$8 sps:$4 sm:$0xff]  }
 0xea8   : > { %v3338_v10 = vpop.f32.mrb[32].mxu0 }
 0xea9   : > { %v3344_v11 = vmul.f32 0.125, %v3338_v10  ;;  %v6198_v12 = vpop.f32.mrb[33].mxu0  ;;  %v6737_v10 = vld [vmem:[#allocation8 + $0xe4] ss:$8 sps:$4 sm:$0xff]  }
 0xeaa   : > { %v3341_v17 = vpop.f32.mrb[34].mxu0  ;;  %3797 = vmatprep.subr.bf16.mxu0 %v6737_v10  ;;  %v6740_v12 = vld [vmem:[#allocation8 + $0xf4] ss:$8 sps:$4 sm:$0xff]  }
 0xeab   : > { %v6199_v19 = vpop.f32.mrb[35].mxu0  ;;  %v3345_v20 = vsel %vm1761_vm3, %v3344_v11, -inf  ;;  %v6738_v17 = vld [vmem:[#allocation8 + $0xf0] ss:$8 sps:$4 sm:$0xff]   ;;  %v6776_v10 = vld [vmem:[#allocation9 + $0xf4] ss:$8 sps:$4 sm:$0xff]  }
 0xeac   : > { %3346 = vmax.xlane.f32.xlu0 %v3345_v20  ;;  %v6743_v19 = vld [vmem:[#allocation8 + $0x104] ss:$8 sps:$4 sm:$0xff]   ;;  %v6741_v20 = vld [vmem:[#allocation8 + $0x100] ss:$8 sps:$4 sm:$0xff]  }
 0xeb0   : > { %v3448_v21 = vpop.f32.mrb[36].mxu0 }
 0xeb1   : > { %v3454_v28 = vmul.f32 0.125, %v3448_v21  ;;  %v6210_v26 = vpop.f32.mrb[37].mxu0  ;;  %v6746_v21 = vld [vmem:[#allocation8 + $0x114] ss:$8 sps:$4 sm:$0xff]  }
 0xeb2   : > { %v3451_v24 = vpop.f32.mrb[38].mxu0  ;;  %v6749_v26 = vld [vmem:[#allocation8 + $0x124] ss:$8 sps:$4 sm:$0xff]  }
 0xeb3   : > { %v6211_v25 = vpop.f32.mrb[39].mxu0  ;;  %v3455_v27 = vsel %vm1761_vm3, %v3454_v28, -inf  ;;  %v6747_v24 = vld [vmem:[#allocation8 + $0x120] ss:$8 sps:$4 sm:$0xff]  }
 0xeb4   : > { %3456 = vmax.xlane.f32.xlu1 %v3455_v27  ;;  %v6752_v25 = vld [vmem:[#allocation8 + $0x134] ss:$8 sps:$4 sm:$0xff]   ;;  %v6750_v27 = vld [vmem:[#allocation8 + $0x130] ss:$8 sps:$4 sm:$0xff]  }
 0xeb8   : > { %v3559_v29 = vpop.f32.mrb[40].mxu0 }
 0xeb9   : > { %v3565_v30 = vmul.f32 0.125, %v3559_v29  ;;  %v6222_v33 = vpop.f32.mrb[41].mxu0  ;;  %v6755_v29 = vld [vmem:[#allocation8 + $0x144] ss:$8 sps:$4 sm:$0xff]  }
 0xeba   : > { %v3562_v34 = vpop.f32.mrb[42].mxu0  ;;  %v6758_v33 = vld [vmem:[#allocation8 + $0x154] ss:$8 sps:$4 sm:$0xff]  }
 0xebb   : > { %v6223_v35 = vpop.f32.mrb[43].mxu0  ;;  %v3566_v31 = vsel %vm1761_vm3, %v3565_v30, -inf  ;;  %v6756_v34 = vld [vmem:[#allocation8 + $0x150] ss:$8 sps:$4 sm:$0xff]  }
 0xebc   : > { %3567 = vmax.xlane.f32.xlu0 %v3566_v31  ;;  %v6761_v35 = vld [vmem:[#allocation8 + $0x164] ss:$8 sps:$4 sm:$0xff]   ;;  %v6759_v31 = vld [vmem:[#allocation8 + $0x160] ss:$8 sps:$4 sm:$0xff]  }
 0xf39   : > { %v3347_v36 = vpop.xlane.xlu0 %3346 }
 0xf3a   : > { %v3348_v32 = vsub.f32 %v3344_v11, %v3347_v36  ;;  %v6735_v11 = vld [vmem:[#allocation8 + $0xe0] ss:$8 sps:$4 sm:$0xff]   ;;  %v6764_v36 = vld [vmem:[#allocation8 + $0x174] ss:$8 sps:$4 sm:$0xff]  }
 0xf3b   : > { %3798 = vmatpush1.bf16.msra.mxu0 %v6735_v11  ;;  %v6777_v11 = vld [vmem:[#allocation9 + $0x100] ss:$8 sps:$4 sm:$0xff]  }
 0xf3c   : > { %v3349_v37 = vmul.f32 1.442695, %v3348_v32  ;;  %3799 = vmatprep.subr.bf16.mxu0 %v6740_v12  ;;  %v6762_v32 = vld [vmem:[#allocation8 + $0x170] ss:$8 sps:$4 sm:$0xff]   ;;  %v6782_v12 = vld [vmem:[#allocation9 + $0x114] ss:$8 sps:$4 sm:$0xff]  }
 0xf3e   : > { %6985 = vpow2.f32 %v3349_v37 }
 0xf3f   : > { %3800 = vmatpush1.bf16.msra.mxu0 %v6738_v17  ;;  %v6780_v17 = vld [vmem:[#allocation9 + $0x110] ss:$8 sps:$4 sm:$0xff]  }
 0xf40   : > { %3801 = vmatprep.subr.bf16.mxu0 %v6743_v19 }
 0xf41   : > { %v3457_v39 = vpop.xlane.xlu1 %3456 }
 0xf42   : > { %v3458_v40 = vsub.f32 %v3454_v28, %v3457_v39  ;;  %v6744_v28 = vld [vmem:[#allocation8 + $0x110] ss:$8 sps:$4 sm:$0xff]  }
 0xf43   : > { %3802 = vmatpush1.bf16.msra.mxu0 %v6741_v20 }
 0xf44   : > { %v3459_v41 = vmul.f32 1.442695, %v3458_v40  ;;  %3803 = vmatprep.subr.bf16.mxu0 %v6746_v21 }
 0xf46   : > { %6987 = vpow2.f32 %v3459_v41 }
 0xf47   : > { %3804 = vmatpush1.bf16.msra.mxu0 %v6744_v28 }
 0xf48   : > { %v6986_v42 = vpop.eup %6985  ;;  %3805 = vmatprep.subr.bf16.mxu0 %v6749_v26 }
 0xf49   : > { %v3568_v47 = vpop.xlane.xlu0 %3567  ;;  %v3351_v48 = vsel %vm1761_vm3, %v6986_v42, 0.0 }
 0xf4a   : > { %v3569_v49 = vsub.f32 %v3565_v30, %v3568_v47  ;;  %3352 = vadd.xlane.f32.xlu0 %v3351_v48  ;;  %v6753_v30 = vld [vmem:[#allocation8 + $0x140] ss:$8 sps:$4 sm:$0xff]  }
 0xf4b   : > { %3806 = vmatpush1.bf16.msra.mxu0 %v6747_v24 }
 0xf4c   : > { %v3570_v50 = vmul.f32 1.442695, %v3569_v49  ;;  %3807 = vmatprep.subr.bf16.mxu0 %v6752_v25 }
 0xf4e   : > { %6989 = vpow2.f32 %v3570_v50 }
 0xf4f   : > { %3808 = vmatpush1.bf16.msra.mxu0 %v6750_v27 }
 0xf50   : > { %v6988_v51 = vpop.eup %6987  ;;  %3809 = vmatprep.subr.bf16.mxu0 %v6755_v29  ;;  %v6785_v29 = vld [vmem:[#allocation9 + $0x124] ss:$8 sps:$4 sm:$0xff]  }
 0xf51   : > { %v3461_v52 = vsel %vm1761_vm3, %v6988_v51, 0.0 }
 0xf52   : > { %3462 = vadd.xlane.f32.xlu1 %v3461_v52 }
 0xf53   : > { %3810 = vmatpush1.bf16.msra.mxu0 %v6753_v30  ;;  %v6783_v30 = vld [vmem:[#allocation9 + $0x120] ss:$8 sps:$4 sm:$0xff]  }
 0xf54   : > { %3811 = vmatprep.subr.bf16.mxu0 %v6758_v33  ;;  %v6788_v33 = vld [vmem:[#allocation9 + $0x134] ss:$8 sps:$4 sm:$0xff]  }
 0xf57   : > { %3812 = vmatpush1.bf16.msra.mxu0 %v6756_v34  ;;  %v6786_v34 = vld [vmem:[#allocation9 + $0x130] ss:$8 sps:$4 sm:$0xff]  }
 0xf58   : > { %v6990_v53 = vpop.eup %6989  ;;  %3813 = vmatprep.subr.bf16.mxu0 %v6761_v35  ;;  %v6791_v35 = vld [vmem:[#allocation9 + $0x144] ss:$8 sps:$4 sm:$0xff]  }
 0xf59   : > { %v3572_v54 = vsel %vm1761_vm3, %v6990_v53, 0.0 }
 0xf5a   : > { %3573 = vadd.xlane.f32.xlu1 %v3572_v54 }
 0xf5b   : > { %3814 = vmatpush1.bf16.msra.mxu0 %v6759_v31  ;;  %v6789_v31 = vld [vmem:[#allocation9 + $0x140] ss:$8 sps:$4 sm:$0xff]  }
 0xf5c   : > { %3815 = vmatprep.subr.bf16.mxu0 %v6764_v36  ;;  %v6794_v36 = vld [vmem:[#allocation9 + $0x154] ss:$8 sps:$4 sm:$0xff]  }
 0xf5f   : > { %3816 = vmatpush1.bf16.msra.mxu0 %v6762_v32  ;;  %v6792_v32 = vld [vmem:[#allocation9 + $0x150] ss:$8 sps:$4 sm:$0xff]  }
 0xf60   : > { %3468 = vrot.lane.b32.xlu0 %v8299_v62, %s7533_s5  ;;  %v3578_v62 = vpack.c.bf16 %v3288_v0, %v3288_v0 }
 0xf62   : > { %v3583_v1 = vsel %vm1778_vm2, %v3578_v62, 0 }
 0xfd7   : > { %v3353_v55 = vpop.xlane.xlu0 %3352 }
 0xfd8   : > { %6991 = vrcp.f32 %v3353_v55 }
 0xfdb   : > { %v3469_v61 = vpop.permute.xlu0 %3468 }
 0xfdc   : > { %v3474_v3 = vsel %vm1778_vm2, %v3469_v61, 0  ;;  %v3667_v61 = vrot.slane %v5947_v58, %v8114_v18 }
 0xfdf   : > { %v3463_v56 = vpop.xlane.xlu1 %3462 }
 0xfe0   : > { %6993 = vrcp.f32 %v3463_v56 }
 0xfe2   : > { %v6992_v57 = vpop.eup %6991 }
 0xfe3   : > { %v3355_v60 = vmul.f32 %v6992_v57, %v6986_v42 }
 0xfe5   : > { %v3356_v63 = vpack.c.bf16 %v3355_v60, %v3355_v60  ;;  %v3663_v60 = vrot.slane %v5947_v58, %v8111_v16  ;;  %v6821_v58 = vld [vmem:[#allocation11 + $0x124] ss:$8 sps:$4 sm:$0xff]  }
 0xfe7   : > { %v3574_v5 = vpop.xlane.xlu1 %3573  ;;  %6203 = vmatmul.mubr.msk.bf16.vlgmr.msra.gmra.mrb[32].mxu1 %vm1761_vm3, %v3356_v63 }
 0xfe8   : > { %6995 = vrcp.f32 %v3574_v5  ;;  %6213 = vmatpush3.bf16.msra.mxu1 %v3474_v3  ;;  %6214 = vmatprep.mubr.msk.bf16.mxu1 %vm7532_vm1, %v7531_v43 }
 0xfe9   : > { %6224 = vmatprep.subr.bf16.mxu1 %v7531_v43 }
 0xfea   : > { %v6994_v15 = vpop.eup %6993 }
 0xfeb   : > { %v3465_v59 = vmul.f32 %v6994_v15, %v6988_v51 }
 0xfed   : > { %v3466_v38 = vpack.c.bf16 %v3465_v59, %v3465_v59 }
 0xfef   : > { %6215 = vmatmul.mubr.msk.bf16.vlgmr.msra.gmra.mrb[36].mxu1 %vm1761_vm3, %v3466_v38 }
 0xff0   : > { %6225 = vmatpush3.bf16.msra.mxu1 %v3583_v1  ;;  %6226 = vmatprep.mubr.msk.bf16.mxu1 %vm7532_vm1, %v7531_v43 }
 0xff2   : > { %v6996_v2 = vpop.eup %6995 }
 0xff3   : > { %v3576_v6 = vmul.f32 %v6996_v2, %v6990_v53 }
 0xff5   : > { %v3577_v7 = vpack.c.bf16 %v3576_v6, %v3576_v6  ;;  %v6765_v6 = vld [vmem:[#allocation9 + $0xc0] ss:$8 sps:$4 sm:$0xff]  }
 0xff7   : > { %6227 = vmatmul.mubr.msk.bf16.vlgmr.msra.gmra.mrb[40].mxu1 %vm1761_vm3, %v3577_v7  ;;  %v6767_v7 = vld [vmem:[#allocation9 + $0xc4] ss:$8 sps:$4 sm:$0xff]  }
 0xff8   : > { %4047 = vmatprep.subr.bf16.mxu1 %v6767_v7 }
 0xff9   : > { %4048 = vmatpush1.bf16.msra.mxu1 %v6765_v6 }
 0xffa   : > { %4049 = vmatprep.subr.bf16.mxu1 %v6770_v45 }
 0xffd   : > { %4050 = vmatpush1.bf16.msra.mxu1 %v6768_v8 }
 0xffe   : > { %4051 = vmatprep.subr.bf16.mxu1 %v6773_v9 }
0x1001   : > { %4052 = vmatpush1.bf16.msra.mxu1 %v6771_v4 }
0x1002   : > { %4053 = vmatprep.subr.bf16.mxu1 %v6776_v10 }
0x10ba   : > { %v3398_v37 = vpop.f32.mrb[32].mxu1 }
0x10bb   : > { %v6204_v39 = vpop.f32.mrb[33].mxu1 }
0x10bc   : > { %v3401_v40 = vpop.f32.mrb[34].mxu1  ;;  %v6797_v39 = vld [vmem:[#allocation9 + $0x164] ss:$8 sps:$4 sm:$0xff]  }
0x10bd   : > { %v6205_v41 = vpop.f32.mrb[35].mxu1  ;;  %v6800_v40 = vld [vmem:[#allocation9 + $0x174] ss:$8 sps:$4 sm:$0xff]  }
0x10be   : > { %v6798_v41 = vld [vmem:[#allocation9 + $0x170] ss:$8 sps:$4 sm:$0xff]  }
0x10c2   : > { %v3510_v42 = vpop.f32.mrb[36].mxu1 }
0x10c3   : > { %3626 = vrot.lane.b32.xlu1 %v3510_v42, %s7533_s5  ;;  %v6216_v47 = vpop.f32.mrb[37].mxu1  ;;  %v6801_v42 = vld [vmem:[#allocation11 + $0xc0] ss:$8 sps:$4 sm:$0xff]   ;;  %s8722_s5 = sld [smem:[#allocation61_spill]] }
0x10c4   : > { %v3513_v48 = vpop.f32.mrb[38].mxu1  ;;  %v6803_v47 = vld [vmem:[#allocation11 + $0xc4] ss:$8 sps:$4 sm:$0xff]  }
0x10c5   : > { %v6217_v49 = vpop.f32.mrb[39].mxu1  ;;  %v6806_v48 = vld [vmem:[#allocation11 + $0xd4] ss:$8 sps:$4 sm:$0xff]   ;;  %4253 = vmatprep.subr.bf16.mxu0 %v6803_v47 }
0x10c6   : > { %v6804_v49 = vld [vmem:[#allocation11 + $0xd0] ss:$8 sps:$4 sm:$0xff]  }
0x10ca   : > { %v3619_v50 = vpop.f32.mrb[40].mxu1 }
0x10cb   : > { %v3631_v51 = vpack.c.bf16 %v3619_v50, %v3619_v50  ;;  %v6228_v52 = vpop.f32.mrb[41].mxu1  ;;  %v6809_v50 = vld [vmem:[#allocation11 + $0xe4] ss:$8 sps:$4 sm:$0xff]  }
0x10cc   : > { %v3622_v53 = vpop.f32.mrb[42].mxu1  ;;  %v6812_v52 = vld [vmem:[#allocation11 + $0xf4] ss:$8 sps:$4 sm:$0xff]  }
0x10cd   : > { %v6229_v54 = vpop.f32.mrb[43].mxu1  ;;  %5972 = vmatprep.mubr.msk.bf16.mxu0 %vm1124_vm0, %v3631_v51  ;;  %v6807_v51 = vld [vmem:[#allocation11 + $0xe0] ss:$8 sps:$4 sm:$0xff]   ;;  %v6810_v53 = vld [vmem:[#allocation11 + $0xf0] ss:$8 sps:$4 sm:$0xff]  }
0x10ce   : > { %v6815_v54 = vld [vmem:[#allocation11 + $0x104] ss:$8 sps:$4 sm:$0xff]  }
0x1135   : > { %v3627_v55 = vpop.permute.xlu1 %3626 }
0x1136   : > { %v3629_v56 = vsel %vm1124_vm0, %v3398_v37, %v3627_v55  ;;  %v6795_v37 = vld [vmem:[#allocation9 + $0x160] ss:$8 sps:$4 sm:$0xff]  }
0x1137   : > { %v3630_v57 = vpack.c.bf16 %v3629_v56, %v3629_v56  ;;  %v6813_v55 = vld [vmem:[#allocation11 + $0x100] ss:$8 sps:$4 sm:$0xff]   ;;  %v6818_v56 = vld [vmem:[#allocation11 + $0x114] ss:$8 sps:$4 sm:$0xff]  }
0x1139   : > { %3826 = vmatmul.mubr.bf16.vlgmr.msra.gmra.mrb[44].mxu0 %v3630_v57  ;;  %v6816_v57 = vld [vmem:[#allocation11 + $0x110] ss:$8 sps:$4 sm:$0xff]  }
0x113a   : > { %4254 = vmatpush1.bf16.msra.mxu0 %v6801_v42 }
0x113b   : > { %4255 = vmatprep.subr.bf16.mxu0 %v6806_v48 }
0x113e   : > { %4256 = vmatpush1.bf16.msra.mxu0 %v6804_v49 }
0x113f   : > { %4257 = vmatprep.subr.bf16.mxu0 %v6809_v50 }
0x1142   : > { %4258 = vmatpush1.bf16.msra.mxu0 %v6807_v51 }
0x1143   : > { %4259 = vmatprep.subr.bf16.mxu0 %v6812_v52 }
0x1146   : > { %4260 = vmatpush1.bf16.msra.mxu0 %v6810_v53 }
0x1147   : > { %4261 = vmatprep.subr.bf16.mxu0 %v6815_v54 }
0x114a   : > { %4262 = vmatpush1.bf16.msra.mxu0 %v6813_v55 }
0x114b   : > { %4263 = vmatprep.subr.bf16.mxu0 %v6818_v56 }
0x114e   : > { %4264 = vmatpush1.bf16.msra.mxu0 %v6816_v57  ;;  %v6837_v57 = vld [vmem:[#allocation17 + $0x8] ss:$16 sps:$4 sm:$0xff]  }
0x114f   : > { %4265 = vmatprep.subr.bf16.mxu0 %v6821_v58  ;;  %v6839_v58 = vld [vmem:[#allocation17 + $0xc] ss:$16 sps:$4 sm:$0xff]  }
0x120c   : > { %v3827_v63 = vpop.f32.mrb[44].mxu0 }
0x120d   : > { %v3828_v0 = vadd.f32 %v3827_v63, %v3663_v60  ;;  %v3829_v3 = vpop.f32.mrb[45].mxu0  ;;  %v6819_v60 = vld [vmem:[#allocation11 + $0x120] ss:$8 sps:$4 sm:$0xff]   ;;  %v6822_v63 = vld [vmem:[#allocation11 + $0x130] ss:$8 sps:$4 sm:$0xff]  }
0x120e   : > { %v3830_v5 = vadd.f32 %v3829_v3, %v3667_v61  ;;  %v3831_v15 = vpop.f32.mrb[46].mxu0  ;;  %v6824_v61 = vld [vmem:[#allocation11 + $0x134] ss:$8 sps:$4 sm:$0xff]   ;;  %4266 = vmatpush1.bf16.msra.mxu0 %v6819_v60  ;;  %v6825_v3 = vld [vmem:[#allocation11 + $0x140] ss:$8 sps:$4 sm:$0xff]  }
0x120f   : > { %v3832_v62 = vpop.f32.mrb[47].mxu0  ;;  %v3834_v38 = vadd.f32 %v3828_v0, %v8261_v23  ;;  %v6779_v23 = vld [vmem:[#allocation9 + $0x104] ss:$8 sps:$4 sm:$0xff]   ;;  %4267 = vmatprep.subr.bf16.mxu0 %v6824_v61  ;;  %v6828_v15 = vld [vmem:[#allocation11 + $0x150] ss:$8 sps:$4 sm:$0xff]  }
0x1210   : > { %v3835_v59 = vadd.f32 %v3830_v5, %v8259_v22  ;;  %v6774_v22 = vld [vmem:[#allocation9 + $0xf0] ss:$8 sps:$4 sm:$0xff]   ;;  %v6827_v0 = vld [vmem:[#allocation11 + $0x144] ss:$8 sps:$4 sm:$0xff]   ;;  %v6830_v5 = vld [vmem:[#allocation11 + $0x154] ss:$8 sps:$4 sm:$0xff]  }
0x1211   : > { %4054 = vmatpush1.bf16.msra.mxu1 %v6774_v22  ;;  %v6840_v60 = vld [vmem:[#allocation17] ss:$16 sps:$4 sm:$0xff]   ;;  %v6842_v61 = vld [vmem:[#allocation17 + $0x4] ss:$16 sps:$4 sm:$0xff]  }
0x1212   : > { %v3840_v1 = vsel %vm1124_vm0, %v3835_v59, 0.0  ;;  %4055 = vmatprep.subr.bf16.mxu1 %v6779_v23  ;;  %4268 = vmatpush1.bf16.msra.mxu0 %v6822_v63  ;;  %v6845_v63 = vld [vmem:[#allocation17 + $0x2c] ss:$16 sps:$4 sm:$0xff]  }
0x1213   : > { %v3841_v2 = vadd.f32 %v3840_v1, %v3834_v38  ;;  %4269 = vmatprep.subr.bf16.mxu0 %v6827_v0  ;;  %v5973_v1 = vld [vmem:[%s8718_s11 + $0x2] sm:$0x3] }
0x1214   : > { %v3866_v6 = vrot.slane %v5973_v1, %v8114_v18  ;;  %v3862_v7 = vrot.slane %v5973_v1, %v8111_v16  ;;  %v6848_v0 = vld [vmem:[#allocation17 + $0x24] ss:$16 sps:$4 sm:$0xff]   ;;  %v6857_v1 = vld [vmem:[#allocation17 + $0x6c] ss:$16 sps:$4 sm:$0xff]  }
0x1215   : > { %3842 = vadd.xlane.f32.xlu0 %v3841_v2  ;;  %4056 = vmatpush1.bf16.msra.mxu1 %v6777_v11  ;;  %v3839_v2 = vld [vmem:[#allocation12 + $0x2] sm:$0x3] }
0x1216   : > { %4057 = vmatprep.subr.bf16.mxu1 %v6782_v12  ;;  %4270 = vmatpush1.bf16.msra.mxu0 %v6825_v3  ;;  %v3879_v4 = vrot.slane %v3839_v2, %v8114_v18  ;;  %v3875_v10 = vrot.slane %v3839_v2, %v8111_v16  ;;  %v6843_v3 = vld [vmem:[#allocation17 + $0x28] ss:$16 sps:$4 sm:$0xff]   ;;  %v6860_v2 = vld [vmem:[#allocation17 + $0x64] ss:$16 sps:$4 sm:$0xff]  }
0x1217   : > { %4271 = vmatprep.subr.bf16.mxu0 %v6830_v5  ;;  %v6846_v5 = vld [vmem:[#allocation17 + $0x20] ss:$16 sps:$4 sm:$0xff]  }
0x1219   : > { %4058 = vmatpush1.bf16.msra.mxu1 %v6780_v17 }
0x121a   : > { %4059 = vmatprep.subr.bf16.mxu1 %v6785_v29  ;;  %4272 = vmatpush1.bf16.msra.mxu0 %v6828_v15  ;;  %v6851_v15 = vld [vmem:[#allocation17 + $0x4c] ss:$16 sps:$4 sm:$0xff]  }
0x121d   : > { %4060 = vmatpush1.bf16.msra.mxu1 %v6783_v30 }
0x121e   : > { %4061 = vmatprep.subr.bf16.mxu1 %v6788_v33 }
0x1221   : > { %4062 = vmatpush1.bf16.msra.mxu1 %v6786_v34 }
0x1222   : > { %4063 = vmatprep.subr.bf16.mxu1 %v6791_v35 }
0x1225   : > { %4064 = vmatpush1.bf16.msra.mxu1 %v6789_v31 }
0x1226   : > { %4065 = vmatprep.subr.bf16.mxu1 %v6794_v36 }
0x1229   : > { %4066 = vmatpush1.bf16.msra.mxu1 %v6792_v32 }
0x122a   : > { %4067 = vmatprep.subr.bf16.mxu1 %v6797_v39 }
0x122d   : > { %4068 = vmatpush1.bf16.msra.mxu1 %v6795_v37 }
0x122e   : > { %4069 = vmatprep.subr.bf16.mxu1 %v6800_v40  ;;  %v6000_v40 = vld [vmem:[%s8720_s10 + $0x2] sm:$0x3] }
0x122f   : > { %v4127_v42 = vrot.slane %v6000_v40, %v8114_v18 }
0x1231   : > { %4070 = vmatpush1.bf16.msra.mxu1 %v6798_v41  ;;  %v4123_v41 = vrot.slane %v6000_v40, %v8111_v16  ;;  %v6893_v40 = vld [vmem:[#allocation17 + $0x12c] ss:$16 sps:$4 sm:$0xff]  }
0x1232   : > { %4659 = vmatprep.subr.bf16.mxu1 %v6842_v61  ;;  %v4299_v61 = vld [vmem:[#allocation15 + $0x2] sm:$0x3] }
0x12a2   : > { %v3843_v19 = vpop.xlane.xlu0 %3842 }
0x12a3   : > { %v3844_v20 = vmul.f32 0.0052083335, %v3843_v19 }
0x12a5   : > { %v8354_v21 = vsub.f32 %v3834_v38, %v3844_v20  ;;  %v8356_v28 = vsub.f32 %v3835_v59, %v3844_v20  ;;  %v6833_v20 = vld [vmem:[#allocation11 + $0x164] ss:$8 sps:$4 sm:$0xff]  }
0x12a6   : > { %4273 = vmatprep.subr.bf16.mxu0 %v6833_v20 }
0x12a7   : > { %v3847_v26 = vmul.f32 %v8354_v21, %v8354_v21  ;;  %v3848_v24 = vmul.f32 %v8356_v28, %v8356_v28 }
0x12a9   : > { %v3849_v25 = vsel %vm1124_vm0, %v3848_v24, 0.0  ;;  %v6834_v24 = vld [vmem:[#allocation11 + $0x170] ss:$8 sps:$4 sm:$0xff]  }
0x12aa   : > { %v3850_v27 = vadd.f32 %v3849_v25, %v3847_v26  ;;  %v6831_v26 = vld [vmem:[#allocation11 + $0x160] ss:$8 sps:$4 sm:$0xff]  }
0x12ab   : > { %4274 = vmatpush1.bf16.msra.mxu0 %v6831_v26 }
0x12ac   : > { %3851 = vadd.xlane.f32.xlu1 %v3850_v27 }
0x1339   : > { %v3852_v62 = vpop.xlane.xlu1 %3851 }
0x133a   : > { %v3853_v59 = vmul.f32 0.0052083335, %v3852_v62  ;;  %v6854_v62 = vld [vmem:[#allocation17 + $0x44] ss:$16 sps:$4 sm:$0xff]  }
0x133c   : > { %v3854_v38 = vadd.f32 1e-05, %v3853_v59  ;;  %v6849_v59 = vld [vmem:[#allocation17 + $0x48] ss:$16 sps:$4 sm:$0xff]  }
0x133e   : > { %6997 = vrsqrt.f32 %v3854_v38  ;;  %v6852_v38 = vld [vmem:[#allocation17 + $0x40] ss:$16 sps:$4 sm:$0xff]  }
0x1348   : > { %v6998_v45 = vpop.eup %6997 }
0x1349   : > { %v3856_v8 = vmul.f32 %v6998_v45, %v8354_v21  ;;  %v3857_v9 = vmul.f32 %v6998_v45, %v8356_v28  ;;  %v6836_v21 = vld [vmem:[#allocation11 + $0x174] ss:$8 sps:$4 sm:$0xff]   ;;  %v6863_v45 = vld [vmem:[#allocation17 + $0x8c] ss:$16 sps:$4 sm:$0xff]  }
0x134a   : > { %4275 = vmatprep.subr.bf16.mxu0 %v6836_v21  ;;  %v5974_v28 = vld [vmem:[%s8719_s12 + $0x2] sm:$0x3] }
0x134b   : > { %v3870_v22 = vmul.f32 %v3866_v6, %v3857_v9  ;;  %v3869_v23 = vmul.f32 %v3862_v7, %v3856_v8  ;;  %4276 = vmatpush1.bf16.msra.mxu0 %v6834_v24  ;;  %v3917_v25 = vrot.slane %v5974_v28, %v8111_v16  ;;  %v3921_v27 = vrot.slane %v5974_v28, %v8114_v18  ;;  %v6855_v6 = vld [vmem:[#allocation17 + $0x68] ss:$16 sps:$4 sm:$0xff]   ;;  %v6858_v7 = vld [vmem:[#allocation17 + $0x60] ss:$16 sps:$4 sm:$0xff]   ;;  %v6866_v8 = vld [vmem:[#allocation17 + $0x84] ss:$16 sps:$4 sm:$0xff]  }
0x134c   : > { %4700 = vmatprep.subr.bf16.mxu0 %v6839_v58  ;;  %v6861_v9 = vld [vmem:[#allocation17 + $0x88] ss:$16 sps:$4 sm:$0xff]  }
0x134d   : > { %v3883_v11 = vadd.f32 %v3879_v4, %v3870_v22  ;;  %v3882_v12 = vadd.f32 %v3875_v10, %v3869_v23  ;;  %v6864_v4 = vld [vmem:[#allocation17 + $0x80] ss:$16 sps:$4 sm:$0xff]   ;;  %v6869_v10 = vld [vmem:[#allocation17 + $0xac] ss:$16 sps:$4 sm:$0xff]   ;;  %v6872_v22 = vld [vmem:[#allocation17 + $0xa4] ss:$16 sps:$4 sm:$0xff]  }
0x134e   : > { %v6867_v23 = vld [vmem:[#allocation17 + $0xa8] ss:$16 sps:$4 sm:$0xff]  }
0x134f   : > { %v3885_v17 = vpack.c.bf16 %v3883_v11, %v3883_v11  ;;  %v3884_v19 = vpack.c.bf16 %v3882_v12, %v3882_v12 }
0x1351   : > { %5999 = vmatprep.mubr.msk.bf16.mxu1 %vm1124_vm0, %v3885_v17  ;;  %v6873_v17 = vld [vmem:[#allocation17 + $0xc8] ss:$16 sps:$4 sm:$0xff]  }
0x1352   : > { %4080 = vmatmul.mubr.bf16.vlgmr.msra.gmra.mrb[44].mxu1 %v3884_v19 }
0x1353   : > { %4660 = vmatpush1.bf16.msra.mxu1 %v6840_v60  ;;  %v4297_v60 = vld [vmem:[#allocation14 + $0x2] sm:$0x3] }
0x1354   : > { %4661 = vmatprep.subr.bf16.mxu1 %v6848_v0  ;;  %v4326_v0 = vrot.slane %v4297_v60, %v8114_v18 }
0x1357   : > { %4662 = vmatpush1.bf16.msra.mxu1 %v6846_v5 }
0x1358   : > { %4663 = vmatprep.subr.bf16.mxu1 %v6854_v62  ;;  %v4335_v62 = vrot.slane %v4299_v61, %v8111_v16 }
0x135b   : > { %4664 = vmatpush1.bf16.msra.mxu1 %v6852_v38 }
0x135c   : > { %4665 = vmatprep.subr.bf16.mxu1 %v6860_v2 }
0x135f   : > { %4666 = vmatpush1.bf16.msra.mxu1 %v6858_v7 }
0x1360   : > { %4667 = vmatprep.subr.bf16.mxu1 %v6866_v8  ;;  %v6909_v8 = vld [vmem:[%s8721_s16] sm:$0xff]  }
0x1363   : > { %4668 = vmatpush1.bf16.msra.mxu1 %v6864_v4  ;;  %v6911_v4 = vld [vmem:[%s8721_s16 + $0x10] sm:$0xff]  }
0x1364   : > { %4669 = vmatprep.subr.bf16.mxu1 %v6872_v22  ;;  %v6914_v22 = vld [vmem:[%s8721_s16 + $0x28] sm:$0xff]  }
0x1425   : > { %v4081_v29 = vpop.f32.mrb[44].mxu1 }
0x1426   : > { %v4082_v30 = vadd.f32 %v4081_v29, %v3917_v25  ;;  %v4083_v33 = vpop.f32.mrb[45].mxu1  ;;  %v6878_v29 = vld [vmem:[#allocation17 + $0xc4] ss:$16 sps:$4 sm:$0xff]  }
0x1427   : > { %v4084_v34 = vadd.f32 %v4083_v33, %v3921_v27  ;;  %v4085_v35 = vpop.f32.mrb[46].mxu1  ;;  %v6881_v33 = vld [vmem:[#allocation17 + $0xec] ss:$16 sps:$4 sm:$0xff]  }
0x1428   : > { %v4088_v31 = vmax.f32 %v4082_v30, 0.0  ;;  %v4086_v36 = vpop.f32.mrb[47].mxu1  ;;  %v6876_v30 = vld [vmem:[#allocation17 + $0xc0] ss:$16 sps:$4 sm:$0xff]   ;;  %v6884_v35 = vld [vmem:[#allocation17 + $0xe4] ss:$16 sps:$4 sm:$0xff]  }
0x1429   : > { %v4089_v32 = vmax.f32 %v4084_v34, 0.0  ;;  %v6879_v34 = vld [vmem:[#allocation17 + $0xe8] ss:$16 sps:$4 sm:$0xff]   ;;  %v6887_v36 = vld [vmem:[#allocation17 + $0x10c] ss:$16 sps:$4 sm:$0xff]  }
0x142a   : > { %v4090_v39 = vpack.c.bf16 %v4088_v31, %v4088_v31  ;;  %v6882_v31 = vld [vmem:[#allocation17 + $0xe0] ss:$16 sps:$4 sm:$0xff]  }
0x142b   : > { %v4091_v37 = vpack.c.bf16 %v4089_v32, %v4089_v32  ;;  %v6885_v32 = vld [vmem:[#allocation17 + $0x108] ss:$16 sps:$4 sm:$0xff]  }
0x142d   : > { %6025 = vmatprep.mubr.msk.bf16.mxu0 %vm1124_vm0, %v4091_v37  ;;  %v6890_v37 = vld [vmem:[#allocation17 + $0x104] ss:$16 sps:$4 sm:$0xff]  }
0x142e   : > { %4286 = vmatmul.mubr.bf16.vlgmr.msra.gmra.mrb[48].mxu0 %v4090_v39  ;;  %v6888_v39 = vld [vmem:[#allocation17 + $0x100] ss:$16 sps:$4 sm:$0xff]  }
0x142f   : > { %4701 = vmatpush1.bf16.msra.mxu0 %v6837_v57 }
0x1430   : > { %4702 = vmatprep.subr.bf16.mxu0 %v6845_v63  ;;  %v4322_v63 = vrot.slane %v4297_v60, %v8111_v16  ;;  %v6076_v60 = vld [vmem:[#allocation2] ss:$0 sm:$0xff] }
0x1433   : > { %4703 = vmatpush1.bf16.msra.mxu0 %v6843_v3 }
0x1434   : > { %4704 = vmatprep.subr.bf16.mxu0 %v6851_v15 }
0x1437   : > { %4705 = vmatpush1.bf16.msra.mxu0 %v6849_v59  ;;  %v4339_v59 = vrot.slane %v4299_v61, %v8114_v18 }
0x1438   : > { %4706 = vmatprep.subr.bf16.mxu0 %v6857_v1 }
0x143b   : > { %4707 = vmatpush1.bf16.msra.mxu0 %v6855_v6 }
0x143c   : > { %4708 = vmatprep.subr.bf16.mxu0 %v6863_v45 }
0x143f   : > { %4709 = vmatpush1.bf16.msra.mxu0 %v6861_v9  ;;  %v6910_v9 = vld [vmem:[%s8721_s16 + $0x8] sm:$0xff]  }
0x1440   : > { %4710 = vmatprep.subr.bf16.mxu0 %v6869_v10  ;;  %v6912_v10 = vld [vmem:[%s8721_s16 + $0x18] sm:$0xff]  }
0x1443   : > { %4711 = vmatpush1.bf16.msra.mxu0 %v6867_v23  ;;  %v6915_v23 = vld [vmem:[%s8721_s16 + $0x30] sm:$0xff]  }
0x1501   : > { %v4287_v47 = vpop.f32.mrb[48].mxu0 }
0x1502   : > { %v4288_v48 = vadd.f32 %v4287_v47, %v4123_v41  ;;  %v4289_v49 = vpop.f32.mrb[49].mxu0  ;;  %v6891_v41 = vld [vmem:[#allocation17 + $0x128] ss:$16 sps:$4 sm:$0xff]   ;;  %v6894_v47 = vld [vmem:[#allocation17 + $0x120] ss:$16 sps:$4 sm:$0xff]  }
0x1503   : > { %v4290_v50 = vadd.f32 %v4289_v49, %v4127_v42  ;;  %v4291_v51 = vpop.f32.mrb[50].mxu0  ;;  %v6896_v42 = vld [vmem:[#allocation17 + $0x124] ss:$16 sps:$4 sm:$0xff]   ;;  %v6897_v49 = vld [vmem:[#allocation17 + $0x148] ss:$16 sps:$4 sm:$0xff]  }
0x1504   : > { %v4292_v52 = vpop.f32.mrb[51].mxu0  ;;  %v4294_v54 = vadd.f32 %v4288_v48, %v3882_v12  ;;  %v6875_v12 = vld [vmem:[#allocation17 + $0xcc] ss:$16 sps:$4 sm:$0xff]   ;;  %v6902_v51 = vld [vmem:[#allocation17 + $0x144] ss:$16 sps:$4 sm:$0xff]  }
0x1505   : > { %v4295_v53 = vadd.f32 %v4290_v50, %v3883_v11  ;;  %v6870_v11 = vld [vmem:[#allocation17 + $0xa0] ss:$16 sps:$4 sm:$0xff]   ;;  %4712 = vmatprep.subr.bf16.mxu0 %v6875_v12  ;;  %v6899_v48 = vld [vmem:[#allocation17 + $0x14c] ss:$16 sps:$4 sm:$0xff]  }
0x1506   : > { %4670 = vmatpush1.bf16.msra.mxu1 %v6870_v11  ;;  %4713 = vmatpush1.bf16.msra.mxu0 %v6873_v17  ;;  %v6900_v50 = vld [vmem:[#allocation17 + $0x140] ss:$16 sps:$4 sm:$0xff]   ;;  %v6905_v52 = vld [vmem:[#allocation17 + $0x16c] ss:$16 sps:$4 sm:$0xff]  }
0x1507   : > { %v4300_v55 = vsel %vm1124_vm0, %v4295_v53, 0.0  ;;  %4671 = vmatprep.subr.bf16.mxu1 %v6878_v29  ;;  %4714 = vmatprep.subr.bf16.mxu0 %v6881_v33  ;;  %v6916_v11 = vld [vmem:[%s8721_s16 + $0x38] sm:$0xff]   ;;  %v6917_v12 = vld [vmem:[%s8721_s16 + $0x40] sm:$0xff]   ;;  %v6918_v17 = vld [vmem:[%s8721_s16 + $0x48] sm:$0xff]  }
0x1508   : > { %v4301_v56 = vadd.f32 %v4300_v55, %v4294_v54  ;;  %v6906_v55 = vld [vmem:[#allocation17 + $0x160] ss:$16 sps:$4 sm:$0xff]  }
0x150a   : > { %4302 = vadd.xlane.f32.xlu0 %v4301_v56  ;;  %4672 = vmatpush1.bf16.msra.mxu1 %v6876_v30 }
0x150b   : > { %4673 = vmatprep.subr.bf16.mxu1 %v6884_v35  ;;  %4715 = vmatpush1.bf16.msra.mxu0 %v6879_v34 }
0x150c   : > { %4716 = vmatprep.subr.bf16.mxu0 %v6887_v36 }
0x150e   : > { %4674 = vmatpush1.bf16.msra.mxu1 %v6882_v31 }
0x150f   : > { %4675 = vmatprep.subr.bf16.mxu1 %v6890_v37  ;;  %4717 = vmatpush1.bf16.msra.mxu0 %v6885_v32 }
0x1510   : > { %4718 = vmatprep.subr.bf16.mxu0 %v6893_v40 }
0x1512   : > { %4676 = vmatpush1.bf16.msra.mxu1 %v6888_v39 }
0x1513   : > { %4677 = vmatprep.subr.bf16.mxu1 %v6896_v42  ;;  %4719 = vmatpush1.bf16.msra.mxu0 %v6891_v41 }
0x1514   : > { %4720 = vmatprep.subr.bf16.mxu0 %v6899_v48 }
0x1516   : > { %4678 = vmatpush1.bf16.msra.mxu1 %v6894_v47 }
0x1517   : > { %4679 = vmatprep.subr.bf16.mxu1 %v6902_v51  ;;  %4721 = vmatpush1.bf16.msra.mxu0 %v6897_v49 }
0x1518   : > { %4722 = vmatprep.subr.bf16.mxu0 %v6905_v52 }
0x151a   : > { %4680 = vmatpush1.bf16.msra.mxu1 %v6900_v50 }
0x1597   : > { %v4303_v19 = vpop.xlane.xlu0 %4302 }
0x1598   : > { %v4304_v20 = vmul.f32 0.0052083335, %v4303_v19  ;;  %v6919_v19 = vld [vmem:[%s8721_s16 + $0x50] sm:$0xff]  }
0x159a   : > { %v4305_v26 = vsub.f32 %v4294_v54, %v4304_v20  ;;  %v4306_v21 = vsub.f32 %v4295_v53, %v4304_v20  ;;  %v6903_v53 = vld [vmem:[#allocation17 + $0x168] ss:$16 sps:$4 sm:$0xff]   ;;  %v6908_v54 = vld [vmem:[#allocation17 + $0x164] ss:$16 sps:$4 sm:$0xff]  }
0x159b   : > { %4681 = vmatprep.subr.bf16.mxu1 %v6908_v54  ;;  %4723 = vmatpush1.bf16.msra.mxu0 %v6903_v53  ;;  %v6920_v20 = vld [vmem:[%s8721_s16 + $0x58] sm:$0xff]  }
0x159c   : > { %v4307_v24 = vmul.f32 %v4305_v26, %v4305_v26  ;;  %v4308_v28 = vmul.f32 %v4306_v21, %v4306_v21  ;;  %4682 = vmatpush1.bf16.msra.mxu1 %v6906_v55 }
0x159d   : > { %4865 = vmatprep.subr.bf16.mxu1 %v7530_v13 }
0x159e   : > { %v4309_v25 = vsel %vm1124_vm0, %v4308_v28, 0.0 }
0x159f   : > { %v4310_v27 = vadd.f32 %v4309_v25, %v4307_v24 }
0x15a1   : > { %4311 = vadd.xlane.f32.xlu0 %v4310_v27 }
0x162e   : > { %v4312_v56 = vpop.xlane.xlu0 %4311 }
0x162f   : > { %v4313_v57 = vmul.f32 0.0052083335, %v4312_v56 }
0x1631   : > { %v4314_v58 = vadd.f32 1e-05, %v4313_v57 }
0x1633   : > { %6999 = vrsqrt.f32 %v4314_v58 }
0x163d   : > { %v7000_v3 = vpop.eup %6999 }
0x163e   : > { %v4316_v5 = vmul.f32 %v7000_v3, %v4305_v26  ;;  %v4317_v15 = vmul.f32 %v7000_v3, %v4306_v21  ;;  %v4394_v26 = vld [vmem:[#allocation18] sm:$0xf] }
0x163f   : > { %v4407_v21 = vrot.slane %v4394_v26, %v8143_v44  ;;  %v4411_v24 = vrot.slane %v4394_v26, %v8151_v46  ;;  %v4399_v44 = vrot.slane %v4394_v26, %v8111_v16  ;;  %v4403_v46 = vrot.slane %v4394_v26, %v8114_v18  ;;  %v6926_v26 = vld [vmem:[#allocation20 + $0x14] ss:$8 sps:$4 sm:$0xff]  }
0x1640   : > { %v4330_v38 = vmul.f32 %v4326_v0, %v4317_v15  ;;  %v4329_v1 = vmul.f32 %v4322_v63, %v4316_v5 }
0x1642   : > { %v4343_v2 = vadd.f32 %v4339_v59, %v4330_v38  ;;  %v4342_v6 = vadd.f32 %v4335_v62, %v4329_v1 }
0x1644   : > { %v4345_v7 = vpack.c.bf16 %v4343_v2, %v4343_v2  ;;  %4960 = vmatprep.subr.mxu0 %v4343_v2  ;;  %v4344_v45 = vpack.c.bf16 %v4342_v6, %v4342_v6 }
0x1646   : > { %6074 = vmatprep.mubr.msk.bf16.mxu1 %vm1124_vm0, %v4345_v7  ;;  %6075 = vmatprep.mubr.msk.bf16.mxu0 %vm1124_vm0, %v4345_v7 }
0x1647   : > { %4692 = vmatmul.mubr.bf16.vlgmr.msra.gmra.mrb[48].mxu1 %v4344_v45  ;;  %4733 = vmatmul.mubr.bf16.vlgmr.msra.gmra.mrb[52].mxu0 %v4344_v45 }
0x1648   : > { %4961 = vmatpush1.msra.mxu0 %v4342_v6  ;;  %4866 = vmatpush1.bf16.msra.mxu1 %v6909_v8 }
0x1649   : > { %4867 = vmatprep.subr.bf16.mxu1 %v7530_v13  ;;  %5024 = vmatprep.mubr.f32.mxu0 %v7531_v43  ;;  %v6913_v43 = vld [vmem:[%s8721_s16 + $0x20] sm:$0xff]  }
0x164a   : > { %5337 = vmatprep.subr.bf16.mxu0 %v7530_v13 }
0x164c   : > { %4868 = vmatpush1.bf16.msra.mxu1 %v6910_v9 }
0x164d   : > { %4869 = vmatprep.subr.bf16.mxu1 %v7530_v13 }
0x1650   : > { %4870 = vmatpush1.bf16.msra.mxu1 %v6911_v4 }
0x1651   : > { %4871 = vmatprep.subr.bf16.mxu1 %v7530_v13 }
0x1654   : > { %4872 = vmatpush1.bf16.msra.mxu1 %v6912_v10 }
0x1655   : > { %4873 = vmatprep.subr.bf16.mxu1 %v7530_v13 }
0x1658   : > { %4874 = vmatpush1.bf16.msra.mxu1 %v6913_v43 }
0x1659   : > { %4875 = vmatprep.subr.bf16.mxu1 %v7530_v13 }
0x165c   : > { %4876 = vmatpush1.bf16.msra.mxu1 %v6914_v22 }
0x165d   : > { %4877 = vmatprep.subr.bf16.mxu1 %v7530_v13 }
0x1660   : > { %4878 = vmatpush1.bf16.msra.mxu1 %v6915_v23 }
0x1661   : > { %4879 = vmatprep.subr.bf16.mxu1 %v7530_v13 }
0x1664   : > { %4880 = vmatpush1.bf16.msra.mxu1 %v6916_v11 }
0x1665   : > { %4881 = vmatprep.subr.bf16.mxu1 %v7530_v13 }
0x1668   : > { %4882 = vmatpush1.bf16.msra.mxu1 %v6917_v12 }
0x1669   : > { %4883 = vmatprep.subr.bf16.mxu1 %v7530_v13 }
0x166c   : > { %4884 = vmatpush1.bf16.msra.mxu1 %v6918_v17 }
0x166d   : > { %4885 = vmatprep.subr.bf16.mxu1 %v7530_v13 }
0x1670   : > { %4886 = vmatpush1.bf16.msra.mxu1 %v6919_v19  ;;  %v6921_v19 = vld [vmem:[#allocation20] ss:$8 sps:$4 sm:$0xff]  }
0x1671   : > { %4887 = vmatprep.subr.bf16.mxu1 %v7530_v13 }
0x1674   : > { %4888 = vmatpush1.bf16.msra.mxu1 %v6920_v20  ;;  %v6923_v20 = vld [vmem:[#allocation20 + $0x4] ss:$8 sps:$4 sm:$0xff]  }
0x1675   : > { %5192 = vmatprep.subr.bf16.mxu1 %v6923_v20 }
0x171a   : > { %v4693_v28 = vpop.f32.mrb[48].mxu1  ;;  %v4734_v25 = vpop.f32.mrb[52].mxu0 }
0x171b   : > { %v4735_v27 = vadd.f32 %v4734_v25, %v4407_v21  ;;  %v4695_v29 = vpop.f32.mrb[49].mxu1  ;;  %v4736_v30 = vpop.f32.mrb[53].mxu0  ;;  %v4694_v41 = vadd.f32 %v4693_v28, %v4399_v44  ;;  %v6924_v21 = vld [vmem:[#allocation20 + $0x10] ss:$8 sps:$4 sm:$0xff]   ;;  %v6927_v28 = vld [vmem:[#allocation20 + $0x20] ss:$8 sps:$4 sm:$0xff]  }
0x171c   : > { %v4737_v33 = vadd.f32 %v4736_v30, %v4411_v24  ;;  %v4697_v34 = vpop.f32.mrb[50].mxu1  ;;  %v4738_v35 = vpop.f32.mrb[54].mxu0  ;;  %v4696_v42 = vadd.f32 %v4695_v29, %v4403_v46  ;;  %v6929_v24 = vld [vmem:[#allocation20 + $0x24] ss:$8 sps:$4 sm:$0xff]   ;;  %v6932_v25 = vld [vmem:[#allocation20 + $0x34] ss:$8 sps:$4 sm:$0xff]  }
0x171d   : > { %v4743_v31 = vsub.f32 0.0, %v4735_v27  ;;  %v4698_v36 = vpop.f32.mrb[51].mxu1  ;;  %v4739_v32 = vpop.f32.mrb[55].mxu0  ;;  %v6930_v27 = vld [vmem:[#allocation20 + $0x30] ss:$8 sps:$4 sm:$0xff]  }
0x171e   : > { %v4744_v37 = vsub.f32 0.0, %v4737_v33  ;;  %v6935_v29 = vld [vmem:[#allocation20 + $0x44] ss:$8 sps:$4 sm:$0xff]   ;;  %v6933_v30 = vld [vmem:[#allocation20 + $0x40] ss:$8 sps:$4 sm:$0xff]  }
0x171f   : > { %v4745_v39 = vmul.f32 1.442695, %v4743_v31  ;;  %v6938_v33 = vld [vmem:[#allocation20 + $0x54] ss:$8 sps:$4 sm:$0xff]   ;;  %v6936_v34 = vld [vmem:[#allocation20 + $0x50] ss:$8 sps:$4 sm:$0xff]  }
0x1720   : > { %v4747_v40 = vmul.f32 1.442695, %v4744_v37  ;;  %v6941_v35 = vld [vmem:[#allocation20 + $0x64] ss:$8 sps:$4 sm:$0xff]   ;;  %v6939_v31 = vld [vmem:[#allocation20 + $0x60] ss:$8 sps:$4 sm:$0xff]  }
0x1721   : > { %7001 = vpow2.f32 %v4745_v39  ;;  %v6944_v36 = vld [vmem:[#allocation20 + $0x74] ss:$8 sps:$4 sm:$0xff]   ;;  %v6942_v32 = vld [vmem:[#allocation20 + $0x70] ss:$8 sps:$4 sm:$0xff]   ;;  %v6947_v37 = vld [vmem:[#allocation20 + $0x84] ss:$8 sps:$4 sm:$0xff]  }
0x1722   : > { %7003 = vpow2.f32 %v4747_v40  ;;  %v6945_v39 = vld [vmem:[#allocation20 + $0x80] ss:$8 sps:$4 sm:$0xff]   ;;  %v6950_v40 = vld [vmem:[#allocation20 + $0x94] ss:$8 sps:$4 sm:$0xff]   ;;  %v6948_v44 = vld [vmem:[#allocation20 + $0x90] ss:$8 sps:$4 sm:$0xff]  }
0x1723   : > { %7005 = vtanh.f32 %v4694_v41  ;;  %v6953_v46 = vld [vmem:[#allocation20 + $0xa4] ss:$8 sps:$4 sm:$0xff]   ;;  %v6951_v41 = vld [vmem:[#allocation20 + $0xa0] ss:$8 sps:$4 sm:$0xff]  }
0x1724   : > { %7007 = vtanh.f32 %v4696_v42 }
0x172b   : > { %v7002_v47 = vpop.eup %7001 }
0x172c   : > { %v7004_v48 = vpop.eup %7003  ;;  %v4749_v49 = vadd.f32 1.0, %v7002_v47  ;;  %v6956_v47 = vld [vmem:[#allocation20 + $0xb4] ss:$8 sps:$4 sm:$0xff]  }
0x172d   : > { %v4750_v50 = vadd.f32 1.0, %v7004_v48  ;;  %v7006_v51 = vpop.eup %7005  ;;  %v6954_v48 = vld [vmem:[#allocation20 + $0xb0] ss:$8 sps:$4 sm:$0xff]  }
0x172e   : > { %7009 = vrcp.f32 %v4749_v49  ;;  %v7008_v52 = vpop.eup %7007  ;;  %v6957_v49 = vld [vmem:[%s8722_s5] sm:$0xff]  }
0x172f   : > { %7011 = vrcp.f32 %v4750_v50  ;;  %v6958_v50 = vld [vmem:[%s8722_s5 + $0x8] sm:$0xff]  }
0x1738   : > { %v7010_v53 = vpop.eup %7009 }
0x1739   : > { %v7012_v54 = vpop.eup %7011  ;;  %v4755_v55 = vmul.f32 %v7010_v53, %v7006_v51  ;;  %v6959_v51 = vld [vmem:[%s8722_s5 + $0x10] sm:$0xff]   ;;  %v6961_v53 = vld [vmem:[%s8722_s5 + $0x20] sm:$0xff]  }
0x173a   : > { %v4756_v56 = vmul.f32 %v7012_v54, %v7008_v52  ;;  %v6960_v52 = vld [vmem:[%s8722_s5 + $0x18] sm:$0xff]   ;;  %v6962_v54 = vld [vmem:[%s8722_s5 + $0x28] sm:$0xff]  }
0x173b   : > { %v4757_v58 = vpack.c.bf16 %v4755_v55, %v4755_v55  ;;  %v6963_v55 = vld [vmem:[%s8722_s5 + $0x30] sm:$0xff]  }
0x173c   : > { %v4758_v57 = vpack.c.bf16 %v4756_v56, %v4756_v56  ;;  %v6964_v56 = vld [vmem:[%s8722_s5 + $0x38] sm:$0xff]  }
0x173e   : > { %6089 = vmatprep.mubr.msk.bf16.mxu1 %vm1124_vm0, %v4758_v57  ;;  %v6965_v57 = vld [vmem:[%s8722_s5 + $0x40] sm:$0xff]  }
0x173f   : > { %4898 = vmatmul.mubr.bf16.vlgmr.msra.gmra.mrb[52].mxu1 %v4757_v58  ;;  %v6966_v58 = vld [vmem:[%s8722_s5 + $0x48] sm:$0xff]  }
0x1740   : > { %5193 = vmatpush1.bf16.msra.mxu1 %v6921_v19 }
0x1741   : > { %5194 = vmatprep.subr.bf16.mxu1 %v6926_v26 }
0x1744   : > { %5195 = vmatpush1.bf16.msra.mxu1 %v6924_v21 }
0x1745   : > { %5196 = vmatprep.subr.bf16.mxu1 %v6929_v24 }
0x1748   : > { %5197 = vmatpush1.bf16.msra.mxu1 %v6927_v28 }
0x1749   : > { %5198 = vmatprep.subr.bf16.mxu1 %v6932_v25 }
0x174c   : > { %5199 = vmatpush1.bf16.msra.mxu1 %v6930_v27 }
0x174d   : > { %5200 = vmatprep.subr.bf16.mxu1 %v6935_v29 }
0x1750   : > { %5201 = vmatpush1.bf16.msra.mxu1 %v6933_v30 }
0x1751   : > { %5202 = vmatprep.subr.bf16.mxu1 %v6938_v33 }
0x1754   : > { %5203 = vmatpush1.bf16.msra.mxu1 %v6936_v34 }
0x1755   : > { %5204 = vmatprep.subr.bf16.mxu1 %v6941_v35 }
0x1758   : > { %5205 = vmatpush1.bf16.msra.mxu1 %v6939_v31 }
0x1759   : > { %5206 = vmatprep.subr.bf16.mxu1 %v6944_v36 }
0x175c   : > { %5207 = vmatpush1.bf16.msra.mxu1 %v6942_v32 }
0x175d   : > { %5208 = vmatprep.subr.bf16.mxu1 %v6947_v37 }
0x1760   : > { %5209 = vmatpush1.bf16.msra.mxu1 %v6945_v39 }
0x1761   : > { %5210 = vmatprep.subr.bf16.mxu1 %v6950_v40 }
0x1764   : > { %5211 = vmatpush1.bf16.msra.mxu1 %v6948_v44 }
0x1765   : > { %5212 = vmatprep.subr.bf16.mxu1 %v6953_v46 }
0x1768   : > { %5213 = vmatpush1.bf16.msra.mxu1 %v6951_v41 }
0x1769   : > { %5214 = vmatprep.subr.bf16.mxu1 %v6956_v47 }
0x176c   : > { %5215 = vmatpush1.bf16.msra.mxu1 %v6954_v48 }
0x1812   : > { %v4899_v61 = vpop.f32.mrb[52].mxu1 }
0x1813   : > { %v4900_v63 = vadd.f32 %v6076_v60, %v4899_v61  ;;  %v4901_v0 = vpop.f32.mrb[53].mxu1 }
0x1814   : > { %v4902_v3 = vpop.f32.mrb[54].mxu1 }
0x1815   : > { %v4906_v5 = vsel %vm4905_vm4, %v4900_v63, -inf  ;;  %v4903_v15 = vpop.f32.mrb[55].mxu1  ;;  %v6967_v3 = vld [vmem:[%s8722_s5 + $0x50] sm:$0xff]  }
0x1816   : > { %v4907_v62 = vrot.slane %v4906_v5, 4  ;;  %v5057_v15 = vld [vmem:[#allocation21] sm:$0x3] }
0x1818   : > { %v4908_v59 = vmax.f32 %v4906_v5, %v4907_v62  ;;  %v6968_v5 = vld [vmem:[%s8722_s5 + $0x58] sm:$0xff]   ;;  %v5182_v62 = vrot.slane %v5057_v15, %v8111_v16 }
0x181a   : > { %v4909_v38 = vrot.slane %v4908_v59, 2 }
0x181c   : > { %v4910_v1 = vmax.f32 %v4908_v59, %v4909_v38  ;;  %v5186_v59 = vrot.slane %v5057_v15, %v8114_v18 }
0x181e   : > { %v4911_v2 = vrot.slane %v4910_v1, 1 }
0x1820   : > { %v4912_v6 = vmax.f32 %v4910_v1, %v4911_v2 }
0x1822   : > { %v4913_v7 = vsub.f32 %v4900_v63, %v4912_v6 }
0x1824   : > { %v4914_v45 = vmul.f32 1.442695, %v4913_v7 }
0x1826   : > { %7013 = vpow2.f32 %v4914_v45 }
0x1830   : > { %v7014_v8 = vpop.eup %7013 }
0x1831   : > { %v4916_v9 = vsel %vm4905_vm4, %v7014_v8, 0.0 }
0x1832   : > { %v4917_v4 = vrot.slane %v4916_v9, 4 }
0x1834   : > { %v4918_v10 = vadd.f32 %v4917_v4, %v4916_v9 }
0x1836   : > { %v4919_v43 = vrot.slane %v4918_v10, 2 }
0x1838   : > { %v4920_v22 = vadd.f32 %v4919_v43, %v4918_v10  ;;  %v5261_v10 = vld [vmem:[#allocation23] sm:$0x1] }
0x183a   : > { %v4921_v23 = vrot.slane %v4920_v22, 1 }
0x183c   : > { %v4922_v11 = vadd.f32 %v4921_v23, %v4920_v22 }
0x183e   : > { %7015 = vrcp.f32 %v4922_v11 }
0x1848   : > { %v7016_v12 = vpop.eup %7015 }
0x1849   : > { %v4924_v17 = vmul.f32 %v7016_v12, %v7014_v8  ;;  %v5392_v12 = vand.u32 127, %v994_v14 }
0x184b   : > { %4925 = vxpose.xlu1.b32.start.end [1/1] (short) (narrow) %v4924_v17, 8 }
0x18cb   : > { %v4941_v42 = vpop.trf.xlu1 }
0x18cc   : > { %6090 = vmatmul.mubr.msk.f32.vlgmr.msra.gmra.mrb[56].mxu0 %vm1761_vm3, %v4941_v42 }
0x18cd   : > { %5338 = vmatpush1.bf16.msra.mxu0 %v6957_v49 }
0x18ce   : > { %5339 = vmatprep.subr.bf16.mxu0 %v7530_v13 }
0x18d1   : > { %5340 = vmatpush1.bf16.msra.mxu0 %v6958_v50 }
0x18d2   : > { %5341 = vmatprep.subr.bf16.mxu0 %v7530_v13 }
0x18d5   : > { %5342 = vmatpush1.bf16.msra.mxu0 %v6959_v51 }
0x18d6   : > { %5343 = vmatprep.subr.bf16.mxu0 %v7530_v13 }
0x18d9   : > { %5344 = vmatpush1.bf16.msra.mxu0 %v6960_v52 }
0x18da   : > { %5345 = vmatprep.subr.bf16.mxu0 %v7530_v13 }
0x18dd   : > { %5346 = vmatpush1.bf16.msra.mxu0 %v6961_v53 }
0x18de   : > { %5347 = vmatprep.subr.bf16.mxu0 %v7530_v13 }
0x18e1   : > { %5348 = vmatpush1.bf16.msra.mxu0 %v6962_v54 }
0x18e2   : > { %5349 = vmatprep.subr.bf16.mxu0 %v7530_v13 }
0x18e5   : > { %5350 = vmatpush1.bf16.msra.mxu0 %v6963_v55 }
0x18e6   : > { %5351 = vmatprep.subr.bf16.mxu0 %v7530_v13 }
0x18e9   : > { %5352 = vmatpush1.bf16.msra.mxu0 %v6964_v56 }
0x18ea   : > { %5353 = vmatprep.subr.bf16.mxu0 %v7530_v13 }
0x18ed   : > { %5354 = vmatpush1.bf16.msra.mxu0 %v6965_v57 }
0x18ee   : > { %5355 = vmatprep.subr.bf16.mxu0 %v7530_v13 }
0x18f1   : > { %5356 = vmatpush1.bf16.msra.mxu0 %v6966_v58 }
0x18f2   : > { %5357 = vmatprep.subr.bf16.mxu0 %v7530_v13 }
0x18f5   : > { %5358 = vmatpush1.bf16.msra.mxu0 %v6967_v3 }
0x18f6   : > { %5359 = vmatprep.subr.bf16.mxu0 %v7530_v13 }
0x18f9   : > { %5360 = vmatpush1.bf16.msra.mxu0 %v6968_v5 }
0x199f   : > { %v5026_v60 = vpop.f32.mrb[56].mxu0 }
0x19a0   : > { %v5028_v61 = vpop.f32.mrb[57].mxu0  ;;  %v5031_v0 = vpack.c.bf16 %v5026_v60, %v5026_v60 }
0x19a1   : > { %v5032_v63 = vpack.c.bf16 %v5028_v61, %v5028_v61 }
0x19a3   : > { %6115 = vmatprep.mubr.msk.bf16.mxu1 %vm1124_vm0, %v5032_v63 }
0x19a4   : > { %5225 = vmatmul.mubr.bf16.vlgmr.msra.gmra.mrb[56].mxu1 %v5031_v0 }
0x1a77   : > { %v5226_v38 = vpop.f32.mrb[56].mxu1 }
0x1a78   : > { %v5227_v1 = vadd.f32 %v5226_v38, %v5182_v62  ;;  %v5228_v2 = vpop.f32.mrb[57].mxu1 }
0x1a79   : > { %v5229_v6 = vadd.f32 %v5228_v2, %v5186_v59  ;;  %v5230_v7 = vpop.f32.mrb[58].mxu1 }
0x1a7a   : > { %v5233_v45 = vmax.f32 %v5227_v1, 0.0  ;;  %v5231_v8 = vpop.f32.mrb[59].mxu1 }
0x1a7b   : > { %v5234_v9 = vmax.f32 %v5229_v6, 0.0 }
0x1a7c   : > { %v5235_v4 = vpack.c.bf16 %v5233_v45, %v5233_v45 }
0x1a7d   : > { %v5236_v13 = vpack.c.bf16 %v5234_v9, %v5234_v9 }
0x1a7f   : > { %6128 = vmatprep.mubr.msk.bf16.mxu0 %vm1124_vm0, %v5236_v13 }
0x1a80   : > { %5370 = vmatmul.mubr.bf16.vlgmr.msra.gmra.mrb[60].mxu0 %v5235_v4 }
0x1b53   : > { %v5371_v16 = vpop.f32.mrb[60].mxu0 }
0x1b54   : > { %v5372_v18 = vadd.f32 %v5371_v16, %v5261_v10  ;;  %v5373_v43 = vpop.f32.mrb[61].mxu0 }
0x1b55   : > { %v5374_v22 = vpop.f32.mrb[62].mxu0 }
0x1b56   : > { %v5375_v23 = vpop.f32.mrb[63].mxu0  ;;  %v5378_v11 = vsel %vm5377_vm5, %v5372_v18, -inf  ;;  %5389 = vst.msk [vmem:[%s943_s8] sm:$0x1] %vm5377_vm5, %v5372_v18 }
0x1b57   : > { %5379 = vmax.xlane.f32.xlu0 %v5378_v11 }
0x1be4   : > { %v5380_v17 = vpop.xlane.xlu0 %5379 }
0x1be5   : > { %v5381_v19 = vsub.f32 %v5372_v18, %v5380_v17  ;;  %vm5393_vm6 = vcmp.ge.f32.partialorder %v5372_v18, %v5380_v17 }
0x1be6   : > { %v5394_v20 = vsel %vm5393_vm6, %v5392_v12, 1073741824 }
0x1be7   : > { %v5382_v26 = vmul.f32 1.442695, %v5381_v19  ;;  %v5395_v21 = vsel %vm5377_vm5, %v5394_v20, 2147483647 }
0x1be8   : > { %v5397_v24 = vshra.s32 %v5395_v21, 16  ;;  %v5396_v29 = vand.u32 65535, %v5395_v21 }
0x1be9   : > { %7017 = vpow2.f32 %v5382_v26 }
0x1bea   : > { %v5399_v28 = vcvt.s32.f32 %v5397_v24  ;;  %v5398_v30 = vcvt.s32.f32 %v5396_v29 }
0x1bec   : > { %5400 = vmin.xlane.f32.xlu0 %v5399_v28 }
0x1bf3   : > { %v7018_v25 = vpop.eup %7017 }
0x1bf4   : > { %v5384_v27 = vsel %vm5377_vm5, %v7018_v25, 0.0 }
0x1bf5   : > { %5385 = vadd.xlane.f32.xlu0 %v5384_v27 }
0x1c79   : > { %v8510_v14 = vpop.xlane.xlu0 %5400 }
0x1c7a   : > { %vm5402_vm7 = vcmp.eq.f32.partialorder %v5399_v28, %v8510_v14 }
0x1c7b   : > { %v5403_v33 = vsel %vm5402_vm7, %v5398_v30, inf }
0x1c7c   : > { %5404 = vmin.xlane.f32.xlu0 %v5403_v33 }
0x1c82   : > { %v5386_v34 = vpop.xlane.xlu0 %5385 }
0x1c83   : > { %7019 = vrcp.f32 %v5386_v34 }
0x1c8d   : > { %v7020_v35 = vpop.eup %7019 }
0x1c8e   : > { %v5388_v31 = vmul.f32 %v7020_v35, %v7018_v25 }
0x1c8f   : > { %7398 = shalt.err (!%p7395_p3)
}
0x1c90   : > { %s7399_s8 = scalar_lea.hbm %s8519_s13, 16  ;;  %s7403_s30 = scalar_lea.hbm %s8726_s26, 32 }
0x1c91   : > { %p7400_p4 = scmp.ne.s32.totalorder %s8519_s13, %s7399_s8  ;;  %p7404_p11 = scmp.lt.u32.totalorder %s8519_s13, %s8726_s26 }
0x1c92   : > { %p7405_p5 = scmp.lt.u32.totalorder %s7403_s30, %s7399_s8  ;;  %p7407_p0 = scmp.lt.u32.totalorder %s7399_s8, %s8519_s13 }
0x1c93   : > { %p7401_p7 = pnand %p7400_p4, %p8727_p9 }
0x1c94   : > { %p7406_p6 = por %p7405_p5, %p7404_p11 }
0x1c95   : > { %p7402_p8 = pneg %p7401_p7 }
0x1c96   : > { %p7408_p10 = por %p7407_p0, %p7406_p6 }
0x1c98   : > { %p7409_p13 = pnand %p7408_p10, %p7402_p8 }
0x1c9a   : > { %7412 = shalt.err (!%p7409_p13)
}
0x1c9b   : > { %6282 = dma.vmem_to_hbm [thread:$0]  (%p8727_p9), %s5433_s3, 16, %s8519_s13, %s5413_s4  }
0x1c9c   : > { %s949_s0 = scalar_lea.vmem [#allocation25], %s8502_s1  ;;  %s8728_s6 = sld [smem:[#allocation63_spill]] }
0x1c9d   : > { %5390 = vst.msk [vmem:[%s949_s0] sm:$0x1] %vm5377_vm5, %v5388_v31  ;;  %s5445_s8 = sshll.u32 %s949_s0, 4  ;;  %s5417_s28 = scalar_lea.sflag [#allocation26], %s8502_s1  ;;  %s5446_s8 = int_to_ptr.vmem [resolvable:$true] %s5445_s8 }
0x1c9e   : > { %s7413_s5 = scalar_lea.vmem %s5446_s8, 16  ;;  %s7535_s10 = smov [#allocation25]  }
0x1c9f   : > { %p7414_p12 = scmp.ne.s32.totalorder %s5446_s8, %s7413_s5  ;;  %s7417_s11 = sshll.u32 %s7535_s10, 4  ;;  %s7418_s11 = int_to_ptr.vmem [resolvable:$false] %s7417_s11 }
0x1ca0   : > { %s7419_s3 = scalar_lea.vmem %s7418_s11, 32  ;;  %p7420_p3 = scmp.lt.s32.totalorder %s5446_s8, %s7418_s11 }
0x1ca1   : > { %p7415_p1 = pnand %p7414_p12, %p8727_p9  ;;  %p7421_p4 = scmp.lt.s32.totalorder %s7419_s3, %s7413_s5 }
0x1ca2   : > { %s8729_s9 = smov %s8728_s6  ;;  %s8546_s30 = scalar_lea.hbm %s8728_s6, %s6129_s25 }
0x1ca3   : > { %p7416_p2 = pneg %p7415_p1  ;;  %p7422_p7 = por %p7421_p4, %p7420_p3 }
0x1ca5   : > { %p7423_p8 = pnand %p7422_p7, %p7416_p2 }
0x1ca7   : > { %7426 = shalt.err (!%p7423_p8)
}
0x1ca8   : > { %s7427_s18 = scalar_lea.hbm %s8546_s30, 16  ;;  %s7431_s10 = scalar_lea.hbm %s8729_s9, 32 }
0x1ca9   : > { %p7428_p11 = scmp.ne.s32.totalorder %s8546_s30, %s7427_s18  ;;  %p7432_p0 = scmp.lt.u32.totalorder %s8546_s30, %s8729_s9 }
0x1caa   : > { %p7433_p10 = scmp.lt.u32.totalorder %s7431_s10, %s7427_s18  ;;  %p7435_p12 = scmp.lt.u32.totalorder %s7427_s18, %s8546_s30 }
0x1cab   : > { %p7429_p5 = pnand %p7428_p11, %p8727_p9 }
0x1cac   : > { %p7434_p13 = por %p7433_p10, %p7432_p0 }
0x1cad   : > { %p7430_p6 = pneg %p7429_p5 }
0x1cae   : > { %p7436_p1 = por %p7435_p12, %p7434_p13 }
0x1cb0   : > { %p7437_p2 = pnand %p7436_p1, %p7430_p6 }
0x1cb2   : > { %7440 = shalt.err (!%p7437_p2)
}
0x1cb3   : > { %6283 = dma.vmem_to_hbm [thread:$0]  (%p8727_p9), %s5446_s8, 16, %s8546_s30, %s5417_s28   ;;  %v5407_v36 = vcvt.f32.s32 %v8510_v14  ;;  %vm5410_vm8 = vcmask 0  }
0x1cb4   : > { %s8730_s0 = sld [smem:[#allocation64_spill]] }
0x1cb5   : > { %v5408_v37 = vshll.u32 %v5407_v36, 16 }
0x1cba   : > { %s962_s7 = scalar_lea.vmem %s8730_s0, %s8038_s21 }
0x1d09   : > { %v5405_v32 = vpop.xlane.xlu0 %5404 }
0x1d0a   : > { %v5406_v39 = vcvt.f32.s32 %v5405_v32 }
0x1d0c   : > { %v5409_v40 = vadd.s32 %v5408_v37, %v5406_v39 }
0x1d0e   : > { %5411 = vst.msk [vmem:[%s962_s7] sm:$0x1] %vm5410_vm8, %v5409_v40 }
0x1d0f PF: > { %s8731_s2 = sld [smem:[#allocation39_spill]]  ;;  %s8732_s6 = sld [smem:[#allocation36_spill]] }
0x1d10   : > { %s8733_s3 = sld [smem:[#allocation43_spill]] }
0x1d15   : > { %p6359_p3 = scmp.ge.s32.totalorder %s8731_s2, 2  ;;  %s5460_s29 = sand.u32 1, %s8732_s6  }
0x1d16   : > { %p8734_p4 = scmp.ne.s32.totalorder %s8733_s3, 0  ;;  %s5461_s30 = scalar_lea.sflag [#allocation5], %s5460_s29 }
0x1d18   : > { %p6327_p9 = pnand %p6359_p3, %p8734_p4 }
0x1d1a   : > { %7486 = dma.done.wait (!%p6327_p9), %s5461_s30, 16  }
0x1d1b   : > { %7488 = vsyncadd (!%p6327_p9), %s5461_s30, 4294967280  ;;  %s5469_s8 = scalar_lea.sflag [#allocation26], %s5460_s29 }
0x1d1c   : > { %7490 = dma.done.wait (!%p6327_p9), %s5469_s8, 16  }
0x1d1d   : > { %7492 = vsyncadd (!%p6327_p9), %s5469_s8, 4294967280  ;;  %s8735_s3 = sld [smem:[#allocation40_spill]]  ;;  %s8736_s6 = sld [smem:[#allocation37_spill]] }
0x1d1e   : > { %s8737_s30 = sld [smem:[#allocation38_spill]]  ;;  %s8738_s7 = sld [smem:[#allocation41_spill]] }
0x1d23   : > { %p48_p7 = scmp.ge.s32.totalorder %s8735_s3, 4  }
0x1d25   :  { %50 = sbr.rel (!%p48_p7) target bundleno = 34 (0x22), region = 241 }
0x1d2c   :  { %5479 = vsyncpa [#allocation4], 1 }
0x1d2d   :  { %5481 = vsyncpa [#allocation4 + $0x1], 1 }
0x1d2e   :  { %5482 = vsyncpa [#allocation7], 1 }
0x1d2f   :  { %5483 = vsyncpa [#allocation10], 1 }
0x1d30   :  { %5484 = vsyncpa [#allocation13], 1 }
0x1d31   :  { %5485 = vsyncpa [#allocation16], 1 }
0x1d32   :  { %5486 = vsyncpa [#allocation19], 1 }
0x1d33   :  { %5487 = vsyncpa [#allocation22], 1 }
0x1d34   :  { %5488 = vsyncpa [#allocation5], 1 }
0x1d35   :  { %5490 = vsyncpa [#allocation5 + $0x1], 1 }
0x1d36   :  { %5491 = vsyncpa [#allocation26], 1 }
0x1d37   :  { %5493 = vsyncpa [#allocation26 + $0x1], 1 }

</bundles_post_ra>
